<compile_context>
chip_gen: v7x
topology: tpu7x:2x2x1
jax: 0.10.0
libtpu: 0.0.40
codegen_flags: <defaults>
</compile_context>

<pallas_src>
import jax
import jax.numpy as jnp
import numpy as np
from jax.experimental import pallas as pl
from jax.experimental.pallas import tpu as pltpu

EPS = 1e-5  # nn.BatchNorm2d default eps


# --------------------------------------------------------------------------- #
# in-kernel helpers
# --------------------------------------------------------------------------- #
def _conv3x3_im2col(a, w_ref):
    """3x3 conv, stride 1, zero pad 1, as a single im2col matmul.

    a:     (H, W, C) float32 activation (un-padded).
    w_ref: (9*C, Cout) bfloat16 weight slab, rows ordered (dh, dw, c) = HWIO.
    returns (H*W, Cout) float32 conv output (f32 MXU accumulate).
    """
    H, W, C = a.shape
    # 1-pixel zero halo, built value-side (no scratch zero-fill / copy round trip)
    zr = jnp.zeros((1, W, C), a.dtype)
    ap = jnp.concatenate([zr, a, zr], axis=0)                    # (H+2, W,   C)
    zc = jnp.zeros((H + 2, 1, C), a.dtype)
    ap = jnp.concatenate([zc, ap, zc], axis=1)                   # (H+2, W+2, C)
    # fold the 3 column taps, then the 3 row taps, into the channel (lane) dim
    cw = jnp.concatenate(
        [ap[:, 0:W, :], ap[:, 1:W + 1, :], ap[:, 2:W + 2, :]], axis=-1)  # (H+2, W, 3C)
    im2col = jnp.concatenate(
        [cw[0:H], cw[1:H + 1], cw[2:H + 2]], axis=-1)                    # (H, W, 9C)
    im2col = im2col.reshape(H * W, 9 * C)
    # single MXU matmul per conv: bf16 operands, f32 accumulate
    return jnp.dot(im2col.astype(jnp.bfloat16), w_ref[...],
                   preferred_element_type=jnp.float32)


def _partial_stats(acc):
    """Per-channel (sum, sumsq) of a (M, C) f32 accumulator -> (1, 2, C)."""
    s = jnp.sum(acc, axis=0, keepdims=True)
    ss = jnp.sum(acc * acc, axis=0, keepdims=True)
    return jnp.concatenate([s, ss], axis=0)[None]


# --------------------------------------------------------------------------- #
# kernels
# --------------------------------------------------------------------------- #
def _conv1_kernel(x_ref, w1_ref, out1_ref, stats1_ref):
    """conv1 (single im2col matmul) + per-image partial BN1 statistics."""
    _, H, W, _ = x_ref.shape
    Cout = out1_ref.shape[-1]
    acc = _conv3x3_im2col(x_ref[0], w1_ref)                      # (H*W, Cout) f32
    out1_ref[...] = acc.reshape(1, H, W, Cout)
    stats1_ref[...] = _partial_stats(acc)                        # single-pass stats


def _bn1_conv2_kernel(out1_ref, s1_ref, t1_ref, w2_ref, out2_ref, stats2_ref):
    """folded BN1 (one FMA) + ReLU + conv2 + per-image partial BN2 statistics."""
    _, H, W, C = out1_ref.shape
    a = jnp.maximum(out1_ref[0] * s1_ref[...].reshape(1, 1, C)
                    + t1_ref[...].reshape(1, 1, C), 0.0)
    acc = _conv3x3_im2col(a, w2_ref)                             # (H*W, C) f32
    out2_ref[...] = acc.reshape(1, H, W, C)
    stats2_ref[...] = _partial_stats(acc)


def _bn2_residual_kernel(out2_ref, x_ref, s2_ref, t2_ref, o_ref):
    """folded BN2 + residual add + ReLU on a lane-dense (1, H, W*C) layout."""
    y = out2_ref[...] * s2_ref[...] + t2_ref[...] + x_ref[...]
    o_ref[...] = jnp.maximum(y, 0.0)


# --------------------------------------------------------------------------- #
# wrapper
# --------------------------------------------------------------------------- #
def _fold_bn(stats, gamma, beta, count):
    """Reduce per-image partial (sum, sumsq) and fold gamma/beta into one
    per-channel scale/shift:  y = x*scale + shift  (training-mode BN,
    biased variance), matching PyTorch BatchNorm2d forward in train mode."""
    s = jnp.sum(stats[:, 0, :], axis=0)
    ss = jnp.sum(stats[:, 1, :], axis=0)
    mu = s / count
    var = ss / count - mu * mu
    inv = jax.lax.rsqrt(var + EPS)
    scale = gamma.astype(jnp.float32) * inv
    shift = beta.astype(jnp.float32) - mu * scale
    return scale, shift


@jax.jit
def basic_resnet_block(x_nchw, w1, w2, g1, b1, g2, b2):
    """x_nchw: (N, C, H, W) f32.  w1: (3,3,Cin,Cout) HWIO, w2: (3,3,Cout,Cout)."""
    x = jnp.transpose(x_nchw, (0, 2, 3, 1)).astype(jnp.float32)   # NHWC (C on lanes)
    N, H, W, Cin = x.shape
    Cout = w1.shape[-1]
    assert Cin == Cout  # residual add with downsample=None => inplanes == planes

    # weight slabs for the im2col matmul; bf16 halves weight DMA
    w1r = w1.reshape(9 * Cin, Cout).astype(jnp.bfloat16)
    w2r = w2.reshape(9 * Cout, Cout).astype(jnp.bfloat16)

    cparams = pltpu.CompilerParams(
        dimension_semantics=("parallel",),           # megacore: batch tiles split
        vmem_limit_bytes=32 * 1024 * 1024)           # safe on v7x 64 MiB/TC too

    conv_flops = 2 * N * H * W * 9 * Cin * Cout
    act_bytes = N * H * W * Cout * 4

    # ---- pass 1: conv1 + per-image partial BN1 stats --------------------- #
    out1, stats1 = pl.pallas_call(
        _conv1_kernel,
        out_shape=(jax.ShapeDtypeStruct((N, H, W, Cout), jnp.float32),
                   jax.ShapeDtypeStruct((N, 2, Cout), jnp.float32)),
        grid=(N,),
        in_specs=[pl.BlockSpec((1, H, W, Cin), lambda n: (n, 0, 0, 0)),
                  pl.BlockSpec((9 * Cin, Cout), lambda n: (0, 0))],
        out_specs=(pl.BlockSpec((1, H, W, Cout), lambda n: (n, 0, 0, 0)),
                   pl.BlockSpec((1, 2, Cout), lambda n: (n, 0, 0))),
        compiler_params=cparams,
        cost_estimate=pl.CostEstimate(
            flops=conv_flops, transcendentals=0,
            bytes_accessed=N * H * W * Cin * 4 + act_bytes + w1r.size * 2),
    )(x, w1r)

    scale1, shift1 = _fold_bn(stats1, g1, b1, jnp.float32(N * H * W))

    # ---- pass 2: folded BN1 + ReLU + conv2 + partial BN2 stats ------------ #
    out2, stats2 = pl.pallas_call(
        _bn1_conv2_kernel,
        out_shape=(jax.ShapeDtypeStruct((N, H, W, Cout), jnp.float32),
                   jax.ShapeDtypeStruct((N, 2, Cout), jnp.float32)),
        grid=(N,),
        in_specs=[pl.BlockSpec((1, H, W, Cout), lambda n: (n, 0, 0, 0)),
                  pl.BlockSpec((1, Cout), lambda n: (0, 0)),
                  pl.BlockSpec((1, Cout), lambda n: (0, 0)),
                  pl.BlockSpec((9 * Cout, Cout), lambda n: (0, 0))],
        out_specs=(pl.BlockSpec((1, H, W, Cout), lambda n: (n, 0, 0, 0)),
                   pl.BlockSpec((1, 2, Cout), lambda n: (n, 0, 0))),
        compiler_params=cparams,
        cost_estimate=pl.CostEstimate(
            flops=2 * N * H * W * 9 * Cout * Cout + 3 * N * H * W * Cout,
            transcendentals=0,
            bytes_accessed=2 * act_bytes + w2r.size * 2),
    )(out1, scale1.reshape(1, Cout), shift1.reshape(1, Cout), w2r)

    scale2, shift2 = _fold_bn(stats2, g2, b2, jnp.float32(N * H * W))

    # ---- pass 3: folded BN2 + residual + ReLU, lane-dense (W*C) layout ---- #
    out2f = out2.reshape(N, H, W * Cout)              # fold W into the lane dim
    xf = x.reshape(N, H, W * Cin)
    s2t = jnp.tile(scale2, W).reshape(1, W * Cout)    # per-channel scale tiled over W
    t2t = jnp.tile(shift2, W).reshape(1, W * Cout)

    outf = pl.pallas_call(
        _bn2_residual_kernel,
        out_shape=jax.ShapeDtypeStruct((N, H, W * Cout), jnp.float32),
        grid=(N,),
        in_specs=[pl.BlockSpec((1, H, W * Cout), lambda n: (n, 0, 0)),
                  pl.BlockSpec((1, H, W * Cout), lambda n: (n, 0, 0)),
                  pl.BlockSpec((1, W * Cout), lambda n: (0, 0)),
                  pl.BlockSpec((1, W * Cout), lambda n: (0, 0))],
        out_specs=pl.BlockSpec((1, H, W * Cout), lambda n: (n, 0, 0)),
        compiler_params=cparams,
        cost_estimate=pl.CostEstimate(
            flops=4 * N * H * W * Cout, transcendentals=0,
            bytes_accessed=3 * act_bytes),
    )(out2f, xf, s2t, t2t)

    out = outf.reshape(N, H, W, Cout)
    return jnp.transpose(out, (0, 3, 1, 2))           # back to NCHW


# --------------------------------------------------------------------------- #
# pure-JAX reference (mirrors PyTorch training-mode forward)
# --------------------------------------------------------------------------- #
def _reference(x_nchw, w1, w2, g1, b1, g2, b2):
    x = jnp.transpose(x_nchw, (0, 2, 3, 1))

    def conv(inp, w):
        return jax.lax.conv_general_dilated(
            inp, w, window_strides=(1, 1), padding=((1, 1), (1, 1)),
            dimension_numbers=("NHWC", "HWIO", "NHWC"),
            precision=jax.lax.Precision.HIGHEST)

    def bn(inp, g, b):
        mu = jnp.mean(inp, axis=(0, 1, 2), keepdims=True)
        var = jnp.mean((inp - mu) ** 2, axis=(0, 1, 2), keepdims=True)
        return (inp - mu) * jax.lax.rsqrt(var + EPS) * g + b

    out = jnp.maximum(bn(conv(x, w1), g1, b1), 0.0)
    out = bn(conv(out, w2), g2, b2)
    out = jnp.maximum(out + x, 0.0)
    return jnp.transpose(out, (0, 3, 1, 2))


if __name__ == "__main__":
    # Small shapes implied by the module: inplanes = planes (residual add).
    N, C, H, W = 2, 4, 16, 16
    key = jax.random.PRNGKey(0)
    kx, kw1, kw2, kg1, kb1, kg2, kb2 = jax.random.split(key, 7)

    x = jax.random.normal(kx, (N, C, H, W), jnp.float32)
    w1 = jax.random.normal(kw1, (3, 3, C, C), jnp.float32) * 0.3   # conv1 weight (HWIO)
    w2 = jax.random.normal(kw2, (3, 3, C, C), jnp.float32) * 0.3   # conv2 weight (HWIO)
    g1 = 1.0 + 0.1 * jax.random.normal(kg1, (C,), jnp.float32)     # bn1 gamma
    b1 = 0.1 * jax.random.normal(kb1, (C,), jnp.float32)           # bn1 beta
    g2 = 1.0 + 0.1 * jax.random.normal(kg2, (C,), jnp.float32)     # bn2 gamma
    b2 = 0.1 * jax.random.normal(kb2, (C,), jnp.float32)           # bn2 beta

    out = basic_resnet_block(x, w1, w2, g1, b1, g2, b2)
    out = jax.block_until_ready(out)

    ref = jax.block_until_ready(_reference(x, w1, w2, g1, b1, g2, b2))
    # Tolerance sized for bf16 MXU operands with f32 accumulation.
    np.testing.assert_allclose(np.asarray(out), np.asarray(ref),
                               rtol=2e-2, atol=2e-2)

    print("KERNEL_OK")
</pallas_src>

<mosaic_0001>
module attributes {stable_mosaic.version = 11 : i64} {
  func.func @_conv1_kernel(%arg0: i32, %arg1: memref<1x16x16x4xf32, #tpu.memory_space<vmem>>, %arg2: memref<36x4xbf16, #tpu.memory_space<vmem>>, %arg3: memref<1x16x16x4xf32, #tpu.memory_space<vmem>>, %arg4: memref<1x2x4xf32, #tpu.memory_space<vmem>>) attributes {dimension_semantics = [#tpu.dimension_semantics<parallel>], iteration_bounds = array<i64: 2>, scalar_prefetch = 0 : i64, scratch_operands = 0 : i64, tpu.core_type = #tpu.core_type<tc>, window_params = [{transform_indices = @transform_0, window_bounds = array<i64: 1, 16, 16, 4>}, {pipeline_mode = #tpu.pipeline_mode<synchronous>, transform_indices = @transform_1, window_bounds = array<i64: 36, 4>}, {transform_indices = @transform_2, window_bounds = array<i64: 1, 16, 16, 4>}, {transform_indices = @transform_3, window_bounds = array<i64: 1, 2, 4>}]} {
    %c0 = arith.constant 0 : index
    %c0_0 = arith.constant 0 : index
    %c0_1 = arith.constant 0 : index
    %c0_2 = arith.constant 0 : index
    %0 = vector.load %arg1[%c0, %c0_0, %c0_1, %c0_2] : memref<1x16x16x4xf32, #tpu.memory_space<vmem>>, vector<1x16x16x4xf32>
    %1 = vector.shape_cast %0 : vector<1x16x16x4xf32> to vector<16x16x4xf32>
    %cst = arith.constant 0.000000e+00 : f32
    %2 = vector.broadcast %cst : f32 to vector<1x16x4xf32>
    %3 = tpu.concatenate %2, %1, %2 in 0 : vector<1x16x4xf32>, vector<16x16x4xf32>, vector<1x16x4xf32> -> vector<18x16x4xf32>
    %cst_3 = arith.constant 0.000000e+00 : f32
    %4 = vector.broadcast %cst_3 : f32 to vector<18x1x4xf32>
    %5 = tpu.concatenate %4, %3, %4 in 1 : vector<18x1x4xf32>, vector<18x16x4xf32>, vector<18x1x4xf32> -> vector<18x18x4xf32>
    %6 = vector.extract_strided_slice %5 {offsets = [0, 0, 0], sizes = [18, 16, 4], strides = [1, 1, 1]} : vector<18x18x4xf32> to vector<18x16x4xf32>
    %7 = vector.extract_strided_slice %5 {offsets = [0, 1, 0], sizes = [18, 16, 4], strides = [1, 1, 1]} : vector<18x18x4xf32> to vector<18x16x4xf32>
    %8 = vector.extract_strided_slice %5 {offsets = [0, 2, 0], sizes = [18, 16, 4], strides = [1, 1, 1]} : vector<18x18x4xf32> to vector<18x16x4xf32>
    %9 = tpu.concatenate %6, %7, %8 in 2 : vector<18x16x4xf32>, vector<18x16x4xf32>, vector<18x16x4xf32> -> vector<18x16x12xf32>
    %10 = vector.extract_strided_slice %9 {offsets = [0, 0, 0], sizes = [16, 16, 12], strides = [1, 1, 1]} : vector<18x16x12xf32> to vector<16x16x12xf32>
    %11 = vector.extract_strided_slice %9 {offsets = [1, 0, 0], sizes = [16, 16, 12], strides = [1, 1, 1]} : vector<18x16x12xf32> to vector<16x16x12xf32>
    %12 = vector.extract_strided_slice %9 {offsets = [2, 0, 0], sizes = [16, 16, 12], strides = [1, 1, 1]} : vector<18x16x12xf32> to vector<16x16x12xf32>
    %13 = tpu.concatenate %10, %11, %12 in 2 : vector<16x16x12xf32>, vector<16x16x12xf32>, vector<16x16x12xf32> -> vector<16x16x36xf32>
    %14 = vector.shape_cast %13 : vector<16x16x36xf32> to vector<256x36xf32>
    %15 = arith.truncf %14 : vector<256x36xf32> to vector<256x36xbf16>
    %c0_4 = arith.constant 0 : index
    %c0_5 = arith.constant 0 : index
    %16 = vector.load %arg2[%c0_4, %c0_5] : memref<36x4xbf16, #tpu.memory_space<vmem>>, vector<36x4xbf16>
    %cst_6 = arith.constant dense<0.000000e+00> : vector<256x4xf32>
    %17 = tpu.matmul %15, %16, %cst_6 {dimension_numbers = #tpu.dot_dimension_numbers<[1], [0], [0], [1], [0, 0, 1, 1], [], []>} : vector<256x36xbf16>, vector<36x4xbf16>, vector<256x4xf32> -> vector<256x4xf32>
    %18 = vector.shape_cast %17 : vector<256x4xf32> to vector<1x16x16x4xf32>
    %c0_7 = arith.constant 0 : index
    %c0_8 = arith.constant 0 : index
    %c0_9 = arith.constant 0 : index
    %c0_10 = arith.constant 0 : index
    %19 = vector.load %arg3[%c0_7, %c0_8, %c0_9, %c0_10] : memref<1x16x16x4xf32, #tpu.memory_space<vmem>>, vector<1x16x16x4xf32>
    tpu.vector_store %arg3[%c0_7, %c0_8, %c0_9, %c0_10], %18 {strides = array<i32>} : memref<1x16x16x4xf32, #tpu.memory_space<vmem>>, vector<1x16x16x4xf32>,
    %cst_11 = arith.constant dense<0.000000e+00> : vector<4xf32>
    %20 = vector.multi_reduction <add>, %17, %cst_11 [0] : vector<256x4xf32> to vector<4xf32>
    %21 = vector.shape_cast %20 : vector<4xf32> to vector<1x4xf32>
    %22 = arith.mulf %17, %17 : vector<256x4xf32>
    %cst_12 = arith.constant dense<0.000000e+00> : vector<4xf32>
    %23 = vector.multi_reduction <add>, %22, %cst_12 [0] : vector<256x4xf32> to vector<4xf32>
    %24 = vector.shape_cast %23 : vector<4xf32> to vector<1x4xf32>
    %25 = tpu.concatenate %21, %24 in 0 : vector<1x4xf32>, vector<1x4xf32> -> vector<2x4xf32>
    %26 = vector.shape_cast %25 : vector<2x4xf32> to vector<1x2x4xf32>
    %c0_13 = arith.constant 0 : index
    %c0_14 = arith.constant 0 : index
    %c0_15 = arith.constant 0 : index
    %27 = vector.load %arg4[%c0_13, %c0_14, %c0_15] : memref<1x2x4xf32, #tpu.memory_space<vmem>>, vector<1x2x4xf32>
    tpu.vector_store %arg4[%c0_13, %c0_14, %c0_15], %26 {strides = array<i32>} : memref<1x2x4xf32, #tpu.memory_space<vmem>>, vector<1x2x4xf32>,
    return
  }
  func.func @transform_0(%arg0: i32) -> (i32, i32, i32, i32) {
    %c0_i32 = arith.constant 0 : i32
    %c0_i32_0 = arith.constant 0 : i32
    %c0_i32_1 = arith.constant 0 : i32
    %c0_i32_2 = arith.constant 0 : i32
    return %arg0, %c0_i32, %c0_i32_0, %c0_i32_1 : i32, i32, i32, i32
  }
  func.func @transform_1(%arg0: i32) -> (i32, i32) {
    %c0_i32 = arith.constant 0 : i32
    %c0_i32_0 = arith.constant 0 : i32
    %c0_i32_1 = arith.constant 0 : i32
    return %c0_i32, %c0_i32_0 : i32, i32
  }
  func.func @transform_2(%arg0: i32) -> (i32, i32, i32, i32) {
    %c0_i32 = arith.constant 0 : i32
    %c0_i32_0 = arith.constant 0 : i32
    %c0_i32_1 = arith.constant 0 : i32
    %c0_i32_2 = arith.constant 0 : i32
    return %arg0, %c0_i32, %c0_i32_0, %c0_i32_1 : i32, i32, i32, i32
  }
  func.func @transform_3(%arg0: i32) -> (i32, i32, i32) {
    %c0_i32 = arith.constant 0 : i32
    %c0_i32_0 = arith.constant 0 : i32
    %c0_i32_1 = arith.constant 0 : i32
    return %arg0, %c0_i32, %c0_i32_0 : i32, i32, i32
  }
}

module attributes {stable_mosaic.version = 11 : i64} {
  func.func @_bn1_conv2_kernel(%arg0: i32, %arg1: memref<1x16x16x4xf32, #tpu.memory_space<vmem>>, %arg2: memref<1x4xf32, #tpu.memory_space<vmem>>, %arg3: memref<1x4xf32, #tpu.memory_space<vmem>>, %arg4: memref<36x4xbf16, #tpu.memory_space<vmem>>, %arg5: memref<1x16x16x4xf32, #tpu.memory_space<vmem>>, %arg6: memref<1x2x4xf32, #tpu.memory_space<vmem>>) attributes {dimension_semantics = [#tpu.dimension_semantics<parallel>], iteration_bounds = array<i64: 2>, scalar_prefetch = 0 : i64, scratch_operands = 0 : i64, tpu.core_type = #tpu.core_type<tc>, window_params = [{transform_indices = @transform_0, window_bounds = array<i64: 1, 16, 16, 4>}, {pipeline_mode = #tpu.pipeline_mode<synchronous>, transform_indices = @transform_1, window_bounds = array<i64: 1, 4>}, {pipeline_mode = #tpu.pipeline_mode<synchronous>, transform_indices = @transform_2, window_bounds = array<i64: 1, 4>}, {pipeline_mode = #tpu.pipeline_mode<synchronous>, transform_indices = @transform_3, window_bounds = array<i64: 36, 4>}, {transform_indices = @transform_4, window_bounds = array<i64: 1, 16, 16, 4>}, {transform_indices = @transform_5, window_bounds = array<i64: 1, 2, 4>}]} {
    %c0 = arith.constant 0 : index
    %c0_0 = arith.constant 0 : index
    %c0_1 = arith.constant 0 : index
    %c0_2 = arith.constant 0 : index
    %0 = vector.load %arg1[%c0, %c0_0, %c0_1, %c0_2] : memref<1x16x16x4xf32, #tpu.memory_space<vmem>>, vector<1x16x16x4xf32>
    %1 = vector.shape_cast %0 : vector<1x16x16x4xf32> to vector<16x16x4xf32>
    %c0_3 = arith.constant 0 : index
    %c0_4 = arith.constant 0 : index
    %2 = vector.load %arg2[%c0_3, %c0_4] : memref<1x4xf32, #tpu.memory_space<vmem>>, vector<1x4xf32>
    %3 = vector.shape_cast %2 : vector<1x4xf32> to vector<1x1x4xf32>
    %4 = vector.broadcast %3 : vector<1x1x4xf32> to vector<16x16x4xf32>
    %5 = arith.mulf %1, %4 : vector<16x16x4xf32>
    %c0_5 = arith.constant 0 : index
    %c0_6 = arith.constant 0 : index
    %6 = vector.load %arg3[%c0_5, %c0_6] : memref<1x4xf32, #tpu.memory_space<vmem>>, vector<1x4xf32>
    %7 = vector.shape_cast %6 : vector<1x4xf32> to vector<1x1x4xf32>
    %8 = vector.broadcast %7 : vector<1x1x4xf32> to vector<16x16x4xf32>
    %9 = arith.addf %5, %8 : vector<16x16x4xf32>
    %cst = arith.constant 0.000000e+00 : f32
    %10 = vector.broadcast %cst : f32 to vector<16x16x4xf32>
    %11 = arith.maximumf %9, %10 : vector<16x16x4xf32>
    %cst_7 = arith.constant 0.000000e+00 : f32
    %12 = vector.broadcast %cst_7 : f32 to vector<1x16x4xf32>
    %13 = tpu.concatenate %12, %11, %12 in 0 : vector<1x16x4xf32>, vector<16x16x4xf32>, vector<1x16x4xf32> -> vector<18x16x4xf32>
    %cst_8 = arith.constant 0.000000e+00 : f32
    %14 = vector.broadcast %cst_8 : f32 to vector<18x1x4xf32>
    %15 = tpu.concatenate %14, %13, %14 in 1 : vector<18x1x4xf32>, vector<18x16x4xf32>, vector<18x1x4xf32> -> vector<18x18x4xf32>
    %16 = vector.extract_strided_slice %15 {offsets = [0, 0, 0], sizes = [18, 16, 4], strides = [1, 1, 1]} : vector<18x18x4xf32> to vector<18x16x4xf32>
    %17 = vector.extract_strided_slice %15 {offsets = [0, 1, 0], sizes = [18, 16, 4], strides = [1, 1, 1]} : vector<18x18x4xf32> to vector<18x16x4xf32>
    %18 = vector.extract_strided_slice %15 {offsets = [0, 2, 0], sizes = [18, 16, 4], strides = [1, 1, 1]} : vector<18x18x4xf32> to vector<18x16x4xf32>
    %19 = tpu.concatenate %16, %17, %18 in 2 : vector<18x16x4xf32>, vector<18x16x4xf32>, vector<18x16x4xf32> -> vector<18x16x12xf32>
    %20 = vector.extract_strided_slice %19 {offsets = [0, 0, 0], sizes = [16, 16, 12], strides = [1, 1, 1]} : vector<18x16x12xf32> to vector<16x16x12xf32>
    %21 = vector.extract_strided_slice %19 {offsets = [1, 0, 0], sizes = [16, 16, 12], strides = [1, 1, 1]} : vector<18x16x12xf32> to vector<16x16x12xf32>
    %22 = vector.extract_strided_slice %19 {offsets = [2, 0, 0], sizes = [16, 16, 12], strides = [1, 1, 1]} : vector<18x16x12xf32> to vector<16x16x12xf32>
    %23 = tpu.concatenate %20, %21, %22 in 2 : vector<16x16x12xf32>, vector<16x16x12xf32>, vector<16x16x12xf32> -> vector<16x16x36xf32>
    %24 = vector.shape_cast %23 : vector<16x16x36xf32> to vector<256x36xf32>
    %25 = arith.truncf %24 : vector<256x36xf32> to vector<256x36xbf16>
    %c0_9 = arith.constant 0 : index
    %c0_10 = arith.constant 0 : index
    %26 = vector.load %arg4[%c0_9, %c0_10] : memref<36x4xbf16, #tpu.memory_space<vmem>>, vector<36x4xbf16>
    %cst_11 = arith.constant dense<0.000000e+00> : vector<256x4xf32>
    %27 = tpu.matmul %25, %26, %cst_11 {dimension_numbers = #tpu.dot_dimension_numbers<[1], [0], [0], [1], [0, 0, 1, 1], [], []>} : vector<256x36xbf16>, vector<36x4xbf16>, vector<256x4xf32> -> vector<256x4xf32>
    %28 = vector.shape_cast %27 : vector<256x4xf32> to vector<1x16x16x4xf32>
    %c0_12 = arith.constant 0 : index
    %c0_13 = arith.constant 0 : index
    %c0_14 = arith.constant 0 : index
    %c0_15 = arith.constant 0 : index
    %29 = vector.load %arg5[%c0_12, %c0_13, %c0_14, %c0_15] : memref<1x16x16x4xf32, #tpu.memory_space<vmem>>, vector<1x16x16x4xf32>
    tpu.vector_store %arg5[%c0_12, %c0_13, %c0_14, %c0_15], %28 {strides = array<i32>} : memref<1x16x16x4xf32, #tpu.memory_space<vmem>>, vector<1x16x16x4xf32>,
    %cst_16 = arith.constant dense<0.000000e+00> : vector<4xf32>
    %30 = vector.multi_reduction <add>, %27, %cst_16 [0] : vector<256x4xf32> to vector<4xf32>
    %31 = vector.shape_cast %30 : vector<4xf32> to vector<1x4xf32>
    %32 = arith.mulf %27, %27 : vector<256x4xf32>
    %cst_17 = arith.constant dense<0.000000e+00> : vector<4xf32>
    %33 = vector.multi_reduction <add>, %32, %cst_17 [0] : vector<256x4xf32> to vector<4xf32>
    %34 = vector.shape_cast %33 : vector<4xf32> to vector<1x4xf32>
    %35 = tpu.concatenate %31, %34 in 0 : vector<1x4xf32>, vector<1x4xf32> -> vector<2x4xf32>
    %36 = vector.shape_cast %35 : vector<2x4xf32> to vector<1x2x4xf32>
    %c0_18 = arith.constant 0 : index
    %c0_19 = arith.constant 0 : index
    %c0_20 = arith.constant 0 : index
    %37 = vector.load %arg6[%c0_18, %c0_19, %c0_20] : memref<1x2x4xf32, #tpu.memory_space<vmem>>, vector<1x2x4xf32>
    tpu.vector_store %arg6[%c0_18, %c0_19, %c0_20], %36 {strides = array<i32>} : memref<1x2x4xf32, #tpu.memory_space<vmem>>, vector<1x2x4xf32>,
    return
  }
  func.func @transform_0(%arg0: i32) -> (i32, i32, i32, i32) {
    %c0_i32 = arith.constant 0 : i32
    %c0_i32_0 = arith.constant 0 : i32
    %c0_i32_1 = arith.constant 0 : i32
    %c0_i32_2 = arith.constant 0 : i32
    return %arg0, %c0_i32, %c0_i32_0, %c0_i32_1 : i32, i32, i32, i32
  }
  func.func @transform_1(%arg0: i32) -> (i32, i32) {
    %c0_i32 = arith.constant 0 : i32
    %c0_i32_0 = arith.constant 0 : i32
    %c0_i32_1 = arith.constant 0 : i32
    return %c0_i32, %c0_i32_0 : i32, i32
  }
  func.func @transform_2(%arg0: i32) -> (i32, i32) {
    %c0_i32 = arith.constant 0 : i32
    %c0_i32_0 = arith.constant 0 : i32
    %c0_i32_1 = arith.constant 0 : i32
    return %c0_i32, %c0_i32_0 : i32, i32
  }
  func.func @transform_3(%arg0: i32) -> (i32, i32) {
    %c0_i32 = arith.constant 0 : i32
    %c0_i32_0 = arith.constant 0 : i32
    %c0_i32_1 = arith.constant 0 : i32
    return %c0_i32, %c0_i32_0 : i32, i32
  }
  func.func @transform_4(%arg0: i32) -> (i32, i32, i32, i32) {
    %c0_i32 = arith.constant 0 : i32
    %c0_i32_0 = arith.constant 0 : i32
    %c0_i32_1 = arith.constant 0 : i32
    %c0_i32_2 = arith.constant 0 : i32
    return %arg0, %c0_i32, %c0_i32_0, %c0_i32_1 : i32, i32, i32, i32
  }
  func.func @transform_5(%arg0: i32) -> (i32, i32, i32) {
    %c0_i32 = arith.constant 0 : i32
    %c0_i32_0 = arith.constant 0 : i32
    %c0_i32_1 = arith.constant 0 : i32
    return %arg0, %c0_i32, %c0_i32_0 : i32, i32, i32
  }
}

module attributes {stable_mosaic.version = 11 : i64} {
  func.func @_bn2_residual_kernel(%arg0: i32, %arg1: memref<1x16x64xf32, #tpu.memory_space<vmem>>, %arg2: memref<1x16x64xf32, #tpu.memory_space<vmem>>, %arg3: memref<1x64xf32, #tpu.memory_space<vmem>>, %arg4: memref<1x64xf32, #tpu.memory_space<vmem>>, %arg5: memref<1x16x64xf32, #tpu.memory_space<vmem>>) attributes {dimension_semantics = [#tpu.dimension_semantics<parallel>], iteration_bounds = array<i64: 2>, scalar_prefetch = 0 : i64, scratch_operands = 0 : i64, tpu.core_type = #tpu.core_type<tc>, window_params = [{transform_indices = @transform_0, window_bounds = array<i64: 1, 16, 64>}, {transform_indices = @transform_1, window_bounds = array<i64: 1, 16, 64>}, {pipeline_mode = #tpu.pipeline_mode<synchronous>, transform_indices = @transform_2, window_bounds = array<i64: 1, 64>}, {pipeline_mode = #tpu.pipeline_mode<synchronous>, transform_indices = @transform_3, window_bounds = array<i64: 1, 64>}, {transform_indices = @transform_4, window_bounds = array<i64: 1, 16, 64>}]} {
    %c0 = arith.constant 0 : index
    %c0_0 = arith.constant 0 : index
    %c0_1 = arith.constant 0 : index
    %0 = vector.load %arg1[%c0, %c0_0, %c0_1] : memref<1x16x64xf32, #tpu.memory_space<vmem>>, vector<1x16x64xf32>
    %c0_2 = arith.constant 0 : index
    %c0_3 = arith.constant 0 : index
    %1 = vector.load %arg3[%c0_2, %c0_3] : memref<1x64xf32, #tpu.memory_space<vmem>>, vector<1x64xf32>
    %2 = vector.shape_cast %1 : vector<1x64xf32> to vector<1x1x64xf32>
    %3 = vector.broadcast %2 : vector<1x1x64xf32> to vector<1x16x64xf32>
    %4 = arith.mulf %0, %3 : vector<1x16x64xf32>
    %c0_4 = arith.constant 0 : index
    %c0_5 = arith.constant 0 : index
    %5 = vector.load %arg4[%c0_4, %c0_5] : memref<1x64xf32, #tpu.memory_space<vmem>>, vector<1x64xf32>
    %6 = vector.shape_cast %5 : vector<1x64xf32> to vector<1x1x64xf32>
    %7 = vector.broadcast %6 : vector<1x1x64xf32> to vector<1x16x64xf32>
    %8 = arith.addf %4, %7 : vector<1x16x64xf32>
    %c0_6 = arith.constant 0 : index
    %c0_7 = arith.constant 0 : index
    %c0_8 = arith.constant 0 : index
    %9 = vector.load %arg2[%c0_6, %c0_7, %c0_8] : memref<1x16x64xf32, #tpu.memory_space<vmem>>, vector<1x16x64xf32>
    %10 = arith.addf %8, %9 : vector<1x16x64xf32>
    %cst = arith.constant 0.000000e+00 : f32
    %11 = vector.broadcast %cst : f32 to vector<1x16x64xf32>
    %12 = arith.maximumf %10, %11 : vector<1x16x64xf32>
    %c0_9 = arith.constant 0 : index
    %c0_10 = arith.constant 0 : index
    %c0_11 = arith.constant 0 : index
    %13 = vector.load %arg5[%c0_9, %c0_10, %c0_11] : memref<1x16x64xf32, #tpu.memory_space<vmem>>, vector<1x16x64xf32>
    tpu.vector_store %arg5[%c0_9, %c0_10, %c0_11], %12 {strides = array<i32>} : memref<1x16x64xf32, #tpu.memory_space<vmem>>, vector<1x16x64xf32>,
    return
  }
  func.func @transform_0(%arg0: i32) -> (i32, i32, i32) {
    %c0_i32 = arith.constant 0 : i32
    %c0_i32_0 = arith.constant 0 : i32
    %c0_i32_1 = arith.constant 0 : i32
    return %arg0, %c0_i32, %c0_i32_0 : i32, i32, i32
  }
  func.func @transform_1(%arg0: i32) -> (i32, i32, i32) {
    %c0_i32 = arith.constant 0 : i32
    %c0_i32_0 = arith.constant 0 : i32
    %c0_i32_1 = arith.constant 0 : i32
    return %arg0, %c0_i32, %c0_i32_0 : i32, i32, i32
  }
  func.func @transform_2(%arg0: i32) -> (i32, i32) {
    %c0_i32 = arith.constant 0 : i32
    %c0_i32_0 = arith.constant 0 : i32
    %c0_i32_1 = arith.constant 0 : i32
    return %c0_i32, %c0_i32_0 : i32, i32
  }
  func.func @transform_3(%arg0: i32) -> (i32, i32) {
    %c0_i32 = arith.constant 0 : i32
    %c0_i32_0 = arith.constant 0 : i32
    %c0_i32_1 = arith.constant 0 : i32
    return %c0_i32, %c0_i32_0 : i32, i32
  }
  func.func @transform_4(%arg0: i32) -> (i32, i32, i32) {
    %c0_i32 = arith.constant 0 : i32
    %c0_i32_0 = arith.constant 0 : i32
    %c0_i32_1 = arith.constant 0 : i32
    return %arg0, %c0_i32, %c0_i32_0 : i32, i32, i32
  }
}

</mosaic_0001>

<bundles_post_ra>
// kernel: tile.13
= control target key start
LH: loop header
LB: loop body
LE: loop exit
PB: predicated region body
PF: predicated region fallthrough
CT: control target
= control target key end

     0   :  { %s28_s0 = inlined_call_operand.vmem [shape: f32[4], index: 0, kind: input, shape index: {}]   ;;  %s29_s1 = inlined_call_operand.vmem [shape: f32[16,4], index: 1, kind: output, shape index: {}]  }
   0x1   :  { %v4_v0 = vld [vmem:[%s28_s0] ss:$0 sm:$0xff] }
   0x2   :  { %5 = vst [vmem:[%s29_s1] sm:$0xff] %v4_v0  ;;  %8 = vst [vmem:[%s29_s1 + $0x8] sm:$0xff] %v4_v0 }

// kernel: tile.14
= control target key start
LH: loop header
LB: loop body
LE: loop exit
PB: predicated region body
PF: predicated region fallthrough
CT: control target
= control target key end

     0   :  { %s131_s10 = smov 60   ;;  %s132_s11 = smov 52   ;;  %vm3_vm0 = vcmask 31744   ;;  %vm9_vm1 = vcmask 523744   ;;  %vm15_vm2 = vcmask 490944   ;;  %vm21_vm3 = vcmask 458144   ;;  %s207_s0 = inlined_call_operand.vmem [shape: f32[16,4], index: 0, kind: input, shape index: {}]   ;;  %s208_s1 = inlined_call_operand.vmem [shape: f32[1,64], index: 1, kind: output, shape index: {}]  }
   0x1   :  { %v101_v0 = vld [vmem:[%s207_s0 + $0xf] sm:$0x1]   ;;  %v103_v1 = vld [vmem:[%s207_s0 + $0xd] sm:$0x1]   ;;  %v102_v2 = vld [vmem:[%s207_s0 + $0xe] sm:$0x1]  }
   0x2   :  { %7 = vrot.lane.b32.xlu0 %v101_v0, %s131_s10  ;;  %19 = vrot.lane.b32.xlu1 %v103_v1, %s132_s11  ;;  %v104_v3 = vld [vmem:[%s207_s0 + $0xc] sm:$0x1]   ;;  %s133_s16 = smov 56   ;;  %s134_s17 = smov 48   ;;  %v105_v4 = vld [vmem:[%s207_s0 + $0xb] sm:$0x1]  }
   0x3   :  { %v106_v5 = vld [vmem:[%s207_s0 + $0xa] sm:$0x1]   ;;  %v2_v6 = vld [vmem:[%s207_s0] sm:$0x1]   ;;  %s135_s24 = smov 44   ;;  %s136_s25 = smov 40  }
   0x4   :  { %4 = vst.msk [vmem:[#allocation0] sm:$0x1] %vm3_vm0, %v2_v6   ;;  %v107_v7 = vld [vmem:[%s207_s0 + $0x9] sm:$0x1]   ;;  %v108_v8 = vld [vmem:[%s207_s0 + $0x8] sm:$0x1]  }
   0x5   :  { %s137_s30 = smov 36   ;;  %s138_s2 = smov 32   ;;  %v109_v9 = vld [vmem:[%s207_s0 + $0x7] sm:$0x1]   ;;  %v110_v10 = vld [vmem:[%s207_s0 + $0x6] sm:$0x1]  }
   0x6   :  { %13 = vrot.lane.b32.xlu0 %v102_v2, %s133_s16  ;;  %25 = vrot.lane.b32.xlu1 %v104_v3, %s134_s17  ;;  %s139_s7 = smov 28   ;;  %s140_s8 = smov 24   ;;  %v111_v11 = vld [vmem:[%s207_s0 + $0x5] sm:$0x1]   ;;  %v112_v12 = vld [vmem:[%s207_s0 + $0x4] sm:$0x1]  }
   0x7   :  { %s141_s13 = smov 20   ;;  %s142_s14 = smov 16   ;;  %v113_v13 = vld [vmem:[%s207_s0 + $0x3] sm:$0x1]   ;;  %v114_v14 = vld [vmem:[%s207_s0 + $0x2] sm:$0x1]  }
   0x8   :  { %s143_s19 = smov 12   ;;  %s144_s20 = smov 8   ;;  %v115_v15 = vld [vmem:[%s207_s0 + $0x1] sm:$0x1]   ;;  %vm27_vm4 = vcmask 425344   ;;  %vm33_vm5 = vcmask 392544  }
   0x9   :  { %s145_s0 = smov 4   ;;  %vm39_vm6 = vcmask 359744   ;;  %vm45_vm7 = vcmask 326944   ;;  %vm51_vm8 = vcmask 294144   ;;  %vm57_vm9 = vcmask 261344  }
   0xa   :  { %31 = vrot.lane.b32.xlu0 %v105_v4, %s135_s24  ;;  %37 = vrot.lane.b32.xlu1 %v106_v5, %s136_s25  ;;  %vm63_vm10 = vcmask 228544   ;;  %vm69_vm11 = vcmask 195744   ;;  %vm75_vm12 = vcmask 162944   ;;  %vm81_vm13 = vcmask 130144  }
   0xb   :  { %vm87_vm14 = vcmask 97344   ;;  %vm93_vm15 = vcmask 64544  }
   0xe   :  { %43 = vrot.lane.b32.xlu0 %v107_v7, %s137_s30  ;;  %49 = vrot.lane.b32.xlu1 %v108_v8, %s138_s2 }
  0x12   :  { %55 = vrot.lane.b32.xlu0 %v109_v9, %s139_s7  ;;  %61 = vrot.lane.b32.xlu1 %v110_v10, %s140_s8 }
  0x16   :  { %67 = vrot.lane.b32.xlu0 %v111_v11, %s141_s13  ;;  %73 = vrot.lane.b32.xlu1 %v112_v12, %s142_s14 }
  0x1a   :  { %79 = vrot.lane.b32.xlu0 %v113_v13, %s143_s19  ;;  %85 = vrot.lane.b32.xlu1 %v114_v14, %s144_s20 }
  0x1e   :  { %91 = vrot.lane.b32.xlu0 %v115_v15, %s145_s0 }
  0x74   :  { %v8_v16 = vpop.permute.xlu0 %7   ;;  %v20_v17 = vpop.permute.xlu1 %19  }
  0x75   :  { %10 = vst.msk [vmem:[#allocation0] sm:$0x1] %vm9_vm1, %v8_v16  }
  0x78   :  { %v14_v18 = vpop.permute.xlu0 %13   ;;  %v26_v19 = vpop.permute.xlu1 %25  }
  0x79   :  { %16 = vst.msk [vmem:[#allocation0] sm:$0x1] %vm15_vm2, %v14_v18  }
  0x7a   :  { %22 = vst.msk [vmem:[#allocation0] sm:$0x1] %vm21_vm3, %v20_v17  }
  0x7b   :  { %28 = vst.msk [vmem:[#allocation0] sm:$0x1] %vm27_vm4, %v26_v19  }
  0x7c   :  { %v32_v20 = vpop.permute.xlu0 %31   ;;  %v38_v21 = vpop.permute.xlu1 %37  }
  0x7d   :  { %34 = vst.msk [vmem:[#allocation0] sm:$0x1] %vm33_vm5, %v32_v20  }
  0x7e   :  { %40 = vst.msk [vmem:[#allocation0] sm:$0x1] %vm39_vm6, %v38_v21  }
  0x80   :  { %v44_v22 = vpop.permute.xlu0 %43   ;;  %v50_v23 = vpop.permute.xlu1 %49  }
  0x81   :  { %46 = vst.msk [vmem:[#allocation0] sm:$0x1] %vm45_vm7, %v44_v22  }
  0x82   :  { %52 = vst.msk [vmem:[#allocation0] sm:$0x1] %vm51_vm8, %v50_v23  }
  0x84   :  { %v56_v24 = vpop.permute.xlu0 %55   ;;  %v62_v25 = vpop.permute.xlu1 %61  }
  0x85   :  { %58 = vst.msk [vmem:[#allocation0] sm:$0x1] %vm57_vm9, %v56_v24  }
  0x86   :  { %64 = vst.msk [vmem:[#allocation0] sm:$0x1] %vm63_vm10, %v62_v25  }
  0x88   :  { %v68_v26 = vpop.permute.xlu0 %67   ;;  %v74_v27 = vpop.permute.xlu1 %73  }
  0x89   :  { %70 = vst.msk [vmem:[#allocation0] sm:$0x1] %vm69_vm11, %v68_v26  }
  0x8a   :  { %76 = vst.msk [vmem:[#allocation0] sm:$0x1] %vm75_vm12, %v74_v27  }
  0x8c   :  { %v80_v28 = vpop.permute.xlu0 %79   ;;  %v86_v29 = vpop.permute.xlu1 %85  }
  0x8d   :  { %82 = vst.msk [vmem:[#allocation0] sm:$0x1] %vm81_vm13, %v80_v28  }
  0x8e   :  { %88 = vst.msk [vmem:[#allocation0] sm:$0x1] %vm87_vm14, %v86_v29  }
  0x90   :  { %v92_v30 = vpop.permute.xlu0 %91  }
  0x91   :  { %94 = vst.msk [vmem:[#allocation0] sm:$0x1] %vm93_vm15, %v92_v30  }
  0x98   :  { %v98_v31 = vld [vmem:[#allocation0] sm:$0x1] }
  0x99   :  { %100 = vst [vmem:[%s208_s1] sm:$0x1] %v98_v31 }

// kernel: basic_resnet_block.5
= control target key start
LH: loop header
LB: loop body
LE: loop exit
PB: predicated region body
PF: predicated region fallthrough
CT: control target
= control target key end

     0   :  { %s373_s15 = smov 0   ;;  %s399_s0 = inlined_call_operand.vmem [shape: f32[2,16,64], index: 0, kind: input, shape index: {}]   ;;  %s400_s1 = inlined_call_operand.vmem [shape: f32[2,16,64], index: 1, kind: input, shape index: {}]   ;;  %s401_s2 = inlined_call_operand.vmem [shape: f32[1,64], index: 2, kind: input, shape index: {}]   ;;  %s402_s3 = inlined_call_operand.vmem [shape: f32[1,64], index: 3, kind: input, shape index: {}]   ;;  %s403_s4 = inlined_call_operand.vmem [shape: f32[2,16,64], index: 4, kind: output, shape index: {}]  }
   0x1 LB: > { %s314_s16 = sadd.s32 4294967295, %s346_s15   ;;  %p318_p0 = scmp.ge.s32.totalorder %s346_s15, 1  ;;  %s346_s15 = sphi %s373_s15, %s14_s15  }
   0x2   : > { %p172_p1 = scmp.lt.s32.totalorder %s346_s15, 3 }
   0x4   : > { %p173_p2 = pnand %p318_p0, %p172_p1 }
   0x5   : > { %p203_p3 = scmp.lt.s32.totalorder (!%p173_p2), %s314_s16, 1  ;;  %v325_v0 = vld [vmem:[%s401_s2] ss:$0 sm:$0xff] (!%p173_p2)  ;;  %vm244_vm0 = vcmask (!%p173_p2), 523264  }
   0x6   : > { %176 = sbr.rel (%p173_p2) target bundleno = 26 (0x1a), region = 36  ;;  %v326_v3 = vld [vmem:[%s402_s3] ss:$0 sm:$0xff] (!%p173_p2) }
   0xd   : > { %s405_s16 = smov (!%p203_p3, %s314_s16), 1 }
   0xe   : > { %s329_s17 = sshll.u32 %s405_s16, 4 }
   0xf   : > { %s207_s22 = scalar_lea.vmem %s399_s0, %s329_s17  ;;  %s212_s25 = scalar_lea.vmem %s400_s1, %s329_s17 }
  0x10   : > { %v218_v1 = vld [vmem:[%s207_s22] sm:$0xff]  ;;  %v219_v2 = vld [vmem:[%s207_s22 + $0x8] sm:$0xff]  ;;  %s217_s30 = scalar_lea.vmem %s403_s4, %s329_s17 }
  0x11   : > { %v227_v4 = vmul.f32 %v325_v0, %v218_v1  ;;  %v228_v5 = vmul.f32 %v325_v0, %v219_v2  ;;  %v238_v6 = vld [vmem:[%s212_s25] sm:$0xff]  ;;  %v239_v7 = vld [vmem:[%s212_s25 + $0x8] sm:$0xff] }
  0x13   : > { %v236_v8 = vadd.f32 %v326_v3, %v227_v4  ;;  %v237_v9 = vadd.f32 %v326_v3, %v228_v5 }
  0x15   : > { %v240_v10 = vadd.f32 %v238_v6, %v236_v8  ;;  %v241_v11 = vadd.f32 %v239_v7, %v237_v9 }
  0x17   : > { %v242_v12 = vmax.f32 %v240_v10, 0.0  ;;  %v243_v13 = vmax.f32 %v241_v11, 0.0 }
  0x19   : > { %245 = vst.msk [vmem:[%s217_s30] sm:$0xff] %vm244_vm0, %v242_v12  ;;  %246 = vst.msk [vmem:[%s217_s30 + $0x8] sm:$0xff] %vm244_vm0, %v243_v13 }
  0x1a PF: > { %s14_s15 = sadd.s32 1, %s346_s15  }
  0x1b   : > { %p11_p4 = scmp.ge.s32.totalorder %s14_s15, 4  }
  0x1d   :  { %13 = sbr.rel (!%p11_p4) target bundleno = 1 (0x1), region = 69 }

// kernel: basic_resnet_block.3
= control target key start
LH: loop header
LB: loop body
LE: loop exit
PB: predicated region body
PF: predicated region fallthrough
CT: control target
= control target key end

     0   :  { %s2173_s12 = smov 0   ;;  %s3019_s0 = inlined_call_operand.vmem [shape: f32[2,16,16,4], index: 0, kind: input, shape index: {}]   ;;  %s3020_s1 = inlined_call_operand.vmem [shape: bf16[36,4], index: 1, kind: input, shape index: {}]   ;;  %s3021_s2 = inlined_call_operand.vmem [shape: f32[2,16,16,4], index: 2, kind: output, shape index: {0}]   ;;  %s3022_s3 = inlined_call_operand.vmem [shape: f32[2,2,4], index: 3, kind: output, shape index: {1}]  }
   0x1 LB: > { %s1696_s13 = sadd.s32 4294967295, %s2146_s12   ;;  %p1700_p0 = scmp.ge.s32.totalorder %s2146_s12, 1  ;;  %s2146_s12 = sphi %s2173_s12, %s14_s12  }
   0x2   : > { %p140_p1 = scmp.lt.s32.totalorder %s2146_s12, 3 }
   0x4   : > { %p141_p2 = pnand %p1700_p0, %p140_p1 }
   0x5   : > { %p168_p3 = scmp.lt.s32.totalorder (!%p141_p2), %s1696_s13, 1  ;;  %v2148_v0 = vmov (!%p141_p2), 0.0   ;;  %vm248_vm0 = vcmask (!%p141_p2), 1040384   ;;  %vm417_vm1 = vcmask (!%p141_p2), 1046528   ;;  %vm605_vm2 = vcmask (!%p141_p2), 1045504   ;;  %s2149_s18 = smov (!%p141_p2), 4  }
   0x6   : > { %144 = sbr.rel (%p141_p2) target bundleno = 574 (0x23e), region = 28  ;;  %v2181_v1 = vrot.slane (!%p141_p2), %v2148_v0, 7  ;;  %s2150_s19 = smov (!%p141_p2), 8   ;;  %vm793_vm3 = vcmask (!%p141_p2), 31744   ;;  %vm828_vm4 = vcmask (!%p141_p2), 64512   ;;  %vm1240_vm5 = vcmask (!%p141_p2), 1041408  }
   0x7   : > { %s2151_s24 = smov (!%p141_p2), 12   ;;  %s2152_s27 = smov (!%p141_p2), 24   ;;  %vm1089_vm6 = vcmask (!%p141_p2), 97280   ;;  %vm1122_vm7 = vcmask (!%p141_p2), 195584   ;;  %vm1191_vm8 = vcmask (!%p141_p2), 293888   ;;  %vm1608_vm9 = vcmask (!%p141_p2), 25600  }
   0x8   : > { %v2187_v2 = vsel (!%p141_p2), %vm248_vm0, 0.0, %v2181_v1  ;;  %v2191_v3 = vsel (!%p141_p2), %vm248_vm0, %v2181_v1, 0.0  ;;  %v419_v4 = vrot.slane (!%p141_p2), %v2181_v1, 1  ;;  %v607_v5 = vrot.slane (!%p141_p2), %v2181_v1, 2 }
   0x9   : > { %v418_v9 = vrot.slane (!%p141_p2), %v2187_v2, 1  ;;  %v421_v10 = vrot.slane (!%p141_p2), %v2191_v3, 1  ;;  %v606_v11 = vrot.slane (!%p141_p2), %v2187_v2, 2  ;;  %v609_v21 = vrot.slane (!%p141_p2), %v2191_v3, 2 }
   0xd   : > { %s3024_s13 = smov (!%p168_p3, %s1696_s13), 1 }
   0xe   : > { %s1727_s14 = sshll.u32 %s3024_s13, 8  ;;  %s1705_s4 = sshll.u32 %s3024_s13, 1 }
   0xf   : > { %s2199_s17 = scalar_lea.vmem %s3019_s0, %s1727_s14  ;;  %s2881_s30 = scalar_lea.vmem %s3021_s2, %s1727_s14 }
  0x10   : > { %v183_v6 = vld [vmem:[%s2199_s17] sm:$0xff]  ;;  %v184_v7 = vld [vmem:[%s2199_s17 + $0x8] sm:$0xff]  ;;  %v185_v8 = vld [vmem:[%s2199_s17 + $0x10] sm:$0xff]  ;;  %s181_s7 = scalar_lea.vmem %s3022_s3, %s1705_s4 }
  0x11   : > { %v251_v12 = vrot.slane %v183_v6, 7  ;;  %v252_v13 = vrot.slane %v184_v7, 7  ;;  %v186_v14 = vld [vmem:[%s2199_s17 + $0x18] sm:$0xff]  ;;  %v254_v15 = vrot.slane %v185_v8, 7  ;;  %v187_v16 = vld [vmem:[%s2199_s17 + $0x20] sm:$0xff]  ;;  %v188_v17 = vld [vmem:[%s2199_s17 + $0x28] sm:$0xff] }
  0x12   : > { %v255_v18 = vrot.slane %v186_v14, 7  ;;  %v257_v19 = vrot.slane %v187_v16, 7  ;;  %v258_v20 = vrot.slane %v188_v17, 7  ;;  %v189_v50 = vld [vmem:[%s2199_s17 + $0x30] sm:$0xff]  ;;  %v190_v55 = vld [vmem:[%s2199_s17 + $0x38] sm:$0xff]  ;;  %v191_v60 = vld [vmem:[%s2199_s17 + $0x40] sm:$0xff] }
  0x13   : > { %v2214_v22 = vsel %vm248_vm0, %v251_v12, %v252_v13  ;;  %v2217_v23 = vsel %vm248_vm0, 0.0, %v251_v12  ;;  %v367_v24 = vsel %vm248_vm0, %v252_v13, 0.0  ;;  %v2221_v25 = vsel %vm248_vm0, 0.0, %v254_v15  ;;  %v192_v13 = vld [vmem:[%s2199_s17 + $0x48] sm:$0xff] }
  0x14   : > { %v423_v26 = vrot.slane %v2217_v23, 1  ;;  %v424_v27 = vrot.slane %v2214_v22, 1  ;;  %v426_v28 = vrot.slane %v367_v24, 1  ;;  %v611_v29 = vrot.slane %v2217_v23, 2 }
  0x15   : > { %v612_v30 = vrot.slane %v2214_v22, 2  ;;  %v614_v31 = vrot.slane %v367_v24, 2  ;;  %v2228_v32 = vsel %vm248_vm0, %v254_v15, %v255_v18  ;;  %v368_v33 = vsel %vm248_vm0, %v255_v18, 0.0 }
  0x16   : > { %v425_v34 = vsel %vm417_vm1, %v423_v26, %v424_v27  ;;  %v427_v35 = vsel %vm417_vm1, %v424_v27, %v426_v28  ;;  %v428_v36 = vrot.slane %v2221_v25, 1  ;;  %v429_v37 = vrot.slane %v2228_v32, 1 }
  0x17   : > { %v1807_v38 = vpack.i.bf16 %v427_v35, %v425_v34  ;;  %v613_v39 = vsel %vm605_vm2, %v611_v29, %v612_v30  ;;  %v615_v40 = vsel %vm605_vm2, %v612_v30, %v614_v31  ;;  %v431_v41 = vrot.slane %v368_v33, 1 }
  0x18   : > { %v1817_v42 = vpack.i.bf16 %v615_v40, %v613_v39  ;;  %v430_v43 = vsel %vm417_vm1, %v428_v36, %v429_v37  ;;  %v2239_v44 = vsel %vm248_vm0, %v257_v19, %v258_v20  ;;  %v2242_v45 = vsel %vm248_vm0, 0.0, %v257_v19  ;;  %v193_v39 = vld [vmem:[%s2199_s17 + $0x50] sm:$0xff] }
  0x19   : > { %1808 = vrot.lane.b32.xlu0 %v1807_v38, %s2149_s18  ;;  %v432_v46 = vsel %vm417_vm1, %v429_v37, %v431_v41  ;;  %v369_v47 = vsel %vm248_vm0, %v258_v20, 0.0  ;;  %v433_v48 = vrot.slane %v2242_v45, 1  ;;  %v434_v49 = vrot.slane %v2239_v44, 1 }
  0x1a   : > { %1818 = vrot.lane.b32.xlu1 %v1817_v42, %s2150_s19  ;;  %v1812_v51 = vpack.i.bf16 %v432_v46, %v430_v43  ;;  %v436_v52 = vrot.slane %v369_v47, 1  ;;  %v616_v53 = vrot.slane %v2221_v25, 2  ;;  %v617_v54 = vrot.slane %v2228_v32, 2  ;;  %v194_v46 = vld [vmem:[%s2199_s17 + $0x58] sm:$0xff] }
  0x1b   : > { %v435_v56 = vsel %vm417_vm1, %v433_v48, %v434_v49  ;;  %v619_v57 = vrot.slane %v368_v33, 2  ;;  %v621_v58 = vrot.slane %v2242_v45, 2  ;;  %v622_v59 = vrot.slane %v2239_v44, 2 }
  0x1c   : > { %v437_v61 = vsel %vm417_vm1, %v434_v49, %v436_v52  ;;  %v618_v62 = vsel %vm605_vm2, %v616_v53, %v617_v54  ;;  %v624_v63 = vrot.slane %v369_v47, 2  ;;  %v260_v0 = vrot.slane %v189_v50, 7  ;;  %v196_v52 = vld [vmem:[%s2199_s17 + $0x68] sm:$0xff] }
  0x1d   : > { %1813 = vrot.lane.b32.xlu0 %v1812_v51, %s2149_s18  ;;  %v1822_v6 = vpack.i.bf16 %v437_v61, %v435_v56  ;;  %v620_v7 = vsel %vm605_vm2, %v617_v54, %v619_v57  ;;  %v623_v8 = vsel %vm605_vm2, %v621_v58, %v622_v59  ;;  %v261_v12 = vrot.slane %v190_v55, 7  ;;  %v195_v51 = vld [vmem:[%s2199_s17 + $0x60] sm:$0xff] }
  0x1e   : > { %v1827_v14 = vpack.i.bf16 %v620_v7, %v618_v62  ;;  %v625_v15 = vsel %vm605_vm2, %v622_v59, %v624_v63  ;;  %v2266_v16 = vsel %vm248_vm0, 0.0, %v260_v0  ;;  %v263_v17 = vrot.slane %v191_v60, 7 }
  0x1f   : > { %1823 = vrot.lane.b32.xlu1 %v1822_v6, %s2149_s18  ;;  %v1832_v18 = vpack.i.bf16 %v625_v15, %v623_v8  ;;  %v2270_v19 = vsel %vm248_vm0, %v260_v0, %v261_v12  ;;  %v370_v20 = vsel %vm248_vm0, %v261_v12, 0.0  ;;  %v438_v24 = vrot.slane %v2266_v16, 1 }
  0x20   : > { %v439_v26 = vrot.slane %v2270_v19, 1  ;;  %v441_v27 = vrot.slane %v370_v20, 1  ;;  %v264_v28 = vrot.slane %v192_v13, 7  ;;  %v2276_v29 = vsel %vm248_vm0, 0.0, %v263_v17 }
  0x21   : > { %1828 = vrot.lane.b32.xlu0 %v1827_v14, %s2150_s19  ;;  %v443_v30 = vrot.slane %v2276_v29, 1  ;;  %v626_v31 = vrot.slane %v2266_v16, 2  ;;  %v627_v33 = vrot.slane %v2270_v19, 2  ;;  %v629_v34 = vrot.slane %v370_v20, 2 }
  0x22   : > { %v440_v35 = vsel %vm417_vm1, %v438_v24, %v439_v26  ;;  %v442_v36 = vsel %vm417_vm1, %v439_v26, %v441_v27  ;;  %v2285_v37 = vsel %vm248_vm0, %v263_v17, %v264_v28  ;;  %v371_v38 = vsel %vm248_vm0, %v264_v28, 0.0 }
  0x23   : > { %1833 = vrot.lane.b32.xlu1 %v1832_v18, %s2150_s19  ;;  %v1837_v40 = vpack.i.bf16 %v442_v36, %v440_v35  ;;  %v444_v41 = vrot.slane %v2285_v37, 1  ;;  %v446_v42 = vrot.slane %v371_v38, 1  ;;  %v628_v43 = vsel %vm605_vm2, %v626_v31, %v627_v33 }
  0x24   : > { %v630_v47 = vsel %vm605_vm2, %v627_v33, %v629_v34  ;;  %v631_v48 = vrot.slane %v2276_v29, 2  ;;  %v632_v49 = vrot.slane %v2285_v37, 2  ;;  %v634_v50 = vrot.slane %v371_v38, 2  ;;  %v197_v33 = vld [vmem:[%s2199_s17 + $0x70] sm:$0xff]  ;;  %v198_v34 = vld [vmem:[%s2199_s17 + $0x78] sm:$0xff] }
  0x25   : > { %1838 = vrot.lane.b32.xlu0 %v1837_v40, %s2149_s18  ;;  %v445_v53 = vsel %vm417_vm1, %v443_v30, %v444_v41  ;;  %v447_v54 = vsel %vm417_vm1, %v444_v41, %v446_v42  ;;  %v1847_v55 = vpack.i.bf16 %v630_v47, %v628_v43  ;;  %v266_v56 = vrot.slane %v193_v39, 7  ;;  %v199_v40 = vld [vmem:[%s2199_s17 + $0x80] sm:$0xff]  ;;  %v200_v41 = vld [vmem:[%s2199_s17 + $0x88] sm:$0xff] }
  0x26   : > { %v1842_v57 = vpack.i.bf16 %v447_v54, %v445_v53  ;;  %v633_v58 = vsel %vm605_vm2, %v631_v48, %v632_v49  ;;  %v635_v59 = vsel %vm605_vm2, %v632_v49, %v634_v50  ;;  %v267_v60 = vrot.slane %v194_v46, 7 }
  0x27   : > { %v1852_v61 = vpack.i.bf16 %v635_v59, %v633_v58  ;;  %v2304_v62 = vsel %vm248_vm0, 0.0, %v266_v56  ;;  %v269_v63 = vrot.slane %v195_v51, 7  ;;  %v270_v0 = vrot.slane %v196_v52, 7 }
  0x28   : > { %1843 = vrot.lane.b32.xlu1 %v1842_v57, %s2149_s18  ;;  %v2308_v6 = vsel %vm248_vm0, %v266_v56, %v267_v60  ;;  %v372_v7 = vsel %vm248_vm0, %v267_v60, 0.0  ;;  %v448_v8 = vrot.slane %v2304_v62, 1  ;;  %v636_v12 = vrot.slane %v2304_v62, 2 }
  0x29   : > { %1848 = vrot.lane.b32.xlu0 %v1847_v55, %s2150_s19  ;;  %v449_v13 = vrot.slane %v2308_v6, 1  ;;  %v451_v14 = vrot.slane %v372_v7, 1  ;;  %v2316_v15 = vsel %vm248_vm0, %v269_v63, %v270_v0  ;;  %v2319_v17 = vsel %vm248_vm0, 0.0, %v269_v63 }
  0x2a   : > { %v373_v18 = vsel %vm248_vm0, %v270_v0, 0.0  ;;  %v453_v20 = vrot.slane %v2319_v17, 1  ;;  %v454_v24 = vrot.slane %v2316_v15, 1  ;;  %v637_v26 = vrot.slane %v2308_v6, 2 }
  0x2b   : > { %v450_v27 = vsel %vm417_vm1, %v448_v8, %v449_v13  ;;  %v452_v28 = vsel %vm417_vm1, %v449_v13, %v451_v14  ;;  %v456_v30 = vrot.slane %v373_v18, 1  ;;  %v639_v31 = vrot.slane %v372_v7, 2 }
  0x2c   : > { %1853 = vrot.lane.b32.xlu1 %v1852_v61, %s2150_s19  ;;  %v1857_v35 = vpack.i.bf16 %v452_v28, %v450_v27  ;;  %v455_v36 = vsel %vm417_vm1, %v453_v20, %v454_v24  ;;  %v638_v38 = vsel %vm605_vm2, %v636_v12, %v637_v26  ;;  %v641_v39 = vrot.slane %v2319_v17, 2 }
  0x2d   : > { %v457_v42 = vsel %vm417_vm1, %v454_v24, %v456_v30  ;;  %v640_v43 = vsel %vm605_vm2, %v637_v26, %v639_v31  ;;  %v642_v46 = vrot.slane %v2316_v15, 2  ;;  %v644_v47 = vrot.slane %v373_v18, 2  ;;  %v201_v26 = vld [vmem:[%s2199_s17 + $0x90] sm:$0xff] }
  0x2e   : > { %1858 = vrot.lane.b32.xlu0 %v1857_v35, %s2149_s18  ;;  %v1862_v48 = vpack.i.bf16 %v457_v42, %v455_v36  ;;  %v1867_v49 = vpack.i.bf16 %v640_v43, %v638_v38  ;;  %v272_v50 = vrot.slane %v197_v33, 7  ;;  %v273_v51 = vrot.slane %v198_v34, 7  ;;  %v202_v33 = vld [vmem:[%s2199_s17 + $0x98] sm:$0xff] }
  0x2f   : > { %v643_v52 = vsel %vm605_vm2, %v641_v39, %v642_v46  ;;  %v645_v53 = vsel %vm605_vm2, %v642_v46, %v644_v47  ;;  %v275_v54 = vrot.slane %v199_v40, 7  ;;  %v276_v55 = vrot.slane %v200_v41, 7  ;;  %v203_v39 = vld [vmem:[%s2199_s17 + $0xa0] sm:$0xff]  ;;  %v204_v40 = vld [vmem:[%s2199_s17 + $0xa8] sm:$0xff] }
  0x30   : > { %1863 = vrot.lane.b32.xlu1 %v1862_v48, %s2149_s18  ;;  %v1872_v56 = vpack.i.bf16 %v645_v53, %v643_v52  ;;  %v2343_v57 = vsel %vm248_vm0, %v272_v50, %v273_v51  ;;  %v2346_v58 = vsel %vm248_vm0, 0.0, %v272_v50  ;;  %v374_v59 = vsel %vm248_vm0, %v273_v51, 0.0 }
  0x31   : > { %v458_v60 = vrot.slane %v2346_v58, 1  ;;  %v459_v61 = vrot.slane %v2343_v57, 1  ;;  %v461_v63 = vrot.slane %v374_v59, 1  ;;  %v2352_v0 = vsel %vm248_vm0, %v275_v54, %v276_v55 }
  0x32   : > { %1868 = vrot.lane.b32.xlu0 %v1867_v49, %s2150_s19  ;;  %v2356_v7 = vsel %vm248_vm0, 0.0, %v275_v54  ;;  %v375_v8 = vsel %vm248_vm0, %v276_v55, 0.0  ;;  %v464_v12 = vrot.slane %v2352_v0, 1  ;;  %v646_v13 = vrot.slane %v2346_v58, 2 }
  0x33   : > { %v460_v14 = vsel %vm417_vm1, %v458_v60, %v459_v61  ;;  %v462_v18 = vsel %vm417_vm1, %v459_v61, %v461_v63  ;;  %v463_v20 = vrot.slane %v2356_v7, 1  ;;  %v466_v24 = vrot.slane %v375_v8, 1 }
  0x34   : > { %1873 = vrot.lane.b32.xlu1 %v1872_v56, %s2150_s19  ;;  %v1877_v27 = vpack.i.bf16 %v462_v18, %v460_v14  ;;  %v647_v28 = vrot.slane %v2343_v57, 2  ;;  %v649_v30 = vrot.slane %v374_v59, 2  ;;  %v651_v31 = vrot.slane %v2356_v7, 2 }
  0x35   : > { %v465_v34 = vsel %vm417_vm1, %v463_v20, %v464_v12  ;;  %v467_v35 = vsel %vm417_vm1, %v464_v12, %v466_v24  ;;  %v652_v36 = vrot.slane %v2352_v0, 2  ;;  %v654_v38 = vrot.slane %v375_v8, 2 }
  0x36   : > { %1878 = vrot.lane.b32.xlu0 %v1877_v27, %s2149_s18  ;;  %v1882_v41 = vpack.i.bf16 %v467_v35, %v465_v34  ;;  %v648_v42 = vsel %vm605_vm2, %v646_v13, %v647_v28  ;;  %v650_v43 = vsel %vm605_vm2, %v647_v28, %v649_v30  ;;  %v278_v46 = vrot.slane %v201_v26, 7  ;;  %v205_v30 = vld [vmem:[%s2199_s17 + $0xb0] sm:$0xff] }
  0x37   : > { %v1887_v47 = vpack.i.bf16 %v650_v43, %v648_v42  ;;  %v653_v48 = vsel %vm605_vm2, %v651_v31, %v652_v36  ;;  %v655_v49 = vsel %vm605_vm2, %v652_v36, %v654_v38  ;;  %v279_v50 = vrot.slane %v202_v33, 7  ;;  %v206_v31 = vld [vmem:[%s2199_s17 + $0xb8] sm:$0xff]  ;;  %v207_v38 = vld [vmem:[%s2199_s17 + $0xc0] sm:$0xff] }
  0x38   : > { %1883 = vrot.lane.b32.xlu1 %v1882_v41, %s2149_s18  ;;  %v1892_v51 = vpack.i.bf16 %v655_v49, %v653_v48  ;;  %v2381_v52 = vsel %vm248_vm0, 0.0, %v278_v46  ;;  %v281_v53 = vrot.slane %v203_v39, 7  ;;  %v282_v54 = vrot.slane %v204_v40, 7  ;;  %v208_v39 = vld [vmem:[%s2199_s17 + $0xc8] sm:$0xff] }
  0x39   : > { %v2384_v55 = vsel %vm248_vm0, %v278_v46, %v279_v50  ;;  %v376_v56 = vsel %vm248_vm0, %v279_v50, 0.0  ;;  %v468_v59 = vrot.slane %v2381_v52, 1  ;;  %v656_v60 = vrot.slane %v2381_v52, 2 }
  0x3a   : > { %1888 = vrot.lane.b32.xlu0 %v1887_v47, %s2150_s19  ;;  %v469_v61 = vrot.slane %v2384_v55, 1  ;;  %v471_v63 = vrot.slane %v376_v56, 1  ;;  %v2392_v8 = vsel %vm248_vm0, %v281_v53, %v282_v54  ;;  %v2395_v12 = vsel %vm248_vm0, 0.0, %v281_v53 }
  0x3b   : > { %v377_v13 = vsel %vm248_vm0, %v282_v54, 0.0  ;;  %v473_v14 = vrot.slane %v2395_v12, 1  ;;  %v474_v18 = vrot.slane %v2392_v8, 1  ;;  %v657_v20 = vrot.slane %v2384_v55, 2 }
  0x3c   : > { %1893 = vrot.lane.b32.xlu1 %v1892_v51, %s2150_s19  ;;  %v470_v24 = vsel %vm417_vm1, %v468_v59, %v469_v61  ;;  %v472_v26 = vsel %vm417_vm1, %v469_v61, %v471_v63  ;;  %v476_v27 = vrot.slane %v377_v13, 1  ;;  %v659_v28 = vrot.slane %v376_v56, 2 }
  0x3d   : > { %v1897_v33 = vpack.i.bf16 %v472_v26, %v470_v24  ;;  %v475_v34 = vsel %vm417_vm1, %v473_v14, %v474_v18  ;;  %v658_v35 = vsel %vm605_vm2, %v656_v60, %v657_v20  ;;  %v661_v36 = vrot.slane %v2395_v12, 2 }
  0x3e   : > { %v477_v40 = vsel %vm417_vm1, %v474_v18, %v476_v27  ;;  %v660_v41 = vsel %vm605_vm2, %v657_v20, %v659_v28  ;;  %v662_v42 = vrot.slane %v2392_v8, 2  ;;  %v664_v43 = vrot.slane %v377_v13, 2 }
  0x3f   : > { %1898 = vrot.lane.b32.xlu0 %v1897_v33, %s2149_s18  ;;  %v1902_v46 = vpack.i.bf16 %v477_v40, %v475_v34  ;;  %v1907_v47 = vpack.i.bf16 %v660_v41, %v658_v35  ;;  %v284_v48 = vrot.slane %v205_v30, 7  ;;  %v285_v49 = vrot.slane %v206_v31, 7  ;;  %v209_v34 = vld [vmem:[%s2199_s17 + $0xd0] sm:$0xff]  ;;  %v210_v40 = vld [vmem:[%s2199_s17 + $0xd8] sm:$0xff] }
  0x40   : > { %v663_v50 = vsel %vm605_vm2, %v661_v36, %v662_v42  ;;  %v665_v51 = vsel %vm605_vm2, %v662_v42, %v664_v43  ;;  %v287_v53 = vrot.slane %v207_v38, 7  ;;  %v288_v54 = vrot.slane %v208_v39, 7 }
  0x41   : > { %1903 = vrot.lane.b32.xlu1 %v1902_v46, %s2149_s18  ;;  %v1912_v56 = vpack.i.bf16 %v665_v51, %v663_v50  ;;  %v2419_v59 = vsel %vm248_vm0, %v284_v48, %v285_v49  ;;  %v2422_v60 = vsel %vm248_vm0, 0.0, %v284_v48  ;;  %v378_v61 = vsel %vm248_vm0, %v285_v49, 0.0  ;;  %v212_v48 = vld [vmem:[%s2199_s17 + $0xe8] sm:$0xff] }
  0x42   : > { %v478_v63 = vrot.slane %v2422_v60, 1  ;;  %v479_v13 = vrot.slane %v2419_v59, 1  ;;  %v481_v14 = vrot.slane %v378_v61, 1  ;;  %v2428_v18 = vsel %vm248_vm0, %v287_v53, %v288_v54 }
  0x43   : > { %1908 = vrot.lane.b32.xlu0 %v1907_v47, %s2150_s19  ;;  %v2432_v20 = vsel %vm248_vm0, 0.0, %v287_v53  ;;  %v379_v24 = vsel %vm248_vm0, %v288_v54, 0.0  ;;  %v484_v26 = vrot.slane %v2428_v18, 1  ;;  %v666_v27 = vrot.slane %v2422_v60, 2  ;;  %v211_v47 = vld [vmem:[%s2199_s17 + $0xe0] sm:$0xff] }
  0x44   : > { %v480_v28 = vsel %vm417_vm1, %v478_v63, %v479_v13  ;;  %v482_v30 = vsel %vm417_vm1, %v479_v13, %v481_v14  ;;  %v483_v31 = vrot.slane %v2432_v20, 1  ;;  %v486_v33 = vrot.slane %v379_v24, 1 }
  0x45   : > { %1913 = vrot.lane.b32.xlu1 %v1912_v56, %s2150_s19  ;;  %v1917_v35 = vpack.i.bf16 %v482_v30, %v480_v28  ;;  %v667_v36 = vrot.slane %v2419_v59, 2  ;;  %v669_v38 = vrot.slane %v378_v61, 2  ;;  %v671_v39 = vrot.slane %v2432_v20, 2 }
  0x46   : > { %v485_v41 = vsel %vm417_vm1, %v483_v31, %v484_v26  ;;  %v487_v42 = vsel %vm417_vm1, %v484_v26, %v486_v33  ;;  %v672_v43 = vrot.slane %v2428_v18, 2  ;;  %v674_v46 = vrot.slane %v379_v24, 2 }
  0x47   : > { %1918 = vrot.lane.b32.xlu0 %v1917_v35, %s2149_s18  ;;  %v1922_v49 = vpack.i.bf16 %v487_v42, %v485_v41  ;;  %v668_v50 = vsel %vm605_vm2, %v666_v27, %v667_v36  ;;  %v670_v51 = vsel %vm605_vm2, %v667_v36, %v669_v38  ;;  %v290_v53 = vrot.slane %v209_v34, 7 }
  0x48   : > { %v1927_v54 = vpack.i.bf16 %v670_v51, %v668_v50  ;;  %v673_v56 = vsel %vm605_vm2, %v671_v39, %v672_v43  ;;  %v675_v61 = vsel %vm605_vm2, %v672_v43, %v674_v46  ;;  %v291_v63 = vrot.slane %v210_v40, 7 }
  0x49   : > { %1923 = vrot.lane.b32.xlu1 %v1922_v49, %s2149_s18  ;;  %v1932_v13 = vpack.i.bf16 %v675_v61, %v673_v56  ;;  %v2457_v14 = vsel %vm248_vm0, 0.0, %v290_v53  ;;  %v293_v24 = vrot.slane %v211_v47, 7  ;;  %v294_v26 = vrot.slane %v212_v48, 7  ;;  %v213_v48 = vld [vmem:[%s2199_s17 + $0xf0] sm:$0xff]  ;;  %v214_v49 = vld [vmem:[%s2199_s17 + $0xf8] sm:$0xff] }
  0x4a   : > { %v2460_v28 = vsel %vm248_vm0, %v290_v53, %v291_v63  ;;  %v380_v27 = vsel %vm248_vm0, %v291_v63, 0.0  ;;  %v488_v30 = vrot.slane %v2457_v14, 1  ;;  %v676_v31 = vrot.slane %v2457_v14, 2 }
  0x4b   : > { %1928 = vrot.lane.b32.xlu0 %v1927_v54, %s2150_s19  ;;  %v489_v33 = vrot.slane %v2460_v28, 1  ;;  %v491_v34 = vrot.slane %v380_v27, 1  ;;  %v2468_v35 = vsel %vm248_vm0, %v293_v24, %v294_v26  ;;  %v2471_v36 = vsel %vm248_vm0, 0.0, %v293_v24 }
  0x4c   : > { %v381_v38 = vsel %vm248_vm0, %v294_v26, 0.0  ;;  %v493_v39 = vrot.slane %v2471_v36, 1  ;;  %v494_v40 = vrot.slane %v2468_v35, 1  ;;  %v677_v41 = vrot.slane %v2460_v28, 2 }
  0x4d   : > { %1933 = vrot.lane.b32.xlu1 %v1932_v13, %s2150_s19  ;;  %v490_v42 = vsel %vm417_vm1, %v488_v30, %v489_v33  ;;  %v492_v43 = vsel %vm417_vm1, %v489_v33, %v491_v34  ;;  %v496_v46 = vrot.slane %v381_v38, 1  ;;  %v679_v47 = vrot.slane %v380_v27, 2 }
  0x4e   : > { %v1937_v50 = vpack.i.bf16 %v492_v43, %v490_v42  ;;  %v495_v51 = vsel %vm417_vm1, %v493_v39, %v494_v40  ;;  %v678_v53 = vsel %vm605_vm2, %v676_v31, %v677_v41  ;;  %v681_v54 = vrot.slane %v2471_v36, 2 }
  0x4f   : > { %v497_v56 = vsel %vm417_vm1, %v494_v40, %v496_v46  ;;  %v680_v61 = vsel %vm605_vm2, %v677_v41, %v679_v47  ;;  %v682_v63 = vrot.slane %v2468_v35, 2  ;;  %v684_v13 = vrot.slane %v381_v38, 2 }
  0x50   : > { %1938 = vrot.lane.b32.xlu0 %v1937_v50, %s2149_s18  ;;  %v1942_v24 = vpack.i.bf16 %v497_v56, %v495_v51  ;;  %v1947_v26 = vpack.i.bf16 %v680_v61, %v678_v53  ;;  %v296_v27 = vrot.slane %v213_v48, 7  ;;  %v297_v30 = vrot.slane %v214_v49, 7 }
  0x51   : > { %v683_v33 = vsel %vm605_vm2, %v681_v54, %v682_v63  ;;  %v685_v34 = vsel %vm605_vm2, %v682_v63, %v684_v13  ;;  %v420_v31 = vsel %vm417_vm1, %v418_v9, %v419_v4  ;;  %v422_v38 = vsel %vm417_vm1, %v419_v4, %v421_v10 }
  0x52   : > { %1943 = vrot.lane.b32.xlu1 %v1942_v24, %s2149_s18  ;;  %v1952_v39 = vpack.i.bf16 %v685_v34, %v683_v33  ;;  %v2503_v40 = vsel %vm248_vm0, %v296_v27, %v297_v30  ;;  %v2506_v41 = vsel %vm248_vm0, 0.0, %v296_v27  ;;  %v382_v42 = vsel %vm248_vm0, %v297_v30, 0.0  ;;  %v2138_v34 = vld [vmem:[%s3020_s1 + $0x8] sm:$0xff]  }
  0x53   : > { %v498_v43 = vrot.slane %v2506_v41, 1  ;;  %v499_v9 = vrot.slane %v2503_v40, 1  ;;  %v501_v46 = vrot.slane %v382_v42, 1  ;;  %v686_v47 = vrot.slane %v2506_v41, 2 }
  0x54   : > { %1948 = vrot.lane.b32.xlu0 %v1947_v26, %s2150_s19  ;;  %v687_v4 = vrot.slane %v2503_v40, 2  ;;  %v689_v10 = vrot.slane %v382_v42, 2  ;;  %v1962_v51 = vpack.i.bf16 %v422_v38, %v420_v31  ;;  %v608_v56 = vsel %vm605_vm2, %v606_v11, %v607_v5  ;;  %v2137_v11 = vld [vmem:[%s3020_s1] sm:$0xff]  }
  0x55   : > { %v500_v48 = vsel %vm417_vm1, %v498_v43, %v499_v9  ;;  %v502_v49 = vsel %vm417_vm1, %v499_v9, %v501_v46  ;;  %v610_v61 = vsel %vm605_vm2, %v607_v5, %v609_v21  ;;  %1748 = vmatprep.subr.bf16.mxu0 %v2137_v11  ;;  %1786 = vmatprep.subr.bf16.mxu1 %v2137_v11 }
  0x56   : > { %1953 = vrot.lane.b32.xlu1 %v1952_v39, %s2150_s19  ;;  %v1957_v50 = vpack.i.bf16 %v502_v49, %v500_v48  ;;  %v688_v53 = vsel %vm605_vm2, %v686_v47, %v687_v4  ;;  %v690_v54 = vsel %vm605_vm2, %v687_v4, %v689_v10  ;;  %v1972_v13 = vpack.i.bf16 %v610_v61, %v608_v56  ;;  %v2139_v4 = vld [vmem:[%s3020_s1 + $0x10] ss:$0 sps:$4 sm:$0x33]  }
  0x57   : > { %v1967_v63 = vpack.i.bf16 %v690_v54, %v688_v53  ;;  %1749 = vmatpush3.bf16.msra.mxu0 %v2137_v11  ;;  %1789 = vmatpush3.bf16.msra.mxu1 %v2137_v11  ;;  %v1242_v56 = vsel %vm1240_vm5, %v2139_v4, 0 }
  0x58   : > { %1958 = vrot.lane.b32.xlu0 %v1957_v50, %s2149_s18  ;;  %1750 = vmatprep.subr.bf16.mxu0 %v2138_v34 }
  0x59   : > { %1787 = vmatprep.subr.bf16.mxu1 %v2138_v34 }
  0x5a   : > { %1963 = vrot.lane.b32.xlu1 %v1962_v51, %s2149_s18 }
  0x5b   : > { %1751 = vmatpush3.bf16.msra.mxu0 %v2138_v34  ;;  %1790 = vmatpush3.bf16.msra.mxu1 %v2138_v34 }
  0x5c   : > { %1968 = vrot.lane.b32.xlu0 %v1967_v63, %s2150_s19  ;;  %1792 = vmatprep.subr.msk.bf16.mxu0 %vm1240_vm5, %v2139_v4 }
  0x5d   : > { %1793 = vmatprep.subr.msk.bf16.mxu1 %vm1240_vm5, %v2139_v4 }
  0x5e   : > { %1973 = vrot.lane.b32.xlu1 %v1972_v13, %s2150_s19 }
  0x5f   : > { %1753 = vmatpush3.bf16.msra.mxu0 %v1242_v56  ;;  %1791 = vmatpush3.bf16.msra.mxu1 %v1242_v56 }
  0x8b   : > { %v1809_v3 = vpop.permute.xlu0 %1808 }
  0x8c   : > { %v1811_v5 = vunpack.i.h.bf16 %v1809_v3  ;;  %v1810_v21 = vunpack.i.l.bf16 %v1809_v3  ;;  %v1819_v24 = vpop.permute.xlu1 %1818 }
  0x8d   : > { %v1821_v26 = vunpack.i.h.bf16 %v1819_v24  ;;  %v1820_v27 = vunpack.i.l.bf16 %v1819_v24 }
  0x8e   : > { %v797_v30 = vsel %vm793_vm3, %v2214_v22, %v1811_v5  ;;  %v796_v33 = vsel %vm793_vm3, %v2217_v23, %v1810_v21 }
  0x8f   : > { %v1814_v31 = vpop.permute.xlu0 %1813  ;;  %v2544_v38 = vsel %vm828_vm4, %v796_v33, %v1820_v27  ;;  %v2547_v39 = vsel %vm828_vm4, %v797_v30, %v1821_v26 }
  0x90   : > { %v1816_v42 = vunpack.i.h.bf16 %v1814_v31  ;;  %v1977_v43 = vpack.i.bf16 %v2547_v39, %v2544_v38  ;;  %v1815_v22 = vunpack.i.l.bf16 %v1814_v31 }
  0x91   : > { %v1824_v9 = vpop.permute.xlu1 %1823 }
  0x92   : > { %v1826_v23 = vunpack.i.h.bf16 %v1824_v9  ;;  %v1825_v46 = vunpack.i.l.bf16 %v1824_v9  ;;  %1978 = vrot.lane.b32.xlu0 %v1977_v43, %s2151_s24  ;;  %v799_v10 = vsel %vm793_vm3, %v2228_v32, %v1816_v42  ;;  %v798_v50 = vsel %vm793_vm3, %v2221_v25, %v1815_v22 }
  0x93   : > { %v1829_v47 = vpop.permute.xlu0 %1828 }
  0x94   : > { %v1831_v48 = vunpack.i.h.bf16 %v1829_v47  ;;  %v1830_v49 = vunpack.i.l.bf16 %v1829_v47  ;;  %v801_v51 = vsel %vm793_vm3, %v2239_v44, %v1826_v23  ;;  %v800_v53 = vsel %vm793_vm3, %v2242_v45, %v1825_v46 }
  0x95   : > { %v1834_v54 = vpop.permute.xlu1 %1833 }
  0x96   : > { %v1836_v61 = vunpack.i.h.bf16 %v1834_v54  ;;  %v1835_v63 = vunpack.i.l.bf16 %v1834_v54  ;;  %v2564_v13 = vsel %vm828_vm4, %v798_v50, %v1830_v49  ;;  %v2567_v32 = vsel %vm828_vm4, %v799_v10, %v1831_v48 }
  0x97   : > { %v1839_v25 = vpop.permute.xlu0 %1838  ;;  %v1982_v44 = vpack.i.bf16 %v2567_v32, %v2564_v13 }
  0x98   : > { %v2572_v45 = vsel %vm828_vm4, %v800_v53, %v1835_v63  ;;  %v2575_v11 = vsel %vm828_vm4, %v801_v51, %v1836_v61  ;;  %v1841_v3 = vunpack.i.h.bf16 %v1839_v25  ;;  %v1840_v5 = vunpack.i.l.bf16 %v1839_v25 }
  0x99   : > { %1983 = vrot.lane.b32.xlu1 %v1982_v44, %s2151_s24  ;;  %1988 = vrot.lane.b32.xlu0 %v1982_v44, %s2152_s27  ;;  %v1992_v30 = vpack.i.bf16 %v2575_v11, %v2572_v45 }
  0x9a   : > { %v1844_v21 = vpop.permute.xlu1 %1843  ;;  %v803_v31 = vsel %vm793_vm3, %v2270_v19, %v1841_v3  ;;  %v802_v42 = vsel %vm793_vm3, %v2266_v16, %v1840_v5 }
  0x9b   : > { %v1846_v24 = vunpack.i.h.bf16 %v1844_v21  ;;  %v1845_v26 = vunpack.i.l.bf16 %v1844_v21  ;;  %v1849_v27 = vpop.permute.xlu0 %1848 }
  0x9c   : > { %v1851_v33 = vunpack.i.h.bf16 %v1849_v27  ;;  %v1850_v34 = vunpack.i.l.bf16 %v1849_v27 }
  0x9d   : > { %1993 = vrot.lane.b32.xlu1 %v1992_v30, %s2152_s27  ;;  %1998 = vrot.lane.b32.xlu0 %v1992_v30, %s2151_s24  ;;  %v805_v43 = vsel %vm793_vm3, %v2285_v37, %v1846_v24  ;;  %v804_v22 = vsel %vm793_vm3, %v2276_v29, %v1845_v26 }
  0x9e   : > { %v1854_v9 = vpop.permute.xlu1 %1853  ;;  %v2592_v23 = vsel %vm828_vm4, %v802_v42, %v1850_v34  ;;  %v2595_v46 = vsel %vm828_vm4, %v803_v31, %v1851_v33 }
  0x9f   : > { %v1856_v19 = vunpack.i.h.bf16 %v1854_v9  ;;  %v1855_v47 = vunpack.i.l.bf16 %v1854_v9  ;;  %v2002_v16 = vpack.i.bf16 %v2595_v46, %v2592_v23 }
  0xa0   : > { %v1859_v4 = vpop.permute.xlu0 %1858 }
  0xa1   : > { %2003 = vrot.lane.b32.xlu1 %v2002_v16, %s2151_s24  ;;  %2008 = vrot.lane.b32.xlu0 %v2002_v16, %s2152_s27  ;;  %v2602_v37 = vsel %vm828_vm4, %v804_v22, %v1855_v47  ;;  %v2605_v29 = vsel %vm828_vm4, %v805_v43, %v1856_v19  ;;  %v1861_v10 = vunpack.i.h.bf16 %v1859_v4  ;;  %v1860_v48 = vunpack.i.l.bf16 %v1859_v4 }
  0xa2   : > { %v1864_v49 = vpop.permute.xlu1 %1863  ;;  %v2012_v53 = vpack.i.bf16 %v2605_v29, %v2602_v37 }
  0xa3   : > { %v1866_v50 = vunpack.i.h.bf16 %v1864_v49  ;;  %v1865_v51 = vunpack.i.l.bf16 %v1864_v49  ;;  %v807_v63 = vsel %vm793_vm3, %v2308_v6, %v1861_v10  ;;  %v806_v25 = vsel %vm793_vm3, %v2304_v62, %v1860_v48 }
  0xa4   : > { %v1869_v54 = vpop.permute.xlu0 %1868 }
  0xa5   : > { %v1871_v56 = vunpack.i.h.bf16 %v1869_v54  ;;  %v1870_v61 = vunpack.i.l.bf16 %v1869_v54  ;;  %2013 = vrot.lane.b32.xlu1 %v2012_v53, %s2152_s27  ;;  %2018 = vrot.lane.b32.xlu0 %v2012_v53, %s2151_s24  ;;  %v809_v44 = vsel %vm793_vm3, %v2316_v15, %v1866_v50  ;;  %v808_v3 = vsel %vm793_vm3, %v2319_v17, %v1865_v51 }
  0xa6   : > { %v1874_v5 = vpop.permute.xlu1 %1873 }
  0xa7   : > { %v1876_v21 = vunpack.i.h.bf16 %v1874_v5  ;;  %v1875_v24 = vunpack.i.l.bf16 %v1874_v5  ;;  %v2620_v26 = vsel %vm828_vm4, %v806_v25, %v1870_v61  ;;  %v2623_v27 = vsel %vm828_vm4, %v807_v63, %v1871_v56 }
  0xa8   : > { %v1879_v30 = vpop.permute.xlu0 %1878  ;;  %v2022_v6 = vpack.i.bf16 %v2623_v27, %v2620_v26 }
  0xa9   : > { %v1881_v62 = vunpack.i.h.bf16 %v1879_v30  ;;  %v2628_v33 = vsel %vm828_vm4, %v808_v3, %v1875_v24  ;;  %v2631_v15 = vsel %vm828_vm4, %v809_v44, %v1876_v21  ;;  %v1880_v17 = vunpack.i.l.bf16 %v1879_v30 }
  0xaa   : > { %v1884_v34 = vpop.permute.xlu1 %1883  ;;  %2023 = vrot.lane.b32.xlu1 %v2022_v6, %s2151_s24  ;;  %2028 = vrot.lane.b32.xlu0 %v2022_v6, %s2152_s27  ;;  %v2032_v22 = vpack.i.bf16 %v2631_v15, %v2628_v33 }
  0xab   : > { %v1886_v31 = vunpack.i.h.bf16 %v1884_v34  ;;  %v1885_v42 = vunpack.i.l.bf16 %v1884_v34  ;;  %v811_v9 = vsel %vm793_vm3, %v2343_v57, %v1881_v62  ;;  %v810_v16 = vsel %vm793_vm3, %v2346_v58, %v1880_v17 }
  0xac   : > { %v1889_v43 = vpop.permute.xlu0 %1888 }
  0xad   : > { %v1891_v19 = vunpack.i.h.bf16 %v1889_v43  ;;  %v1890_v47 = vunpack.i.l.bf16 %v1889_v43  ;;  %v813_v4 = vsel %vm793_vm3, %v2352_v0, %v1886_v31  ;;  %v812_v10 = vsel %vm793_vm3, %v2356_v7, %v1885_v42 }
  0xae   : > { %v1894_v48 = vpop.permute.xlu1 %1893  ;;  %2033 = vrot.lane.b32.xlu1 %v2032_v22, %s2152_s27  ;;  %2038 = vrot.lane.b32.xlu0 %v2032_v22, %s2151_s24 }
  0xaf   : > { %v1896_v49 = vunpack.i.h.bf16 %v1894_v48  ;;  %v1895_v50 = vunpack.i.l.bf16 %v1894_v48  ;;  %v2648_v57 = vsel %vm828_vm4, %v810_v16, %v1890_v47  ;;  %v2651_v51 = vsel %vm828_vm4, %v811_v9, %v1891_v19 }
  0xb0   : > { %v2042_v58 = vpack.i.bf16 %v2651_v51, %v2648_v57 }
  0xb1   : > { %v1899_v0 = vpop.permute.xlu0 %1898  ;;  %v2656_v53 = vsel %vm828_vm4, %v812_v10, %v1895_v50  ;;  %v2659_v7 = vsel %vm828_vm4, %v813_v4, %v1896_v49 }
  0xb2   : > { %2043 = vrot.lane.b32.xlu1 %v2042_v58, %s2151_s24  ;;  %2048 = vrot.lane.b32.xlu0 %v2042_v58, %s2152_s27  ;;  %v1901_v54 = vunpack.i.h.bf16 %v1899_v0  ;;  %v1900_v56 = vunpack.i.l.bf16 %v1899_v0  ;;  %v2052_v44 = vpack.i.bf16 %v2659_v7, %v2656_v53 }
  0xb3   : > { %v1904_v61 = vpop.permute.xlu1 %1903 }
  0xb4   : > { %v1906_v63 = vunpack.i.h.bf16 %v1904_v61  ;;  %v1905_v25 = vunpack.i.l.bf16 %v1904_v61  ;;  %v815_v24 = vsel %vm793_vm3, %v2384_v55, %v1901_v54  ;;  %v814_v30 = vsel %vm793_vm3, %v2381_v52, %v1900_v56 }
  0xb5   : > { %v1909_v3 = vpop.permute.xlu0 %1908 }
  0xb6   : > { %v1911_v5 = vunpack.i.h.bf16 %v1909_v3  ;;  %v1910_v21 = vunpack.i.l.bf16 %v1909_v3  ;;  %2053 = vrot.lane.b32.xlu1 %v2052_v44, %s2152_s27  ;;  %2058 = vrot.lane.b32.xlu0 %v2052_v44, %s2151_s24  ;;  %v817_v6 = vsel %vm793_vm3, %v2392_v8, %v1906_v63  ;;  %v816_v62 = vsel %vm793_vm3, %v2395_v12, %v1905_v25 }
  0xb7   : > { %v1914_v17 = vpop.permute.xlu1 %1913 }
  0xb8   : > { %v1916_v34 = vunpack.i.h.bf16 %v1914_v17  ;;  %v1915_v31 = vunpack.i.l.bf16 %v1914_v17  ;;  %v2676_v42 = vsel %vm828_vm4, %v814_v30, %v1910_v21  ;;  %v2679_v43 = vsel %vm828_vm4, %v815_v24, %v1911_v5 }
  0xb9   : > { %v1919_v22 = vpop.permute.xlu0 %1918  ;;  %v2062_v55 = vpack.i.bf16 %v2679_v43, %v2676_v42 }
  0xba   : > { %v1921_v52 = vunpack.i.h.bf16 %v1919_v22  ;;  %v2684_v9 = vsel %vm828_vm4, %v816_v62, %v1915_v31  ;;  %v2687_v8 = vsel %vm828_vm4, %v817_v6, %v1916_v34  ;;  %v1920_v12 = vunpack.i.l.bf16 %v1919_v22 }
  0xbb   : > { %v1924_v19 = vpop.permute.xlu1 %1923  ;;  %2063 = vrot.lane.b32.xlu1 %v2062_v55, %s2151_s24  ;;  %2068 = vrot.lane.b32.xlu0 %v2062_v55, %s2152_s27  ;;  %v2072_v10 = vpack.i.bf16 %v2687_v8, %v2684_v9 }
  0xbc   : > { %v1926_v47 = vunpack.i.h.bf16 %v1924_v19  ;;  %v1925_v16 = vunpack.i.l.bf16 %v1924_v19  ;;  %v819_v48 = vsel %vm793_vm3, %v2419_v59, %v1921_v52  ;;  %v818_v58 = vsel %vm793_vm3, %v2422_v60, %v1920_v12 }
  0xbd   : > { %v1929_v4 = vpop.permute.xlu0 %1928 }
  0xbe   : > { %v1931_v49 = vunpack.i.h.bf16 %v1929_v4  ;;  %v1930_v50 = vunpack.i.l.bf16 %v1929_v4  ;;  %v821_v0 = vsel %vm793_vm3, %v2428_v18, %v1926_v47  ;;  %v820_v54 = vsel %vm793_vm3, %v2432_v20, %v1925_v16 }
  0xbf   : > { %v1934_v56 = vpop.permute.xlu1 %1933  ;;  %2073 = vrot.lane.b32.xlu1 %v2072_v10, %s2152_s27  ;;  %2078 = vrot.lane.b32.xlu0 %v2072_v10, %s2151_s24 }
  0xc0   : > { %v1936_v61 = vunpack.i.h.bf16 %v1934_v56  ;;  %v1935_v63 = vunpack.i.l.bf16 %v1934_v56  ;;  %v2704_v59 = vsel %vm828_vm4, %v818_v58, %v1930_v50  ;;  %v2707_v25 = vsel %vm828_vm4, %v819_v48, %v1931_v49 }
  0xc1   : > { %v2082_v60 = vpack.i.bf16 %v2707_v25, %v2704_v59 }
  0xc2   : > { %v1939_v18 = vpop.permute.xlu0 %1938  ;;  %v2712_v44 = vsel %vm828_vm4, %v820_v54, %v1935_v63  ;;  %v2715_v20 = vsel %vm828_vm4, %v821_v0, %v1936_v61 }
  0xc3   : > { %2083 = vrot.lane.b32.xlu1 %v2082_v60, %s2151_s24  ;;  %2088 = vrot.lane.b32.xlu0 %v2082_v60, %s2152_s27  ;;  %v1941_v3 = vunpack.i.h.bf16 %v1939_v18  ;;  %v1940_v5 = vunpack.i.l.bf16 %v1939_v18  ;;  %v2092_v6 = vpack.i.bf16 %v2715_v20, %v2712_v44 }
  0xc4   : > { %v1944_v21 = vpop.permute.xlu1 %1943 }
  0xc5   : > { %v1946_v24 = vunpack.i.h.bf16 %v1944_v21  ;;  %v1945_v30 = vunpack.i.l.bf16 %v1944_v21  ;;  %v823_v31 = vsel %vm793_vm3, %v2460_v28, %v1941_v3  ;;  %v822_v22 = vsel %vm793_vm3, %v2457_v14, %v1940_v5 }
  0xc6   : > { %v1949_v62 = vpop.permute.xlu0 %1948 }
  0xc7   : > { %v1951_v17 = vunpack.i.h.bf16 %v1949_v62  ;;  %v1950_v34 = vunpack.i.l.bf16 %v1949_v62  ;;  %2093 = vrot.lane.b32.xlu1 %v2092_v6, %s2152_s27  ;;  %2098 = vrot.lane.b32.xlu0 %v2092_v6, %s2151_s24  ;;  %v825_v55 = vsel %vm793_vm3, %v2468_v35, %v1946_v24  ;;  %v824_v52 = vsel %vm793_vm3, %v2471_v36, %v1945_v30 }
  0xc8   : > { %v1954_v12 = vpop.permute.xlu1 %1953 }
  0xc9   : > { %v1956_v19 = vunpack.i.h.bf16 %v1954_v12  ;;  %v1955_v47 = vunpack.i.l.bf16 %v1954_v12  ;;  %v2732_v16 = vsel %vm828_vm4, %v822_v22, %v1950_v34  ;;  %v2735_v4 = vsel %vm828_vm4, %v823_v31, %v1951_v17 }
  0xca   : > { %v1959_v10 = vpop.permute.xlu0 %1958  ;;  %v2102_v28 = vpack.i.bf16 %v2735_v4, %v2732_v16 }
  0xcb   : > { %v1961_v14 = vunpack.i.h.bf16 %v1959_v10  ;;  %v2740_v48 = vsel %vm828_vm4, %v824_v52, %v1955_v47  ;;  %v2743_v35 = vsel %vm828_vm4, %v825_v55, %v1956_v19  ;;  %v1960_v36 = vunpack.i.l.bf16 %v1959_v10 }
  0xcc   : > { %v1964_v49 = vpop.permute.xlu1 %1963  ;;  %2103 = vrot.lane.b32.xlu1 %v2102_v28, %s2151_s24  ;;  %2108 = vrot.lane.b32.xlu0 %v2102_v28, %s2152_s27  ;;  %v2112_v54 = vpack.i.bf16 %v2743_v35, %v2740_v48 }
  0xcd   : > { %v1966_v50 = vunpack.i.h.bf16 %v1964_v49  ;;  %v1965_v58 = vunpack.i.l.bf16 %v1964_v49  ;;  %v827_v56 = vsel %vm793_vm3, %v2503_v40, %v1961_v14  ;;  %v826_v60 = vsel %vm793_vm3, %v2506_v41, %v1960_v36 }
  0xce   : > { %v1969_v0 = vpop.permute.xlu0 %1968 }
  0xcf   : > { %v1971_v61 = vunpack.i.h.bf16 %v1969_v0  ;;  %v1970_v63 = vunpack.i.l.bf16 %v1969_v0  ;;  %v795_v18 = vsel %vm793_vm3, %v2181_v1, %v1966_v50  ;;  %v794_v3 = vsel %vm793_vm3, %v2187_v2, %v1965_v58 }
  0xd0   : > { %v1974_v5 = vpop.permute.xlu1 %1973  ;;  %2113 = vrot.lane.b32.xlu1 %v2112_v54, %s2152_s27  ;;  %2118 = vrot.lane.b32.xlu0 %v2112_v54, %s2151_s24 }
  0xd1   : > { %v1976_v21 = vunpack.i.h.bf16 %v1974_v5  ;;  %v1975_v24 = vunpack.i.l.bf16 %v1974_v5  ;;  %v861_v40 = vsel %vm828_vm4, %v826_v60, %v1970_v63  ;;  %v862_v30 = vsel %vm828_vm4, %v827_v56, %v1971_v61 }
  0xd2   : > { %v2122_v6 = vpack.i.bf16 %v862_v30, %v861_v40 }
  0xd3   : > { %v829_v41 = vsel %vm828_vm4, %v794_v3, %v1975_v24  ;;  %v830_v62 = vsel %vm828_vm4, %v795_v18, %v1976_v21 }
  0xd4   : > { %2123 = vrot.lane.b32.xlu1 %v2122_v6, %s2151_s24  ;;  %2128 = vrot.lane.b32.xlu0 %v2122_v6, %s2152_s27  ;;  %v2132_v1 = vpack.i.bf16 %v830_v62, %v829_v41 }
  0xd8   : > { %2133 = vrot.lane.b32.xlu1 %v2132_v1, %s2152_s27 }
 0x104   : > { %v1979_v2 = vpop.permute.xlu0 %1978 }
 0x105   : > { %v1981_v17 = vunpack.i.h.bf16 %v1979_v2  ;;  %v1980_v34 = vunpack.i.l.bf16 %v1979_v2 }
 0x107   : > { %v1090_v47 = vsel %vm1089_vm6, %v829_v41, %v1980_v34  ;;  %v1091_v10 = vsel %vm1089_vm6, %v830_v62, %v1981_v17 }
 0x10b   : > { %v1984_v31 = vpop.permute.xlu1 %1983  ;;  %v1989_v22 = vpop.permute.xlu0 %1988 }
 0x10c   : > { %v1991_v55 = vunpack.i.h.bf16 %v1989_v22  ;;  %v1990_v52 = vunpack.i.l.bf16 %v1989_v22  ;;  %v1986_v12 = vunpack.i.h.bf16 %v1984_v31  ;;  %v1985_v19 = vunpack.i.l.bf16 %v1984_v31 }
 0x10e   : > { %v1123_v28 = vsel %vm1122_vm7, %v1090_v47, %v1990_v52  ;;  %v1124_v14 = vsel %vm1122_vm7, %v1091_v10, %v1991_v55  ;;  %v1092_v54 = vsel %vm1089_vm6, %v2544_v38, %v1985_v19  ;;  %v1093_v56 = vsel %vm1089_vm6, %v2547_v39, %v1986_v12 }
 0x10f   : > { %v1994_v36 = vpop.permute.xlu1 %1993  ;;  %v1999_v49 = vpop.permute.xlu0 %1998  ;;  %v1155_v50 = vpack.c.bf16 %v1124_v14, %v1123_v28 }
 0x110   : > { %v1996_v58 = vunpack.i.h.bf16 %v1994_v36  ;;  %v1995_v0 = vunpack.i.l.bf16 %v1994_v36  ;;  %v2001_v61 = vunpack.i.h.bf16 %v1999_v49  ;;  %v2000_v63 = vunpack.i.l.bf16 %v1999_v49 }
 0x111   : > { %1754 = vmatprep.mubr.msk.bf16.mxu0 %vm1191_vm8, %v1155_v50 }
 0x112   : > { %v1125_v60 = vsel %vm1122_vm7, %v1092_v54, %v1995_v0  ;;  %v1126_v18 = vsel %vm1122_vm7, %v1093_v56, %v1996_v58  ;;  %v1095_v30 = vsel %vm1089_vm6, %v2567_v32, %v2001_v61  ;;  %v1094_v38 = vsel %vm1089_vm6, %v2564_v13, %v2000_v63 }
 0x113   : > { %v1156_v3 = vpack.c.bf16 %v1126_v18, %v1125_v60  ;;  %v2004_v5 = vpop.permute.xlu1 %2003  ;;  %v2009_v21 = vpop.permute.xlu0 %2008 }
 0x114   : > { %v2011_v24 = vunpack.i.h.bf16 %v2009_v21  ;;  %v2010_v40 = vunpack.i.l.bf16 %v2009_v21  ;;  %v2006_v39 = vunpack.i.h.bf16 %v2004_v5  ;;  %v2005_v6 = vunpack.i.l.bf16 %v2004_v5 }
 0x115   : > { %1755 = vmatmul.mubr.msk.bf16.vlgmr.msra.gmra.mrb[0].mxu0 %vm1191_vm8, %v1156_v3 }
 0x116   : > { %v1127_v41 = vsel %vm1122_vm7, %v1094_v38, %v2010_v40  ;;  %v1128_v62 = vsel %vm1122_vm7, %v1095_v30, %v2011_v24  ;;  %v1097_v22 = vsel %vm1089_vm6, %v2575_v11, %v2006_v39  ;;  %v1096_v32 = vsel %vm1089_vm6, %v2572_v45, %v2005_v6 }
 0x117   : > { %v1157_v1 = vpack.c.bf16 %v1128_v62, %v1127_v41  ;;  %v2014_v2 = vpop.permute.xlu1 %2013  ;;  %v2019_v17 = vpop.permute.xlu0 %2018 }
 0x118   : > { %v2016_v34 = vunpack.i.h.bf16 %v2014_v2  ;;  %v2015_v31 = vunpack.i.l.bf16 %v2014_v2  ;;  %v2021_v52 = vunpack.i.h.bf16 %v2019_v17  ;;  %v2020_v12 = vunpack.i.l.bf16 %v2019_v17 }
 0x119   : > { %1758 = vmatprep.mubr.msk.bf16.mxu0 %vm1191_vm8, %v1157_v1 }
 0x11a   : > { %v1129_v13 = vsel %vm1122_vm7, %v1096_v32, %v2015_v31  ;;  %v1130_v55 = vsel %vm1122_vm7, %v1097_v22, %v2016_v34  ;;  %v1099_v11 = vsel %vm1089_vm6, %v2595_v46, %v2021_v52  ;;  %v1098_v45 = vsel %vm1089_vm6, %v2592_v23, %v2020_v12 }
 0x11b   : > { %v1158_v19 = vpack.c.bf16 %v1130_v55, %v1129_v13 }
 0x11c   : > { %v2024_v47 = vpop.permute.xlu1 %2023  ;;  %v2029_v10 = vpop.permute.xlu0 %2028 }
 0x11d   : > { %v2031_v28 = vunpack.i.h.bf16 %v2029_v10  ;;  %v2030_v14 = vunpack.i.l.bf16 %v2029_v10  ;;  %1759 = vmatmul.mubr.msk.bf16.gmra.mrb[4].mxu0 %vm1191_vm8, %v1158_v19  ;;  %v2026_v36 = vunpack.i.h.bf16 %v2024_v47  ;;  %v2025_v49 = vunpack.i.l.bf16 %v2024_v47 }
 0x11f   : > { %v1131_v50 = vsel %vm1122_vm7, %v1098_v45, %v2030_v14  ;;  %v1132_v58 = vsel %vm1122_vm7, %v1099_v11, %v2031_v28  ;;  %v1101_v60 = vsel %vm1089_vm6, %v2605_v29, %v2026_v36  ;;  %v1100_v46 = vsel %vm1089_vm6, %v2602_v37, %v2025_v49 }
 0x120   : > { %v1159_v0 = vpack.c.bf16 %v1132_v58, %v1131_v50  ;;  %v2034_v54 = vpop.permute.xlu1 %2033  ;;  %v2039_v56 = vpop.permute.xlu0 %2038 }
 0x121   : > { %v2036_v61 = vunpack.i.h.bf16 %v2034_v54  ;;  %v2035_v63 = vunpack.i.l.bf16 %v2034_v54  ;;  %v2041_v18 = vunpack.i.h.bf16 %v2039_v56  ;;  %v2040_v3 = vunpack.i.l.bf16 %v2039_v56 }
 0x122   : > { %1762 = vmatprep.mubr.msk.bf16.mxu0 %vm1191_vm8, %v1159_v0 }
 0x123   : > { %v1133_v23 = vsel %vm1122_vm7, %v1100_v46, %v2035_v63  ;;  %v1134_v5 = vsel %vm1122_vm7, %v1101_v60, %v2036_v61  ;;  %v1103_v39 = vsel %vm1089_vm6, %v2623_v27, %v2041_v18  ;;  %v1102_v29 = vsel %vm1089_vm6, %v2620_v26, %v2040_v3 }
 0x124   : > { %v1160_v21 = vpack.c.bf16 %v1134_v5, %v1133_v23  ;;  %v2044_v24 = vpop.permute.xlu1 %2043  ;;  %v2049_v40 = vpop.permute.xlu0 %2048 }
 0x125   : > { %v2051_v30 = vunpack.i.h.bf16 %v2049_v40  ;;  %v2050_v38 = vunpack.i.l.bf16 %v2049_v40  ;;  %v2046_v37 = vunpack.i.h.bf16 %v2044_v24  ;;  %v2045_v6 = vunpack.i.l.bf16 %v2044_v24 }
 0x126   : > { %1763 = vmatmul.mubr.msk.bf16.gmra.mrb[8].mxu0 %vm1191_vm8, %v1160_v21 }
 0x127   : > { %v1135_v41 = vsel %vm1122_vm7, %v1102_v29, %v2050_v38  ;;  %v1136_v62 = vsel %vm1122_vm7, %v1103_v39, %v2051_v30  ;;  %v1105_v22 = vsel %vm1089_vm6, %v2631_v15, %v2046_v37  ;;  %v1104_v27 = vsel %vm1089_vm6, %v2628_v33, %v2045_v6 }
 0x128   : > { %v1161_v1 = vpack.c.bf16 %v1136_v62, %v1135_v41  ;;  %v2054_v2 = vpop.permute.xlu1 %2053  ;;  %v2059_v17 = vpop.permute.xlu0 %2058 }
 0x129   : > { %v2056_v34 = vunpack.i.h.bf16 %v2054_v2  ;;  %v2055_v31 = vunpack.i.l.bf16 %v2054_v2  ;;  %v2061_v13 = vunpack.i.h.bf16 %v2059_v17  ;;  %v2060_v55 = vunpack.i.l.bf16 %v2059_v17 }
 0x12a   : > { %1766 = vmatprep.mubr.msk.bf16.mxu0 %vm1191_vm8, %v1161_v1 }
 0x12b   : > { %v1137_v26 = vsel %vm1122_vm7, %v1104_v27, %v2055_v31  ;;  %v1138_v32 = vsel %vm1122_vm7, %v1105_v22, %v2056_v34  ;;  %v1106_v33 = vsel %vm1089_vm6, %v2648_v57, %v2060_v55  ;;  %v1107_v14 = vsel %vm1089_vm6, %v2651_v51, %v2061_v13 }
 0x12c   : > { %v1162_v52 = vpack.c.bf16 %v1138_v32, %v1137_v26 }
 0x12d   : > { %v2064_v12 = vpop.permute.xlu1 %2063  ;;  %v2069_v19 = vpop.permute.xlu0 %2068 }
 0x12e   : > { %v2071_v47 = vunpack.i.h.bf16 %v2069_v19  ;;  %v2070_v10 = vunpack.i.l.bf16 %v2069_v19  ;;  %1767 = vmatmul.mubr.msk.bf16.gmra.mrb[12].mxu0 %vm1191_vm8, %v1162_v52  ;;  %v2066_v28 = vunpack.i.h.bf16 %v2064_v12  ;;  %v2065_v15 = vunpack.i.l.bf16 %v2064_v12 }
 0x130   : > { %v1139_v11 = vsel %vm1122_vm7, %v1106_v33, %v2070_v10  ;;  %v1140_v45 = vsel %vm1122_vm7, %v1107_v14, %v2071_v47  ;;  %v1109_v54 = vsel %vm1089_vm6, %v2659_v7, %v2066_v28  ;;  %v1108_v56 = vsel %vm1089_vm6, %v2656_v53, %v2065_v15 }
 0x131   : > { %v2074_v36 = vpop.permute.xlu1 %2073  ;;  %v2079_v49 = vpop.permute.xlu0 %2078  ;;  %v1163_v50 = vpack.c.bf16 %v1140_v45, %v1139_v11 }
 0x132   : > { %v2076_v58 = vunpack.i.h.bf16 %v2074_v36  ;;  %v2075_v0 = vunpack.i.l.bf16 %v2074_v36  ;;  %v2081_v61 = vunpack.i.h.bf16 %v2079_v49  ;;  %v2080_v57 = vunpack.i.l.bf16 %v2079_v49 }
 0x133   : > { %1770 = vmatprep.mubr.msk.bf16.mxu1 %vm1191_vm8, %v1163_v50 }
 0x134   : > { %v1141_v51 = vsel %vm1122_vm7, %v1108_v56, %v2075_v0  ;;  %v1142_v63 = vsel %vm1122_vm7, %v1109_v54, %v2076_v58  ;;  %v1111_v5 = vsel %vm1089_vm6, %v2679_v43, %v2081_v61  ;;  %v1110_v7 = vsel %vm1089_vm6, %v2676_v42, %v2080_v57 }
 0x135   : > { %v1164_v60 = vpack.c.bf16 %v1142_v63, %v1141_v51  ;;  %v2084_v46 = vpop.permute.xlu1 %2083  ;;  %v2089_v18 = vpop.permute.xlu0 %2088 }
 0x136   : > { %v2091_v3 = vunpack.i.h.bf16 %v2089_v18  ;;  %v2090_v23 = vunpack.i.l.bf16 %v2089_v18  ;;  %v2086_v53 = vunpack.i.h.bf16 %v2084_v46  ;;  %v2085_v21 = vunpack.i.l.bf16 %v2084_v46 }
 0x137   : > { %1771 = vmatmul.mubr.msk.bf16.vlgmr.msra.gmra.mrb[0].mxu1 %vm1191_vm8, %v1164_v60 }
 0x138   : > { %v1143_v24 = vsel %vm1122_vm7, %v1110_v7, %v2090_v23  ;;  %v1144_v40 = vsel %vm1122_vm7, %v1111_v5, %v2091_v3  ;;  %v1113_v6 = vsel %vm1089_vm6, %v2687_v8, %v2086_v53  ;;  %v1112_v43 = vsel %vm1089_vm6, %v2684_v9, %v2085_v21 }
 0x139   : > { %v1165_v30 = vpack.c.bf16 %v1144_v40, %v1143_v24  ;;  %v2094_v38 = vpop.permute.xlu1 %2093  ;;  %v2099_v39 = vpop.permute.xlu0 %2098 }
 0x13a   : > { %v2096_v29 = vunpack.i.h.bf16 %v2094_v38  ;;  %v2095_v37 = vunpack.i.l.bf16 %v2094_v38  ;;  %v2101_v62 = vunpack.i.h.bf16 %v2099_v39  ;;  %v2100_v1 = vunpack.i.l.bf16 %v2099_v39 }
 0x13b   : > { %1774 = vmatprep.mubr.msk.bf16.mxu1 %vm1191_vm8, %v1165_v30 }
 0x13c   : > { %v1145_v42 = vsel %vm1122_vm7, %v1112_v43, %v2095_v37  ;;  %v1146_v41 = vsel %vm1122_vm7, %v1113_v6, %v2096_v29  ;;  %v1115_v8 = vsel %vm1089_vm6, %v2707_v25, %v2101_v62  ;;  %v1114_v9 = vsel %vm1089_vm6, %v2704_v59, %v2100_v1 }
 0x13d   : > { %v1166_v2 = vpack.c.bf16 %v1146_v41, %v1145_v42 }
 0x13e   : > { %v2104_v17 = vpop.permute.xlu1 %2103  ;;  %v2109_v34 = vpop.permute.xlu0 %2108 }
 0x13f   : > { %v2111_v31 = vunpack.i.h.bf16 %v2109_v34  ;;  %v2110_v22 = vunpack.i.l.bf16 %v2109_v34  ;;  %1775 = vmatmul.mubr.msk.bf16.gmra.mrb[4].mxu1 %vm1191_vm8, %v1166_v2  ;;  %v2106_v27 = vunpack.i.h.bf16 %v2104_v17  ;;  %v2105_v26 = vunpack.i.l.bf16 %v2104_v17 }
 0x141   : > { %v1147_v32 = vsel %vm1122_vm7, %v1114_v9, %v2110_v22  ;;  %v1148_v13 = vsel %vm1122_vm7, %v1115_v8, %v2111_v31  ;;  %v1117_v10 = vsel %vm1089_vm6, %v2715_v20, %v2106_v27  ;;  %v1116_v25 = vsel %vm1089_vm6, %v2712_v44, %v2105_v26 }
 0x142   : > { %v1167_v55 = vpack.c.bf16 %v1148_v13, %v1147_v32  ;;  %v2114_v52 = vpop.permute.xlu1 %2113  ;;  %v2119_v12 = vpop.permute.xlu0 %2118 }
 0x143   : > { %v2116_v19 = vunpack.i.h.bf16 %v2114_v52  ;;  %v2115_v47 = vunpack.i.l.bf16 %v2114_v52  ;;  %v2121_v28 = vunpack.i.h.bf16 %v2119_v12  ;;  %v2120_v15 = vunpack.i.l.bf16 %v2119_v12 }
 0x144   : > { %1778 = vmatprep.mubr.msk.bf16.mxu1 %vm1191_vm8, %v1167_v55 }
 0x145   : > { %v1149_v59 = vsel %vm1122_vm7, %v1116_v25, %v2115_v47  ;;  %v1150_v33 = vsel %vm1122_vm7, %v1117_v10, %v2116_v19  ;;  %v1119_v50 = vsel %vm1089_vm6, %v2735_v4, %v2121_v28  ;;  %v1118_v20 = vsel %vm1089_vm6, %v2732_v16, %v2120_v15 }
 0x146   : > { %v1168_v14 = vpack.c.bf16 %v1150_v33, %v1149_v59  ;;  %v2124_v11 = vpop.permute.xlu1 %2123  ;;  %v2129_v45 = vpop.permute.xlu0 %2128 }
 0x147   : > { %v2131_v36 = vunpack.i.h.bf16 %v2129_v45  ;;  %v2130_v49 = vunpack.i.l.bf16 %v2129_v45  ;;  %v2126_v44 = vunpack.i.h.bf16 %v2124_v11  ;;  %v2125_v58 = vunpack.i.l.bf16 %v2124_v11 }
 0x148   : > { %1779 = vmatmul.mubr.msk.bf16.gmra.mrb[8].mxu1 %vm1191_vm8, %v1168_v14 }
 0x149   : > { %v1151_v0 = vsel %vm1122_vm7, %v1118_v20, %v2130_v49  ;;  %v1152_v54 = vsel %vm1122_vm7, %v1119_v50, %v2131_v36  ;;  %v1121_v63 = vsel %vm1089_vm6, %v2743_v35, %v2126_v44  ;;  %v1120_v4 = vsel %vm1089_vm6, %v2740_v48, %v2125_v58 }
 0x14a   : > { %v1169_v56 = vpack.c.bf16 %v1152_v54, %v1151_v0  ;;  %v2134_v61 = vpop.permute.xlu1 %2133 }
 0x14b   : > { %v2136_v57 = vunpack.i.h.bf16 %v2134_v61  ;;  %v2135_v51 = vunpack.i.l.bf16 %v2134_v61 }
 0x14c   : > { %1782 = vmatprep.mubr.msk.bf16.mxu1 %vm1191_vm8, %v1169_v56 }
 0x14d   : > { %v1153_v16 = vsel %vm1122_vm7, %v1120_v4, %v2135_v51  ;;  %v1154_v60 = vsel %vm1122_vm7, %v1121_v63, %v2136_v57 }
 0x14e   : > { %v1170_v46 = vpack.c.bf16 %v1154_v60, %v1153_v16 }
 0x150   : > { %1783 = vmatmul.mubr.msk.bf16.gmra.mrb[12].mxu1 %vm1191_vm8, %v1170_v46 }
 0x1e8   : > { %v1756_v48 = vpop.f32.mrb[0].mxu0 }
 0x1e9   : > { %1407 = vst.msk [vmem:[%s2881_s30 + $0x10] sm:$0xff] %vm793_vm3, %v1756_v48  ;;  %v1278_v35 = vpop.f32.mrb[1].mxu0  ;;  %v1508_v5 = vmul.f32 %v1756_v48, %v1756_v48  ;;  %v1440_v40 = vsel %vm793_vm3, %v1756_v48, 0.0 }
 0x1ea   : > { %1405 = vst.msk [vmem:[%s2881_s30] sm:$0xff] %vm793_vm3, %v1278_v35  ;;  %v1506_v18 = vmul.f32 %v1278_v35, %v1278_v35  ;;  %v1757_v3 = vpop.f32.mrb[2].mxu0  ;;  %v1437_v7 = vsel %vm793_vm3, %v1278_v35, 0.0 }
 0x1eb   : > { %1408 = vst.msk [vmem:[%s2881_s30 + $0x18] sm:$0xff] %vm793_vm3, %v1757_v3  ;;  %v1281_v23 = vpop.f32.mrb[3].mxu0  ;;  %v1509_v38 = vmul.f32 %v1757_v3, %v1757_v3  ;;  %v1541_v6 = vsel %vm793_vm3, %v1508_v5, 0.0  ;;  %v1442_v43 = vsel %vm793_vm3, %v1757_v3, 0.0 }
 0x1ec   : > { %1406 = vst.msk [vmem:[%s2881_s30 + $0x8] sm:$0xff] %vm793_vm3, %v1281_v23  ;;  %v1438_v53 = vsel %vm793_vm3, %v1281_v23, 0.0  ;;  %v1507_v21 = vmul.f32 %v1281_v23, %v1281_v23  ;;  %v1538_v30 = vsel %vm793_vm3, %v1506_v18, 0.0 }
 0x1ed   : > { %v1439_v24 = vadd.f32 %v1438_v53, %v1437_v7  ;;  %v1543_v2 = vsel %vm793_vm3, %v1509_v38, 0.0 }
 0x1ee   : > { %v1539_v39 = vsel %vm793_vm3, %v1507_v21, 0.0 }
 0x1ef   : > { %v1441_v29 = vadd.f32 %v1440_v40, %v1439_v24  ;;  %v1540_v37 = vadd.f32 %v1539_v39, %v1538_v30 }
 0x1f0   : > { %v1760_v42 = vpop.f32.mrb[4].mxu0 }
 0x1f1   : > { %v1542_v41 = vadd.f32 %v1541_v6, %v1540_v37  ;;  %1411 = vst.msk [vmem:[%s2881_s30 + $0x30] sm:$0xff] %vm793_vm3, %v1760_v42  ;;  %v1294_v62 = vpop.f32.mrb[5].mxu0  ;;  %v1443_v1 = vadd.f32 %v1442_v43, %v1441_v29  ;;  %v1512_v27 = vmul.f32 %v1760_v42, %v1760_v42  ;;  %v1448_v12 = vsel %vm793_vm3, %v1760_v42, 0.0 }
 0x1f2   : > { %1409 = vst.msk [vmem:[%s2881_s30 + $0x20] sm:$0xff] %vm793_vm3, %v1294_v62  ;;  %v1444_v17 = vsel %vm793_vm3, %v1294_v62, 0.0  ;;  %v1510_v34 = vmul.f32 %v1294_v62, %v1294_v62  ;;  %v1761_v31 = vpop.f32.mrb[6].mxu0 }
 0x1f3   : > { %v1445_v22 = vadd.f32 %v1444_v17, %v1443_v1  ;;  %v1544_v8 = vadd.f32 %v1543_v2, %v1542_v41  ;;  %1412 = vst.msk [vmem:[%s2881_s30 + $0x38] sm:$0xff] %vm793_vm3, %v1761_v31  ;;  %v1297_v9 = vpop.f32.mrb[7].mxu0  ;;  %v1513_v19 = vmul.f32 %v1761_v31, %v1761_v31  ;;  %v1549_v28 = vsel %vm793_vm3, %v1512_v27, 0.0 }
 0x1f4   : > { %v1545_v26 = vsel %vm793_vm3, %v1510_v34, 0.0  ;;  %1410 = vst.msk [vmem:[%s2881_s30 + $0x28] sm:$0xff] %vm793_vm3, %v1297_v9  ;;  %v1446_v32 = vsel %vm793_vm3, %v1297_v9, 0.0  ;;  %v1511_v13 = vmul.f32 %v1297_v9, %v1297_v9  ;;  %v1450_v15 = vsel %vm793_vm3, %v1761_v31, 0.0 }
 0x1f5   : > { %v1546_v55 = vadd.f32 %v1545_v26, %v1544_v8  ;;  %v1447_v52 = vadd.f32 %v1446_v32, %v1445_v22  ;;  %v1551_v11 = vsel %vm793_vm3, %v1513_v19, 0.0 }
 0x1f6   : > { %v1547_v47 = vsel %vm793_vm3, %v1511_v13, 0.0 }
 0x1f7   : > { %v1449_v10 = vadd.f32 %v1448_v12, %v1447_v52  ;;  %v1548_v25 = vadd.f32 %v1547_v47, %v1546_v55 }
 0x1f9   : > { %v1550_v59 = vadd.f32 %v1549_v28, %v1548_v25  ;;  %v1764_v33 = vpop.f32.mrb[8].mxu0  ;;  %v1451_v14 = vadd.f32 %v1450_v15, %v1449_v10 }
 0x1fa   : > { %1415 = vst.msk [vmem:[%s2881_s30 + $0x50] sm:$0xff] %vm793_vm3, %v1764_v33  ;;  %v1310_v45 = vpop.f32.mrb[9].mxu0  ;;  %v1516_v0 = vmul.f32 %v1764_v33, %v1764_v33  ;;  %v1456_v63 = vsel %vm793_vm3, %v1764_v33, 0.0 }
 0x1fb   : > { %1413 = vst.msk [vmem:[%s2881_s30 + $0x40] sm:$0xff] %vm793_vm3, %v1310_v45  ;;  %v1452_v36 = vsel %vm793_vm3, %v1310_v45, 0.0  ;;  %v1514_v49 = vmul.f32 %v1310_v45, %v1310_v45  ;;  %v1552_v50 = vadd.f32 %v1551_v11, %v1550_v59  ;;  %v1765_v20 = vpop.f32.mrb[10].mxu0 }
 0x1fc   : > { %v1453_v44 = vadd.f32 %v1452_v36, %v1451_v14  ;;  %1416 = vst.msk [vmem:[%s2881_s30 + $0x58] sm:$0xff] %vm793_vm3, %v1765_v20  ;;  %v1313_v58 = vpop.f32.mrb[11].mxu0  ;;  %v1517_v4 = vmul.f32 %v1765_v20, %v1765_v20  ;;  %v1557_v48 = vsel %vm793_vm3, %v1516_v0, 0.0  ;;  %v1458_v35 = vsel %vm793_vm3, %v1765_v20, 0.0 }
 0x1fd   : > { %v1553_v54 = vsel %vm793_vm3, %v1514_v49, 0.0  ;;  %1414 = vst.msk [vmem:[%s2881_s30 + $0x48] sm:$0xff] %vm793_vm3, %v1313_v58  ;;  %v1454_v56 = vsel %vm793_vm3, %v1313_v58, 0.0  ;;  %v1515_v61 = vmul.f32 %v1313_v58, %v1313_v58 }
 0x1fe   : > { %v1554_v57 = vadd.f32 %v1553_v54, %v1552_v50  ;;  %v1455_v51 = vadd.f32 %v1454_v56, %v1453_v44  ;;  %v1559_v7 = vsel %vm793_vm3, %v1517_v4, 0.0 }
 0x1ff   : > { %v1555_v16 = vsel %vm793_vm3, %v1515_v61, 0.0 }
 0x200   : > { %v1457_v60 = vadd.f32 %v1456_v63, %v1455_v51  ;;  %v1556_v46 = vadd.f32 %v1555_v16, %v1554_v57 }
 0x201   : > { %v1768_v18 = vpop.f32.mrb[12].mxu0 }
 0x202   : > { %v1558_v3 = vadd.f32 %v1557_v48, %v1556_v46  ;;  %1419 = vst.msk [vmem:[%s2881_s30 + $0x70] sm:$0xff] %vm793_vm3, %v1768_v18  ;;  %v1326_v23 = vpop.f32.mrb[13].mxu0  ;;  %v1459_v5 = vadd.f32 %v1458_v35, %v1457_v60  ;;  %v1520_v39 = vmul.f32 %v1768_v18, %v1768_v18  ;;  %v1464_v41 = vsel %vm793_vm3, %v1768_v18, 0.0 }
 0x203   : > { %1417 = vst.msk [vmem:[%s2881_s30 + $0x60] sm:$0xff] %vm793_vm3, %v1326_v23  ;;  %v1460_v53 = vsel %vm793_vm3, %v1326_v23, 0.0  ;;  %v1518_v21 = vmul.f32 %v1326_v23, %v1326_v23  ;;  %v1769_v24 = vpop.f32.mrb[14].mxu0 }
 0x204   : > { %v1461_v40 = vadd.f32 %v1460_v53, %v1459_v5  ;;  %v1560_v30 = vadd.f32 %v1559_v7, %v1558_v3  ;;  %1420 = vst.msk [vmem:[%s2881_s30 + $0x78] sm:$0xff] %vm793_vm3, %v1769_v24  ;;  %v1329_v38 = vpop.f32.mrb[15].mxu0  ;;  %v1521_v62 = vmul.f32 %v1769_v24, %v1769_v24  ;;  %v1565_v34 = vsel %vm793_vm3, %v1520_v39, 0.0 }
 0x205   : > { %v1561_v29 = vsel %vm793_vm3, %v1518_v21, 0.0  ;;  %1418 = vst.msk [vmem:[%s2881_s30 + $0x68] sm:$0xff] %vm793_vm3, %v1329_v38  ;;  %v1462_v37 = vsel %vm793_vm3, %v1329_v38, 0.0  ;;  %v1519_v6 = vmul.f32 %v1329_v38, %v1329_v38  ;;  %v1466_v31 = vsel %vm793_vm3, %v1769_v24, 0.0 }
 0x206   : > { %v1562_v43 = vadd.f32 %v1561_v29, %v1560_v30  ;;  %v1463_v42 = vadd.f32 %v1462_v37, %v1461_v40  ;;  %v1567_v27 = vsel %vm793_vm3, %v1521_v62, 0.0 }
 0x207   : > { %v1563_v1 = vsel %vm793_vm3, %v1519_v6, 0.0 }
 0x208   : > { %v1465_v2 = vadd.f32 %v1464_v41, %v1463_v42  ;;  %v1564_v17 = vadd.f32 %v1563_v1, %v1562_v43 }
 0x20a   : > { %v1566_v22 = vadd.f32 %v1565_v34, %v1564_v17  ;;  %v1772_v8 = vpop.f32.mrb[0].mxu1  ;;  %v1467_v9 = vadd.f32 %v1466_v31, %v1465_v2 }
 0x20b   : > { %1423 = vst.msk [vmem:[%s2881_s30 + $0x90] sm:$0xff] %vm793_vm3, %v1772_v8  ;;  %v1342_v26 = vpop.f32.mrb[1].mxu1  ;;  %v1524_v47 = vmul.f32 %v1772_v8, %v1772_v8  ;;  %v1472_v33 = vsel %vm793_vm3, %v1772_v8, 0.0 }
 0x20c   : > { %1421 = vst.msk [vmem:[%s2881_s30 + $0x80] sm:$0xff] %vm793_vm3, %v1342_v26  ;;  %v1468_v32 = vsel %vm793_vm3, %v1342_v26, 0.0  ;;  %v1522_v13 = vmul.f32 %v1342_v26, %v1342_v26  ;;  %v1568_v55 = vadd.f32 %v1567_v27, %v1566_v22  ;;  %v1773_v52 = vpop.f32.mrb[2].mxu1 }
 0x20d   : > { %v1469_v12 = vadd.f32 %v1468_v32, %v1467_v9  ;;  %1424 = vst.msk [vmem:[%s2881_s30 + $0x98] sm:$0xff] %vm793_vm3, %v1773_v52  ;;  %v1345_v19 = vpop.f32.mrb[3].mxu1  ;;  %v1525_v14 = vmul.f32 %v1773_v52, %v1773_v52  ;;  %v1573_v49 = vsel %vm793_vm3, %v1524_v47, 0.0  ;;  %v1474_v50 = vsel %vm793_vm3, %v1773_v52, 0.0 }
 0x20e   : > { %v1569_v10 = vsel %vm793_vm3, %v1522_v13, 0.0  ;;  %1422 = vst.msk [vmem:[%s2881_s30 + $0x88] sm:$0xff] %vm793_vm3, %v1345_v19  ;;  %v1470_v25 = vsel %vm793_vm3, %v1345_v19, 0.0  ;;  %v1523_v28 = vmul.f32 %v1345_v19, %v1345_v19 }
 0x20f   : > { %v1570_v15 = vadd.f32 %v1569_v10, %v1568_v55  ;;  %v1471_v59 = vadd.f32 %v1470_v25, %v1469_v12  ;;  %v1575_v54 = vsel %vm793_vm3, %v1525_v14, 0.0 }
 0x210   : > { %v1571_v11 = vsel %vm793_vm3, %v1523_v28, 0.0 }
 0x211   : > { %v1473_v45 = vadd.f32 %v1472_v33, %v1471_v59  ;;  %v1572_v36 = vadd.f32 %v1571_v11, %v1570_v15 }
 0x212   : > { %v1776_v20 = vpop.f32.mrb[4].mxu1 }
 0x213   : > { %v1574_v44 = vadd.f32 %v1573_v49, %v1572_v36  ;;  %1427 = vst.msk [vmem:[%s2881_s30 + $0xb0] sm:$0xff] %vm793_vm3, %v1776_v20  ;;  %v1358_v58 = vpop.f32.mrb[5].mxu1  ;;  %v1475_v0 = vadd.f32 %v1474_v50, %v1473_v45  ;;  %v1528_v16 = vmul.f32 %v1776_v20, %v1776_v20  ;;  %v1480_v3 = vsel %vm793_vm3, %v1776_v20, 0.0 }
 0x214   : > { %1425 = vst.msk [vmem:[%s2881_s30 + $0xa0] sm:$0xff] %vm793_vm3, %v1358_v58  ;;  %v1476_v56 = vsel %vm793_vm3, %v1358_v58, 0.0  ;;  %v1526_v61 = vmul.f32 %v1358_v58, %v1358_v58  ;;  %v1777_v57 = vpop.f32.mrb[6].mxu1 }
 0x215   : > { %v1477_v51 = vadd.f32 %v1476_v56, %v1475_v0  ;;  %v1576_v63 = vadd.f32 %v1575_v54, %v1574_v44  ;;  %1428 = vst.msk [vmem:[%s2881_s30 + $0xb8] sm:$0xff] %vm793_vm3, %v1777_v57  ;;  %v1361_v4 = vpop.f32.mrb[7].mxu1  ;;  %v1529_v23 = vmul.f32 %v1777_v57, %v1777_v57  ;;  %v1581_v21 = vsel %vm793_vm3, %v1528_v16, 0.0 }
 0x216   : > { %v1577_v60 = vsel %vm793_vm3, %v1526_v61, 0.0  ;;  %1426 = vst.msk [vmem:[%s2881_s30 + $0xa8] sm:$0xff] %vm793_vm3, %v1361_v4  ;;  %v1478_v46 = vsel %vm793_vm3, %v1361_v4, 0.0  ;;  %v1527_v48 = vmul.f32 %v1361_v4, %v1361_v4  ;;  %v1482_v24 = vsel %vm793_vm3, %v1777_v57, 0.0 }
 0x217   : > { %v1578_v35 = vadd.f32 %v1577_v60, %v1576_v63  ;;  %v1479_v18 = vadd.f32 %v1478_v46, %v1477_v51  ;;  %v1583_v39 = vsel %vm793_vm3, %v1529_v23, 0.0 }
 0x218   : > { %v1579_v5 = vsel %vm793_vm3, %v1527_v48, 0.0 }
 0x219   : > { %v1481_v7 = vadd.f32 %v1480_v3, %v1479_v18  ;;  %v1580_v53 = vadd.f32 %v1579_v5, %v1578_v35 }
 0x21b   : > { %v1582_v40 = vadd.f32 %v1581_v21, %v1580_v53  ;;  %v1780_v30 = vpop.f32.mrb[8].mxu1  ;;  %v1483_v38 = vadd.f32 %v1482_v24, %v1481_v7 }
 0x21c   : > { %1431 = vst.msk [vmem:[%s2881_s30 + $0xd0] sm:$0xff] %vm793_vm3, %v1780_v30  ;;  %v1374_v29 = vpop.f32.mrb[9].mxu1  ;;  %v1532_v1 = vmul.f32 %v1780_v30, %v1780_v30  ;;  %v1488_v8 = vsel %vm793_vm3, %v1780_v30, 0.0 }
 0x21d   : > { %1429 = vst.msk [vmem:[%s2881_s30 + $0xc0] sm:$0xff] %vm793_vm3, %v1374_v29  ;;  %v1484_v37 = vsel %vm793_vm3, %v1374_v29, 0.0  ;;  %v1530_v6 = vmul.f32 %v1374_v29, %v1374_v29  ;;  %v1584_v43 = vadd.f32 %v1583_v39, %v1582_v40  ;;  %v1781_v42 = vpop.f32.mrb[10].mxu1 }
 0x21e   : > { %v1485_v41 = vadd.f32 %v1484_v37, %v1483_v38  ;;  %1432 = vst.msk [vmem:[%s2881_s30 + $0xd8] sm:$0xff] %vm793_vm3, %v1781_v42  ;;  %v1377_v62 = vpop.f32.mrb[11].mxu1  ;;  %v1533_v9 = vmul.f32 %v1781_v42, %v1781_v42  ;;  %v1589_v13 = vsel %vm793_vm3, %v1532_v1, 0.0  ;;  %v1490_v55 = vsel %vm793_vm3, %v1781_v42, 0.0 }
 0x21f   : > { %v1585_v2 = vsel %vm793_vm3, %v1530_v6, 0.0  ;;  %1430 = vst.msk [vmem:[%s2881_s30 + $0xc8] sm:$0xff] %vm793_vm3, %v1377_v62  ;;  %v1486_v17 = vsel %vm793_vm3, %v1377_v62, 0.0  ;;  %v1531_v34 = vmul.f32 %v1377_v62, %v1377_v62 }
 0x220   : > { %v1586_v31 = vadd.f32 %v1585_v2, %v1584_v43  ;;  %v1487_v22 = vadd.f32 %v1486_v17, %v1485_v41  ;;  %v1591_v10 = vsel %vm793_vm3, %v1533_v9, 0.0 }
 0x221   : > { %v1587_v27 = vsel %vm793_vm3, %v1531_v34, 0.0 }
 0x222   : > { %v1489_v26 = vadd.f32 %v1488_v8, %v1487_v22  ;;  %v1588_v32 = vadd.f32 %v1587_v27, %v1586_v31 }
 0x223   : > { %v1784_v52 = vpop.f32.mrb[12].mxu1 }
 0x224   : > { %v1590_v12 = vadd.f32 %v1589_v13, %v1588_v32  ;;  %1435 = vst.msk [vmem:[%s2881_s30 + $0xf0] sm:$0xff] %vm793_vm3, %v1784_v52  ;;  %v1390_v19 = vpop.f32.mrb[13].mxu1  ;;  %v1491_v47 = vadd.f32 %v1490_v55, %v1489_v26  ;;  %v1536_v11 = vmul.f32 %v1784_v52, %v1784_v52  ;;  %v1496_v44 = vsel %vm793_vm3, %v1784_v52, 0.0 }
 0x225   : > { %1433 = vst.msk [vmem:[%s2881_s30 + $0xe0] sm:$0xff] %vm793_vm3, %v1390_v19  ;;  %v1492_v25 = vsel %vm793_vm3, %v1390_v19, 0.0  ;;  %v1534_v28 = vmul.f32 %v1390_v19, %v1390_v19  ;;  %v1785_v15 = vpop.f32.mrb[14].mxu1 }
 0x226   : > { %v1493_v59 = vadd.f32 %v1492_v25, %v1491_v47  ;;  %v1592_v33 = vadd.f32 %v1591_v10, %v1590_v12  ;;  %1436 = vst.msk [vmem:[%s2881_s30 + $0xf8] sm:$0xff] %vm793_vm3, %v1785_v15  ;;  %v1393_v14 = vpop.f32.mrb[15].mxu1  ;;  %v1537_v58 = vmul.f32 %v1785_v15, %v1785_v15  ;;  %v1597_v61 = vsel %vm793_vm3, %v1536_v11, 0.0 }
 0x227   : > { %v1593_v45 = vsel %vm793_vm3, %v1534_v28, 0.0  ;;  %1434 = vst.msk [vmem:[%s2881_s30 + $0xe8] sm:$0xff] %vm793_vm3, %v1393_v14  ;;  %v1494_v36 = vsel %vm793_vm3, %v1393_v14, 0.0  ;;  %v1535_v49 = vmul.f32 %v1393_v14, %v1393_v14  ;;  %v1498_v57 = vsel %vm793_vm3, %v1785_v15, 0.0 }
 0x228   : > { %v1594_v50 = vadd.f32 %v1593_v45, %v1592_v33  ;;  %v1495_v20 = vadd.f32 %v1494_v36, %v1493_v59  ;;  %v1599_v4 = vsel %vm793_vm3, %v1537_v58, 0.0 }
 0x229   : > { %v1595_v0 = vsel %vm793_vm3, %v1535_v49, 0.0 }
 0x22a   : > { %v1497_v54 = vadd.f32 %v1496_v44, %v1495_v20  ;;  %v1596_v56 = vadd.f32 %v1595_v0, %v1594_v50 }
 0x22c   : > { %v1499_v51 = vadd.f32 %v1498_v57, %v1497_v54  ;;  %v1598_v63 = vadd.f32 %v1597_v61, %v1596_v56 }
 0x22e   : > { %v1500_v16 = vrot.slane %v1499_v51, 4  ;;  %v1600_v60 = vadd.f32 %v1599_v4, %v1598_v63 }
 0x230   : > { %v1501_v46 = vadd.f32 %v1500_v16, %v1499_v51  ;;  %v1601_v48 = vrot.slane %v1600_v60, 4 }
 0x232   : > { %v1502_v35 = vrot.slane %v1501_v46, 2  ;;  %v1602_v18 = vadd.f32 %v1601_v48, %v1600_v60 }
 0x234   : > { %v1503_v3 = vadd.f32 %v1502_v35, %v1501_v46  ;;  %v1603_v23 = vrot.slane %v1602_v18, 2 }
 0x236   : > { %v1504_v5 = vrot.slane %v1503_v3, 1  ;;  %v1604_v7 = vadd.f32 %v1603_v23, %v1602_v18 }
 0x238   : > { %v1605_v53 = vrot.slane %v1604_v7, 1  ;;  %v1505_v21 = vadd.f32 %v1504_v5, %v1503_v3 }
 0x23a   : > { %v1606_v24 = vadd.f32 %v1605_v53, %v1604_v7 }
 0x23c   : > { %v1607_v40 = vsel %vm248_vm0, %v1505_v21, %v1606_v24 }
 0x23d   : > { %1609 = vst.msk [vmem:[%s181_s7] sm:$0x3] %vm1608_vm9, %v1607_v40 }
 0x23e PF: > { %s14_s12 = sadd.s32 1, %s2146_s12  }
 0x23f   : > { %p11_p4 = scmp.ge.s32.totalorder %s14_s12, 4  }
 0x241   :  { %13 = sbr.rel (!%p11_p4) target bundleno = 1 (0x1), region = 70 }

// kernel: basic_resnet_block.4
= control target key start
LH: loop header
LB: loop body
LE: loop exit
PB: predicated region body
PF: predicated region fallthrough
CT: control target
= control target key end

     0   :  { %s2349_s18 = smov 0   ;;  %s3265_s0 = inlined_call_operand.vmem [shape: f32[2,16,16,4], index: 0, kind: input, shape index: {}]   ;;  %s3266_s1 = inlined_call_operand.vmem [shape: f32[1,4], index: 1, kind: input, shape index: {}]   ;;  %s3267_s2 = inlined_call_operand.vmem [shape: f32[1,4], index: 2, kind: input, shape index: {}]   ;;  %s3268_s3 = inlined_call_operand.vmem [shape: bf16[36,4], index: 3, kind: input, shape index: {}]   ;;  %s3269_s4 = inlined_call_operand.vmem [shape: f32[2,16,16,4], index: 4, kind: output, shape index: {0}]   ;;  %s3270_s5 = inlined_call_operand.vmem [shape: f32[2,2,4], index: 5, kind: output, shape index: {1}]  }
   0x1 LB: > { %s1860_s19 = sadd.s32 4294967295, %s2312_s18   ;;  %p1864_p0 = scmp.ge.s32.totalorder %s2312_s18, 1  ;;  %s2312_s18 = sphi %s2349_s18, %s16_s18  }
   0x2   : > { %p190_p1 = scmp.lt.s32.totalorder %s2312_s18, 3 }
   0x4   : > { %p191_p2 = pnand %p1864_p0, %p190_p1 }
   0x5   : > { %p222_p3 = scmp.lt.s32.totalorder (!%p191_p2), %s1860_s19, 1  ;;  %v2314_v0 = vmov (!%p191_p2), 0.0   ;;  %v2365_v2 = vld [vmem:[%s3266_s1] ss:$0 sm:$0xff] (!%p191_p2)  ;;  %vm412_vm0 = vcmask (!%p191_p2), 1040384   ;;  %vm581_vm1 = vcmask (!%p191_p2), 1046528  }
   0x6   : > { %194 = sbr.rel (%p191_p2) target bundleno = 599 (0x257), region = 36  ;;  %v2359_v1 = vrot.slane (!%p191_p2), %v2314_v0, 7  ;;  %v2377_v3 = vld [vmem:[%s3267_s2] ss:$0 sm:$0xff] (!%p191_p2)  ;;  %vm769_vm2 = vcmask (!%p191_p2), 1045504   ;;  %s2315_s28 = smov (!%p191_p2), 4  }
   0x7   : > { %s2316_s29 = smov (!%p191_p2), 8   ;;  %vm957_vm3 = vcmask (!%p191_p2), 31744   ;;  %vm992_vm4 = vcmask (!%p191_p2), 64512   ;;  %s2317_s9 = smov (!%p191_p2), 12   ;;  %vm1404_vm5 = vcmask (!%p191_p2), 1041408   ;;  %vm1253_vm6 = vcmask (!%p191_p2), 97280  }
   0x8   : > { %v2384_v7 = vsel (!%p191_p2), %vm412_vm0, 0.0, %v2359_v1  ;;  %v2388_v8 = vsel (!%p191_p2), %vm412_vm0, %v2359_v1, 0.0  ;;  %v583_v15 = vrot.slane (!%p191_p2), %v2359_v1, 1  ;;  %v771_v21 = vrot.slane (!%p191_p2), %v2359_v1, 2  ;;  %s2318_s12 = smov (!%p191_p2), 24  }
   0x9   : > { %vm1286_vm7 = vcmask (!%p191_p2), 195584   ;;  %vm1355_vm8 = vcmask (!%p191_p2), 293888   ;;  %vm1772_vm9 = vcmask (!%p191_p2), 25600  }
   0xd   : > { %s3272_s19 = smov (!%p222_p3, %s1860_s19), 1 }
   0xe   : > { %s1893_s20 = sshll.u32 %s3272_s19, 8  ;;  %s1869_s16 = sshll.u32 %s3272_s19, 1 }
   0xf   : > { %s2372_s25 = scalar_lea.vmem %s3265_s0, %s1893_s20  ;;  %s3127_s15 = scalar_lea.vmem %s3269_s4, %s1893_s20 }
  0x10   : > { %v237_v4 = vld [vmem:[%s2372_s25] sm:$0xff]  ;;  %v238_v5 = vld [vmem:[%s2372_s25 + $0x8] sm:$0xff]  ;;  %v239_v6 = vld [vmem:[%s2372_s25 + $0x10] sm:$0xff]  ;;  %s235_s21 = scalar_lea.vmem %s3270_s5, %s1869_s16 }
  0x11   : > { %v276_v9 = vmul.f32 %v2365_v2, %v237_v4  ;;  %v277_v10 = vmul.f32 %v2365_v2, %v238_v5  ;;  %v240_v11 = vld [vmem:[%s2372_s25 + $0x18] sm:$0xff]  ;;  %v278_v12 = vmul.f32 %v2365_v2, %v239_v6  ;;  %v241_v13 = vld [vmem:[%s2372_s25 + $0x20] sm:$0xff]  ;;  %v242_v14 = vld [vmem:[%s2372_s25 + $0x28] sm:$0xff] }
  0x12   : > { %v279_v16 = vmul.f32 %v2365_v2, %v240_v11  ;;  %v280_v17 = vmul.f32 %v2365_v2, %v241_v13  ;;  %v281_v18 = vmul.f32 %v2365_v2, %v242_v14  ;;  %v243_v19 = vld [vmem:[%s2372_s25 + $0x30] sm:$0xff]  ;;  %v244_v20 = vld [vmem:[%s2372_s25 + $0x38] sm:$0xff] }
  0x13   : > { %v315_v22 = vadd.f32 %v2377_v3, %v276_v9  ;;  %v316_v23 = vadd.f32 %v2377_v3, %v277_v10  ;;  %v317_v24 = vadd.f32 %v2377_v3, %v278_v12  ;;  %v282_v25 = vmul.f32 %v2365_v2, %v243_v19 }
  0x14   : > { %v318_v26 = vadd.f32 %v2377_v3, %v279_v16  ;;  %v319_v27 = vadd.f32 %v2377_v3, %v280_v17  ;;  %v320_v28 = vadd.f32 %v2377_v3, %v281_v18  ;;  %v283_v29 = vmul.f32 %v2365_v2, %v244_v20 }
  0x15   : > { %v347_v30 = vmax.f32 %v315_v22, 0.0  ;;  %v348_v31 = vmax.f32 %v316_v23, 0.0  ;;  %v349_v32 = vmax.f32 %v317_v24, 0.0  ;;  %v321_v33 = vadd.f32 %v2377_v3, %v282_v25  ;;  %v245_v25 = vld [vmem:[%s2372_s25 + $0x40] sm:$0xff] }
  0x16   : > { %v350_v34 = vmax.f32 %v318_v26, 0.0  ;;  %v351_v35 = vmax.f32 %v319_v27, 0.0  ;;  %v352_v36 = vmax.f32 %v320_v28, 0.0  ;;  %v322_v37 = vadd.f32 %v2377_v3, %v283_v29 }
  0x17   : > { %v415_v38 = vrot.slane %v347_v30, 7  ;;  %v416_v39 = vrot.slane %v348_v31, 7  ;;  %v418_v40 = vrot.slane %v349_v32, 7  ;;  %v353_v41 = vmax.f32 %v321_v33, 0.0 }
  0x18   : > { %v419_v42 = vrot.slane %v350_v34, 7  ;;  %v421_v43 = vrot.slane %v351_v35, 7  ;;  %v422_v44 = vrot.slane %v352_v36, 7  ;;  %v354_v45 = vmax.f32 %v322_v37, 0.0  ;;  %v246_v34 = vld [vmem:[%s2372_s25 + $0x48] sm:$0xff] }
  0x19   : > { %v2414_v46 = vsel %vm412_vm0, %v415_v38, %v416_v39  ;;  %v2417_v47 = vsel %vm412_vm0, 0.0, %v415_v38  ;;  %v531_v48 = vsel %vm412_vm0, %v416_v39, 0.0  ;;  %v2421_v49 = vsel %vm412_vm0, 0.0, %v418_v40  ;;  %v247_v39 = vld [vmem:[%s2372_s25 + $0x50] sm:$0xff] }
  0x1a   : > { %v587_v50 = vrot.slane %v2417_v47, 1  ;;  %v588_v51 = vrot.slane %v2414_v46, 1  ;;  %v590_v52 = vrot.slane %v531_v48, 1  ;;  %v775_v53 = vrot.slane %v2417_v47, 2 }
  0x1b   : > { %v776_v54 = vrot.slane %v2414_v46, 2  ;;  %v778_v55 = vrot.slane %v531_v48, 2  ;;  %v2428_v56 = vsel %vm412_vm0, %v418_v40, %v419_v42  ;;  %v532_v57 = vsel %vm412_vm0, %v419_v42, 0.0 }
  0x1c   : > { %v589_v58 = vsel %vm581_vm1, %v587_v50, %v588_v51  ;;  %v591_v59 = vsel %vm581_vm1, %v588_v51, %v590_v52  ;;  %v592_v60 = vrot.slane %v2421_v49, 1  ;;  %v593_v61 = vrot.slane %v2428_v56, 1  ;;  %v248_v51 = vld [vmem:[%s2372_s25 + $0x58] sm:$0xff] }
  0x1d   : > { %v1973_v62 = vpack.i.bf16 %v591_v59, %v589_v58  ;;  %v777_v63 = vsel %vm769_vm2, %v775_v53, %v776_v54  ;;  %v779_v0 = vsel %vm769_vm2, %v776_v54, %v778_v55  ;;  %v595_v4 = vrot.slane %v532_v57, 1 }
  0x1e   : > { %v1983_v5 = vpack.i.bf16 %v779_v0, %v777_v63  ;;  %v594_v6 = vsel %vm581_vm1, %v592_v60, %v593_v61  ;;  %v2439_v9 = vsel %vm412_vm0, %v421_v43, %v422_v44  ;;  %v2442_v10 = vsel %vm412_vm0, 0.0, %v421_v43  ;;  %v251_v63 = vld [vmem:[%s2372_s25 + $0x70] sm:$0xff] }
  0x1f   : > { %1974 = vrot.lane.b32.xlu0 %v1973_v62, %s2315_s28  ;;  %v596_v11 = vsel %vm581_vm1, %v593_v61, %v595_v4  ;;  %v533_v12 = vsel %vm412_vm0, %v422_v44, 0.0  ;;  %v597_v13 = vrot.slane %v2442_v10, 1  ;;  %v598_v14 = vrot.slane %v2439_v9, 1  ;;  %v249_v61 = vld [vmem:[%s2372_s25 + $0x60] sm:$0xff]  ;;  %v250_v62 = vld [vmem:[%s2372_s25 + $0x68] sm:$0xff] }
  0x20   : > { %1984 = vrot.lane.b32.xlu1 %v1983_v5, %s2316_s29  ;;  %v1978_v16 = vpack.i.bf16 %v596_v11, %v594_v6  ;;  %v600_v17 = vrot.slane %v533_v12, 1  ;;  %v780_v18 = vrot.slane %v2421_v49, 2  ;;  %v781_v19 = vrot.slane %v2428_v56, 2  ;;  %v252_v11 = vld [vmem:[%s2372_s25 + $0x78] sm:$0xff] }
  0x21   : > { %v599_v20 = vsel %vm581_vm1, %v597_v13, %v598_v14  ;;  %v783_v22 = vrot.slane %v532_v57, 2  ;;  %v785_v23 = vrot.slane %v2442_v10, 2  ;;  %v786_v24 = vrot.slane %v2439_v9, 2 }
  0x22   : > { %v601_v26 = vsel %vm581_vm1, %v598_v14, %v600_v17  ;;  %v782_v27 = vsel %vm769_vm2, %v780_v18, %v781_v19  ;;  %v788_v28 = vrot.slane %v533_v12, 2  ;;  %v424_v29 = vrot.slane %v353_v41, 7 }
  0x23   : > { %1979 = vrot.lane.b32.xlu0 %v1978_v16, %s2315_s28  ;;  %v1988_v30 = vpack.i.bf16 %v601_v26, %v599_v20  ;;  %v784_v31 = vsel %vm769_vm2, %v781_v19, %v783_v22  ;;  %v787_v32 = vsel %vm769_vm2, %v785_v23, %v786_v24  ;;  %v425_v33 = vrot.slane %v354_v45, 7 }
  0x24   : > { %v1993_v35 = vpack.i.bf16 %v784_v31, %v782_v27  ;;  %v789_v36 = vsel %vm769_vm2, %v786_v24, %v788_v28  ;;  %v2464_v37 = vsel %vm412_vm0, 0.0, %v424_v29  ;;  %v284_v38 = vmul.f32 %v2365_v2, %v245_v25 }
  0x25   : > { %1989 = vrot.lane.b32.xlu1 %v1988_v30, %s2315_s28  ;;  %v1998_v40 = vpack.i.bf16 %v789_v36, %v787_v32  ;;  %v2470_v41 = vsel %vm412_vm0, %v424_v29, %v425_v33  ;;  %v534_v42 = vsel %vm412_vm0, %v425_v33, 0.0  ;;  %v602_v43 = vrot.slane %v2464_v37, 1 }
  0x26   : > { %v603_v44 = vrot.slane %v2470_v41, 1  ;;  %v605_v45 = vrot.slane %v534_v42, 1  ;;  %v285_v48 = vmul.f32 %v2365_v2, %v246_v34  ;;  %v323_v50 = vadd.f32 %v2377_v3, %v284_v38 }
  0x27   : > { %1994 = vrot.lane.b32.xlu0 %v1993_v35, %s2316_s29  ;;  %v790_v52 = vrot.slane %v2464_v37, 2  ;;  %v791_v53 = vrot.slane %v2470_v41, 2  ;;  %v793_v54 = vrot.slane %v534_v42, 2  ;;  %v286_v55 = vmul.f32 %v2365_v2, %v247_v39 }
  0x28   : > { %v604_v57 = vsel %vm581_vm1, %v602_v43, %v603_v44  ;;  %v606_v58 = vsel %vm581_vm1, %v603_v44, %v605_v45  ;;  %v324_v59 = vadd.f32 %v2377_v3, %v285_v48  ;;  %v355_v60 = vmax.f32 %v323_v50, 0.0 }
  0x29   : > { %1999 = vrot.lane.b32.xlu1 %v1998_v40, %s2316_s29  ;;  %v2003_v0 = vpack.i.bf16 %v606_v58, %v604_v57  ;;  %v792_v4 = vsel %vm769_vm2, %v790_v52, %v791_v53  ;;  %v794_v5 = vsel %vm769_vm2, %v791_v53, %v793_v54  ;;  %v287_v6 = vmul.f32 %v2365_v2, %v248_v51 }
  0x2a   : > { %v356_v12 = vmax.f32 %v324_v59, 0.0  ;;  %v427_v13 = vrot.slane %v355_v60, 7  ;;  %v2013_v14 = vpack.i.bf16 %v794_v5, %v792_v4  ;;  %v325_v16 = vadd.f32 %v2377_v3, %v286_v55 }
  0x2b   : > { %2004 = vrot.lane.b32.xlu0 %v2003_v0, %s2315_s28  ;;  %v326_v17 = vadd.f32 %v2377_v3, %v287_v6  ;;  %v288_v18 = vmul.f32 %v2365_v2, %v249_v61  ;;  %v289_v19 = vmul.f32 %v2365_v2, %v250_v62  ;;  %v290_v20 = vmul.f32 %v2365_v2, %v251_v63 }
  0x2c   : > { %v428_v22 = vrot.slane %v356_v12, 7  ;;  %v2500_v23 = vsel %vm412_vm0, 0.0, %v427_v13  ;;  %v357_v24 = vmax.f32 %v325_v16, 0.0  ;;  %v291_v25 = vmul.f32 %v2365_v2, %v252_v11 }
  0x2d   : > { %v607_v26 = vrot.slane %v2500_v23, 1  ;;  %v795_v27 = vrot.slane %v2500_v23, 2  ;;  %v358_v28 = vmax.f32 %v326_v17, 0.0  ;;  %v327_v29 = vadd.f32 %v2377_v3, %v288_v18 }
  0x2e   : > { %v2507_v30 = vsel %vm412_vm0, %v427_v13, %v428_v22  ;;  %v535_v31 = vsel %vm412_vm0, %v428_v22, 0.0  ;;  %v430_v32 = vrot.slane %v357_v24, 7  ;;  %v328_v33 = vadd.f32 %v2377_v3, %v289_v19  ;;  %v253_v22 = vld [vmem:[%s2372_s25 + $0x80] sm:$0xff] }
  0x2f   : > { %v608_v34 = vrot.slane %v2507_v30, 1  ;;  %v610_v35 = vrot.slane %v535_v31, 1  ;;  %2014 = vrot.lane.b32.xlu0 %v2013_v14, %s2316_s29  ;;  %v796_v36 = vrot.slane %v2507_v30, 2  ;;  %v798_v38 = vrot.slane %v535_v31, 2 }
  0x30   : > { %v431_v39 = vrot.slane %v358_v28, 7  ;;  %v2515_v40 = vsel %vm412_vm0, 0.0, %v430_v32  ;;  %v359_v42 = vmax.f32 %v327_v29, 0.0  ;;  %v360_v43 = vmax.f32 %v328_v33, 0.0  ;;  %v254_v28 = vld [vmem:[%s2372_s25 + $0x88] sm:$0xff] }
  0x31   : > { %v609_v44 = vsel %vm581_vm1, %v607_v26, %v608_v34  ;;  %v611_v45 = vsel %vm581_vm1, %v608_v34, %v610_v35  ;;  %v797_v48 = vsel %vm769_vm2, %v795_v27, %v796_v36  ;;  %v799_v50 = vsel %vm769_vm2, %v796_v36, %v798_v38  ;;  %v255_v34 = vld [vmem:[%s2372_s25 + $0x90] sm:$0xff]  ;;  %v256_v35 = vld [vmem:[%s2372_s25 + $0x98] sm:$0xff] }
  0x32   : > { %v2008_v51 = vpack.i.bf16 %v611_v45, %v609_v44  ;;  %v2018_v52 = vpack.i.bf16 %v799_v50, %v797_v48  ;;  %v2522_v53 = vsel %vm412_vm0, %v430_v32, %v431_v39  ;;  %v536_v54 = vsel %vm412_vm0, %v431_v39, 0.0 }
  0x33   : > { %v612_v55 = vrot.slane %v2515_v40, 1  ;;  %v613_v57 = vrot.slane %v2522_v53, 1  ;;  %v615_v58 = vrot.slane %v536_v54, 1  ;;  %v433_v59 = vrot.slane %v359_v42, 7 }
  0x34   : > { %2009 = vrot.lane.b32.xlu1 %v2008_v51, %s2315_s28  ;;  %v434_v60 = vrot.slane %v360_v43, 7  ;;  %v800_v61 = vrot.slane %v2515_v40, 2  ;;  %v801_v62 = vrot.slane %v2522_v53, 2  ;;  %v803_v63 = vrot.slane %v536_v54, 2  ;;  %v257_v43 = vld [vmem:[%s2372_s25 + $0xa0] sm:$0xff] }
  0x35   : > { %v614_v0 = vsel %vm581_vm1, %v612_v55, %v613_v57  ;;  %v616_v4 = vsel %vm581_vm1, %v613_v57, %v615_v58  ;;  %v2533_v5 = vsel %vm412_vm0, 0.0, %v433_v59  ;;  %v329_v6 = vadd.f32 %v2377_v3, %v290_v20 }
  0x36   : > { %v2023_v11 = vpack.i.bf16 %v616_v4, %v614_v0  ;;  %v2537_v12 = vsel %vm412_vm0, %v433_v59, %v434_v60  ;;  %v537_v13 = vsel %vm412_vm0, %v434_v60, 0.0  ;;  %v617_v14 = vrot.slane %v2533_v5, 1 }
  0x37   : > { %v618_v16 = vrot.slane %v2537_v12, 1  ;;  %v620_v17 = vrot.slane %v537_v13, 1  ;;  %v802_v18 = vsel %vm769_vm2, %v800_v61, %v801_v62  ;;  %v804_v19 = vsel %vm769_vm2, %v801_v62, %v803_v63 }
  0x38   : > { %2019 = vrot.lane.b32.xlu1 %v2018_v52, %s2316_s29  ;;  %2024 = vrot.lane.b32.xlu0 %v2023_v11, %s2315_s28  ;;  %v2033_v20 = vpack.i.bf16 %v804_v19, %v802_v18  ;;  %v805_v24 = vrot.slane %v2533_v5, 2  ;;  %v806_v26 = vrot.slane %v2537_v12, 2  ;;  %v808_v27 = vrot.slane %v537_v13, 2 }
  0x39   : > { %v619_v29 = vsel %vm581_vm1, %v617_v14, %v618_v16  ;;  %v621_v31 = vsel %vm581_vm1, %v618_v16, %v620_v17  ;;  %v330_v32 = vadd.f32 %v2377_v3, %v291_v25  ;;  %v361_v33 = vmax.f32 %v329_v6, 0.0 }
  0x3a   : > { %v2028_v36 = vpack.i.bf16 %v621_v31, %v619_v29  ;;  %v807_v38 = vsel %vm769_vm2, %v805_v24, %v806_v26  ;;  %v809_v39 = vsel %vm769_vm2, %v806_v26, %v808_v27  ;;  %v292_v42 = vmul.f32 %v2365_v2, %v253_v22 }
  0x3b   : > { %v2038_v44 = vpack.i.bf16 %v809_v39, %v807_v38  ;;  %v362_v45 = vmax.f32 %v330_v32, 0.0  ;;  %v436_v48 = vrot.slane %v361_v33, 7  ;;  %v293_v50 = vmul.f32 %v2365_v2, %v254_v28 }
  0x3c   : > { %2029 = vrot.lane.b32.xlu1 %v2028_v36, %s2315_s28  ;;  %2034 = vrot.lane.b32.xlu0 %v2033_v20, %s2316_s29  ;;  %v331_v25 = vadd.f32 %v2377_v3, %v292_v42  ;;  %v294_v51 = vmul.f32 %v2365_v2, %v255_v34  ;;  %v295_v52 = vmul.f32 %v2365_v2, %v256_v35  ;;  %v582_v54 = vrot.slane %v2384_v7, 1  ;;  %v258_v34 = vld [vmem:[%s2372_s25 + $0xa8] sm:$0xff] }
  0x3d   : > { %v437_v55 = vrot.slane %v362_v45, 7  ;;  %v2567_v57 = vsel %vm412_vm0, 0.0, %v436_v48  ;;  %v332_v58 = vadd.f32 %v2377_v3, %v293_v50  ;;  %v296_v59 = vmul.f32 %v2365_v2, %v257_v43 }
  0x3e   : > { %v622_v60 = vrot.slane %v2567_v57, 1  ;;  %v363_v61 = vmax.f32 %v331_v25, 0.0  ;;  %v810_v62 = vrot.slane %v2567_v57, 2  ;;  %v333_v63 = vadd.f32 %v2377_v3, %v294_v51 }
  0x3f   : > { %v2575_v0 = vsel %vm412_vm0, %v436_v48, %v437_v55  ;;  %v538_v4 = vsel %vm412_vm0, %v437_v55, 0.0  ;;  %v364_v6 = vmax.f32 %v332_v58, 0.0  ;;  %v334_v11 = vadd.f32 %v2377_v3, %v295_v52 }
  0x40   : > { %2039 = vrot.lane.b32.xlu1 %v2038_v44, %s2316_s29  ;;  %v623_v13 = vrot.slane %v2575_v0, 1  ;;  %v625_v14 = vrot.slane %v538_v4, 1  ;;  %v439_v16 = vrot.slane %v363_v61, 7  ;;  %v811_v17 = vrot.slane %v2575_v0, 2  ;;  %v259_v61 = vld [vmem:[%s2372_s25 + $0xb0] sm:$0xff] }
  0x41   : > { %v440_v18 = vrot.slane %v364_v6, 7  ;;  %v813_v19 = vrot.slane %v538_v4, 2  ;;  %v365_v22 = vmax.f32 %v333_v63, 0.0  ;;  %v366_v20 = vmax.f32 %v334_v11, 0.0 }
  0x42   : > { %v624_v24 = vsel %vm581_vm1, %v622_v60, %v623_v13  ;;  %v626_v26 = vsel %vm581_vm1, %v623_v13, %v625_v14  ;;  %v2585_v27 = vsel %vm412_vm0, 0.0, %v439_v16  ;;  %v812_v28 = vsel %vm769_vm2, %v810_v62, %v811_v17 }
  0x43   : > { %v2043_v29 = vpack.i.bf16 %v626_v26, %v624_v24  ;;  %v2589_v31 = vsel %vm412_vm0, %v439_v16, %v440_v18  ;;  %v539_v32 = vsel %vm412_vm0, %v440_v18, 0.0  ;;  %v627_v33 = vrot.slane %v2585_v27, 1 }
  0x44   : > { %v628_v35 = vrot.slane %v2589_v31, 1  ;;  %v630_v36 = vrot.slane %v539_v32, 1  ;;  %v814_v38 = vsel %vm769_vm2, %v811_v17, %v813_v19  ;;  %v815_v39 = vrot.slane %v2585_v27, 2  ;;  %v260_v17 = vld [vmem:[%s2372_s25 + $0xb8] sm:$0xff] }
  0x45   : > { %2044 = vrot.lane.b32.xlu0 %v2043_v29, %s2315_s28  ;;  %v2053_v42 = vpack.i.bf16 %v814_v38, %v812_v28  ;;  %v816_v43 = vrot.slane %v2589_v31, 2  ;;  %v818_v44 = vrot.slane %v539_v32, 2  ;;  %v442_v45 = vrot.slane %v365_v22, 7  ;;  %v261_v32 = vld [vmem:[%s2372_s25 + $0xc0] sm:$0xff] }
  0x46   : > { %v629_v48 = vsel %vm581_vm1, %v627_v33, %v628_v35  ;;  %v631_v50 = vsel %vm581_vm1, %v628_v35, %v630_v36  ;;  %v443_v25 = vrot.slane %v366_v20, 7  ;;  %v297_v51 = vmul.f32 %v2365_v2, %v258_v34  ;;  %v262_v33 = vld [vmem:[%s2372_s25 + $0xc8] sm:$0xff]  ;;  %v263_v34 = vld [vmem:[%s2372_s25 + $0xd0] sm:$0xff] }
  0x47   : > { %v2048_v52 = vpack.i.bf16 %v631_v50, %v629_v48  ;;  %v817_v55 = vsel %vm769_vm2, %v815_v39, %v816_v43  ;;  %v819_v58 = vsel %vm769_vm2, %v816_v43, %v818_v44  ;;  %v2605_v60 = vsel %vm412_vm0, 0.0, %v442_v45 }
  0x48   : > { %v2058_v62 = vpack.i.bf16 %v819_v58, %v817_v55  ;;  %v2609_v63 = vsel %vm412_vm0, %v442_v45, %v443_v25  ;;  %v540_v4 = vsel %vm412_vm0, %v443_v25, 0.0  ;;  %v632_v6 = vrot.slane %v2605_v60, 1 }
  0x49   : > { %2049 = vrot.lane.b32.xlu1 %v2048_v52, %s2315_s28  ;;  %2054 = vrot.lane.b32.xlu0 %v2053_v42, %s2316_s29  ;;  %v633_v11 = vrot.slane %v2609_v63, 1  ;;  %v635_v13 = vrot.slane %v540_v4, 1  ;;  %v335_v14 = vadd.f32 %v2377_v3, %v296_v59  ;;  %v336_v16 = vadd.f32 %v2377_v3, %v297_v51 }
  0x4a   : > { %v820_v18 = vrot.slane %v2605_v60, 2  ;;  %v821_v19 = vrot.slane %v2609_v63, 2  ;;  %v823_v22 = vrot.slane %v540_v4, 2  ;;  %v298_v20 = vmul.f32 %v2365_v2, %v259_v61 }
  0x4b   : > { %v634_v24 = vsel %vm581_vm1, %v632_v6, %v633_v11  ;;  %v636_v26 = vsel %vm581_vm1, %v633_v11, %v635_v13  ;;  %v367_v28 = vmax.f32 %v335_v14, 0.0  ;;  %v368_v29 = vmax.f32 %v336_v16, 0.0 }
  0x4c   : > { %v2063_v59 = vpack.i.bf16 %v636_v26, %v634_v24  ;;  %v822_v35 = vsel %vm769_vm2, %v820_v18, %v821_v19  ;;  %v824_v36 = vsel %vm769_vm2, %v821_v19, %v823_v22  ;;  %v299_v38 = vmul.f32 %v2365_v2, %v260_v17 }
  0x4d   : > { %2059 = vrot.lane.b32.xlu1 %v2058_v62, %s2316_s29  ;;  %v445_v39 = vrot.slane %v367_v28, 7  ;;  %v446_v42 = vrot.slane %v368_v29, 7  ;;  %v2073_v43 = vpack.i.bf16 %v824_v36, %v822_v35  ;;  %v337_v44 = vadd.f32 %v2377_v3, %v298_v20 }
  0x4e   : > { %2064 = vrot.lane.b32.xlu0 %v2063_v59, %s2315_s28  ;;  %v338_v45 = vadd.f32 %v2377_v3, %v299_v38  ;;  %v300_v48 = vmul.f32 %v2365_v2, %v261_v32  ;;  %v301_v50 = vmul.f32 %v2365_v2, %v262_v33  ;;  %v302_v25 = vmul.f32 %v2365_v2, %v263_v34  ;;  %v264_v59 = vld [vmem:[%s2372_s25 + $0xd8] sm:$0xff] }
  0x4f   : > { %v2638_v51 = vsel %vm412_vm0, %v445_v39, %v446_v42  ;;  %v2641_v52 = vsel %vm412_vm0, 0.0, %v445_v39  ;;  %v541_v55 = vsel %vm412_vm0, %v446_v42, 0.0  ;;  %v369_v58 = vmax.f32 %v337_v44, 0.0 }
  0x50   : > { %v637_v61 = vrot.slane %v2641_v52, 1  ;;  %v638_v62 = vrot.slane %v2638_v51, 1  ;;  %v640_v4 = vrot.slane %v541_v55, 1  ;;  %v825_v6 = vrot.slane %v2641_v52, 2 }
  0x51   : > { %v826_v11 = vrot.slane %v2638_v51, 2  ;;  %v828_v13 = vrot.slane %v541_v55, 2  ;;  %v370_v14 = vmax.f32 %v338_v45, 0.0  ;;  %v448_v16 = vrot.slane %v369_v58, 7 }
  0x52   : > { %v639_v17 = vsel %vm581_vm1, %v637_v61, %v638_v62  ;;  %v641_v18 = vsel %vm581_vm1, %v638_v62, %v640_v4  ;;  %2074 = vrot.lane.b32.xlu0 %v2073_v43, %s2316_s29  ;;  %v339_v19 = vadd.f32 %v2377_v3, %v300_v48  ;;  %v340_v22 = vadd.f32 %v2377_v3, %v301_v50 }
  0x53   : > { %v2068_v20 = vpack.i.bf16 %v641_v18, %v639_v17  ;;  %v827_v24 = vsel %vm769_vm2, %v825_v6, %v826_v11  ;;  %v829_v26 = vsel %vm769_vm2, %v826_v11, %v828_v13  ;;  %v449_v28 = vrot.slane %v370_v14, 7 }
  0x54   : > { %v2078_v29 = vpack.i.bf16 %v829_v26, %v827_v24  ;;  %v2656_v32 = vsel %vm412_vm0, 0.0, %v448_v16  ;;  %v371_v33 = vmax.f32 %v339_v19, 0.0  ;;  %v372_v34 = vmax.f32 %v340_v22, 0.0 }
  0x55   : > { %2069 = vrot.lane.b32.xlu1 %v2068_v20, %s2315_s28  ;;  %v2661_v35 = vsel %vm412_vm0, %v448_v16, %v449_v28  ;;  %v542_v36 = vsel %vm412_vm0, %v449_v28, 0.0  ;;  %v642_v38 = vrot.slane %v2656_v32, 1  ;;  %v830_v39 = vrot.slane %v2656_v32, 2  ;;  %v266_v20 = vld [vmem:[%s2372_s25 + $0xe8] sm:$0xff] }
  0x56   : > { %v643_v42 = vrot.slane %v2661_v35, 1  ;;  %v645_v43 = vrot.slane %v542_v36, 1  ;;  %v451_v44 = vrot.slane %v371_v33, 7  ;;  %v452_v45 = vrot.slane %v372_v34, 7 }
  0x57   : > { %v831_v48 = vrot.slane %v2661_v35, 2  ;;  %v833_v50 = vrot.slane %v542_v36, 2  ;;  %v303_v55 = vmul.f32 %v2365_v2, %v264_v59  ;;  %v341_v58 = vadd.f32 %v2377_v3, %v302_v25  ;;  %v265_v25 = vld [vmem:[%s2372_s25 + $0xe0] sm:$0xff] }
  0x58   : > { %v644_v61 = vsel %vm581_vm1, %v642_v38, %v643_v42  ;;  %v646_v62 = vsel %vm581_vm1, %v643_v42, %v645_v43  ;;  %v2673_v4 = vsel %vm412_vm0, %v451_v44, %v452_v45  ;;  %v2676_v6 = vsel %vm412_vm0, 0.0, %v451_v44  ;;  %v267_v38 = vld [vmem:[%s2372_s25 + $0xf0] sm:$0xff] }
  0x59   : > { %2079 = vrot.lane.b32.xlu1 %v2078_v29, %s2316_s29  ;;  %v2083_v11 = vpack.i.bf16 %v646_v62, %v644_v61  ;;  %v543_v13 = vsel %vm412_vm0, %v452_v45, 0.0  ;;  %v647_v14 = vrot.slane %v2676_v6, 1  ;;  %v648_v16 = vrot.slane %v2673_v4, 1 }
  0x5a   : > { %v650_v17 = vrot.slane %v543_v13, 1  ;;  %v832_v18 = vsel %vm769_vm2, %v830_v39, %v831_v48  ;;  %v834_v19 = vsel %vm769_vm2, %v831_v48, %v833_v50  ;;  %v835_v22 = vrot.slane %v2676_v6, 2  ;;  %v268_v39 = vld [vmem:[%s2372_s25 + $0xf8] sm:$0xff] }
  0x5b   : > { %2084 = vrot.lane.b32.xlu0 %v2083_v11, %s2315_s28  ;;  %v649_v24 = vsel %vm581_vm1, %v647_v14, %v648_v16  ;;  %v2093_v26 = vpack.i.bf16 %v834_v19, %v832_v18  ;;  %v836_v28 = vrot.slane %v2673_v4, 2  ;;  %v838_v29 = vrot.slane %v543_v13, 2 }
  0x5c   : > { %v651_v33 = vsel %vm581_vm1, %v648_v16, %v650_v17  ;;  %v342_v34 = vadd.f32 %v2377_v3, %v303_v55  ;;  %v373_v59 = vmax.f32 %v341_v58, 0.0  ;;  %v304_v36 = vmul.f32 %v2365_v2, %v265_v25 }
  0x5d   : > { %v2088_v42 = vpack.i.bf16 %v651_v33, %v649_v24  ;;  %v837_v43 = vsel %vm769_vm2, %v835_v22, %v836_v28  ;;  %v839_v44 = vsel %vm769_vm2, %v836_v28, %v838_v29  ;;  %v305_v45 = vmul.f32 %v2365_v2, %v266_v20 }
  0x5e   : > { %v2098_v48 = vpack.i.bf16 %v839_v44, %v837_v43  ;;  %v374_v50 = vmax.f32 %v342_v34, 0.0  ;;  %v454_v61 = vrot.slane %v373_v59, 7  ;;  %v343_v62 = vadd.f32 %v2377_v3, %v304_v36 }
  0x5f   : > { %2089 = vrot.lane.b32.xlu1 %v2088_v42, %s2315_s28  ;;  %2094 = vrot.lane.b32.xlu0 %v2093_v26, %s2316_s29  ;;  %v344_v55 = vadd.f32 %v2377_v3, %v305_v45  ;;  %v306_v58 = vmul.f32 %v2365_v2, %v267_v38  ;;  %v307_v11 = vmul.f32 %v2365_v2, %v268_v39  ;;  %v585_v13 = vrot.slane %v2388_v8, 1 }
  0x60   : > { %v455_v14 = vrot.slane %v374_v50, 7  ;;  %v2706_v16 = vsel %vm412_vm0, 0.0, %v454_v61  ;;  %v375_v25 = vmax.f32 %v343_v62, 0.0  ;;  %v770_v17 = vrot.slane %v2384_v7, 2 }
  0x61   : > { %v652_v18 = vrot.slane %v2706_v16, 1  ;;  %v376_v19 = vmax.f32 %v344_v55, 0.0  ;;  %v840_v22 = vrot.slane %v2706_v16, 2  ;;  %v345_v20 = vadd.f32 %v2377_v3, %v306_v58 }
  0x62   : > { %v2713_v24 = vsel %vm412_vm0, %v454_v61, %v455_v14  ;;  %v544_v2 = vsel %vm412_vm0, %v455_v14, 0.0  ;;  %v457_v26 = vrot.slane %v375_v25, 7  ;;  %v346_v28 = vadd.f32 %v2377_v3, %v307_v11 }
  0x63   : > { %2099 = vrot.lane.b32.xlu1 %v2098_v48, %s2316_s29  ;;  %v653_v29 = vrot.slane %v2713_v24, 1  ;;  %v655_v33 = vrot.slane %v544_v2, 1  ;;  %v458_v34 = vrot.slane %v376_v19, 7  ;;  %v841_v59 = vrot.slane %v2713_v24, 2 }
  0x64   : > { %v2721_v36 = vsel %vm412_vm0, 0.0, %v457_v26  ;;  %v843_v38 = vrot.slane %v544_v2, 2  ;;  %v377_v39 = vmax.f32 %v345_v20, 0.0  ;;  %v378_v42 = vmax.f32 %v346_v28, 0.0 }
  0x65   : > { %v654_v43 = vsel %vm581_vm1, %v652_v18, %v653_v29  ;;  %v656_v44 = vsel %vm581_vm1, %v653_v29, %v655_v33  ;;  %v2726_v3 = vsel %vm412_vm0, %v457_v26, %v458_v34  ;;  %v545_v45 = vsel %vm412_vm0, %v458_v34, 0.0 }
  0x66   : > { %v2103_v48 = vpack.i.bf16 %v656_v44, %v654_v43  ;;  %v657_v50 = vrot.slane %v2721_v36, 1  ;;  %v658_v61 = vrot.slane %v2726_v3, 1  ;;  %v660_v62 = vrot.slane %v545_v45, 1 }
  0x67   : > { %v842_v55 = vsel %vm769_vm2, %v840_v22, %v841_v59  ;;  %v844_v58 = vsel %vm769_vm2, %v841_v59, %v843_v38  ;;  %v845_v11 = vrot.slane %v2721_v36, 2  ;;  %v846_v14 = vrot.slane %v2726_v3, 2 }
  0x68   : > { %2104 = vrot.lane.b32.xlu0 %v2103_v48, %s2315_s28  ;;  %v659_v25 = vsel %vm581_vm1, %v657_v50, %v658_v61  ;;  %v661_v18 = vsel %vm581_vm1, %v658_v61, %v660_v62  ;;  %v2113_v19 = vpack.i.bf16 %v844_v58, %v842_v55  ;;  %v848_v20 = vrot.slane %v545_v45, 2 }
  0x69   : > { %v2108_v2 = vpack.i.bf16 %v661_v18, %v659_v25  ;;  %v847_v26 = vsel %vm769_vm2, %v845_v11, %v846_v14  ;;  %v460_v28 = vrot.slane %v377_v39, 7  ;;  %v461_v29 = vrot.slane %v378_v42, 7 }
  0x6a   : > { %v849_v22 = vsel %vm769_vm2, %v846_v14, %v848_v20  ;;  %v584_v33 = vsel %vm581_vm1, %v582_v54, %v583_v15  ;;  %v586_v34 = vsel %vm581_vm1, %v583_v15, %v585_v13  ;;  %v773_v59 = vrot.slane %v2388_v8, 2 }
  0x6b   : > { %2109 = vrot.lane.b32.xlu1 %v2108_v2, %s2315_s28  ;;  %v2118_v38 = vpack.i.bf16 %v849_v22, %v847_v26  ;;  %v2751_v39 = vsel %vm412_vm0, %v460_v28, %v461_v29  ;;  %v2754_v42 = vsel %vm412_vm0, 0.0, %v460_v28  ;;  %v546_v43 = vsel %vm412_vm0, %v461_v29, 0.0 }
  0x6c   : > { %2114 = vrot.lane.b32.xlu0 %v2113_v19, %s2316_s29  ;;  %v662_v54 = vrot.slane %v2754_v42, 1  ;;  %v663_v44 = vrot.slane %v2751_v39, 1  ;;  %v665_v15 = vrot.slane %v546_v43, 1  ;;  %v850_v8 = vrot.slane %v2754_v42, 2  ;;  %v2303_v19 = vld [vmem:[%s3268_s3] sm:$0xff]  }
  0x6d   : > { %v851_v13 = vrot.slane %v2751_v39, 2  ;;  %v853_v45 = vrot.slane %v546_v43, 2  ;;  %v2128_v62 = vpack.i.bf16 %v586_v34, %v584_v33  ;;  %v772_v11 = vsel %vm769_vm2, %v770_v17, %v771_v21  ;;  %1914 = vmatprep.subr.bf16.mxu0 %v2303_v19  ;;  %1952 = vmatprep.subr.bf16.mxu1 %v2303_v19  ;;  %v2304_v33 = vld [vmem:[%s3268_s3 + $0x8] sm:$0xff]  }
  0x6e   : > { %v664_v48 = vsel %vm581_vm1, %v662_v54, %v663_v44  ;;  %v666_v50 = vsel %vm581_vm1, %v663_v44, %v665_v15  ;;  %v774_v14 = vsel %vm769_vm2, %v771_v21, %v773_v59  ;;  %1915 = vmatpush3.bf16.msra.mxu0 %v2303_v19  ;;  %1955 = vmatpush3.bf16.msra.mxu1 %v2303_v19 }
  0x6f   : > { %2119 = vrot.lane.b32.xlu1 %v2118_v38, %s2316_s29  ;;  %v2123_v61 = vpack.i.bf16 %v666_v50, %v664_v48  ;;  %v852_v55 = vsel %vm769_vm2, %v850_v8, %v851_v13  ;;  %v854_v58 = vsel %vm769_vm2, %v851_v13, %v853_v45  ;;  %v2138_v18 = vpack.i.bf16 %v774_v14, %v772_v11  ;;  %v2305_v13 = vld [vmem:[%s3268_s3 + $0x10] ss:$0 sps:$4 sm:$0x33]  }
  0x70   : > { %v2133_v25 = vpack.i.bf16 %v854_v58, %v852_v55  ;;  %1916 = vmatprep.subr.bf16.mxu0 %v2304_v33  ;;  %1953 = vmatprep.subr.bf16.mxu1 %v2304_v33  ;;  %v1406_v11 = vsel %vm1404_vm5, %v2305_v13, 0 }
  0x71   : > { %2124 = vrot.lane.b32.xlu0 %v2123_v61, %s2315_s28 }
  0x72   : > { %1917 = vmatpush3.bf16.msra.mxu0 %v2304_v33  ;;  %1956 = vmatpush3.bf16.msra.mxu1 %v2304_v33 }
  0x73   : > { %2129 = vrot.lane.b32.xlu1 %v2128_v62, %s2315_s28  ;;  %1958 = vmatprep.subr.msk.bf16.mxu0 %vm1404_vm5, %v2305_v13 }
  0x74   : > { %1959 = vmatprep.subr.msk.bf16.mxu1 %vm1404_vm5, %v2305_v13 }
  0x75   : > { %2134 = vrot.lane.b32.xlu0 %v2133_v25, %s2316_s29 }
  0x76   : > { %1919 = vmatpush3.bf16.msra.mxu0 %v1406_v11  ;;  %1957 = vmatpush3.bf16.msra.mxu1 %v1406_v11 }
  0x77   : > { %2139 = vrot.lane.b32.xlu1 %v2138_v18, %s2316_s29 }
  0x91   : > { %v1975_v21 = vpop.permute.xlu0 %1974 }
  0x92   : > { %v1977_v17 = vunpack.i.h.bf16 %v1975_v21  ;;  %v1976_v20 = vunpack.i.l.bf16 %v1975_v21  ;;  %v1985_v2 = vpop.permute.xlu1 %1984 }
  0x93   : > { %v1987_v26 = vunpack.i.h.bf16 %v1985_v2  ;;  %v1986_v28 = vunpack.i.l.bf16 %v1985_v2 }
  0x94   : > { %v961_v29 = vsel %vm957_vm3, %v2414_v46, %v1977_v17  ;;  %v960_v22 = vsel %vm957_vm3, %v2417_v47, %v1976_v20 }
  0x95   : > { %v1980_v34 = vpop.permute.xlu0 %1979  ;;  %v2790_v59 = vsel %vm992_vm4, %v960_v22, %v1986_v28  ;;  %v2793_v38 = vsel %vm992_vm4, %v961_v29, %v1987_v26 }
  0x96   : > { %v1982_v43 = vunpack.i.h.bf16 %v1980_v34  ;;  %v2143_v54 = vpack.i.bf16 %v2793_v38, %v2790_v59  ;;  %v1981_v46 = vunpack.i.l.bf16 %v1980_v34 }
  0x97   : > { %v1990_v44 = vpop.permute.xlu1 %1989 }
  0x98   : > { %v1992_v47 = vunpack.i.h.bf16 %v1990_v44  ;;  %v1991_v15 = vunpack.i.l.bf16 %v1990_v44  ;;  %2144 = vrot.lane.b32.xlu0 %v2143_v54, %s2317_s9  ;;  %v963_v45 = vsel %vm957_vm3, %v2428_v56, %v1982_v43  ;;  %v962_v61 = vsel %vm957_vm3, %v2421_v49, %v1981_v46 }
  0x99   : > { %v1995_v8 = vpop.permute.xlu0 %1994 }
  0x9a   : > { %v1997_v48 = vunpack.i.h.bf16 %v1995_v8  ;;  %v1996_v50 = vunpack.i.l.bf16 %v1995_v8  ;;  %v965_v62 = vsel %vm957_vm3, %v2439_v9, %v1992_v47  ;;  %v964_v55 = vsel %vm957_vm3, %v2442_v10, %v1991_v15 }
  0x9b   : > { %v2000_v58 = vpop.permute.xlu1 %1999 }
  0x9c   : > { %v2002_v14 = vunpack.i.h.bf16 %v2000_v58  ;;  %v2001_v25 = vunpack.i.l.bf16 %v2000_v58  ;;  %v2810_v18 = vsel %vm992_vm4, %v962_v61, %v1996_v50  ;;  %v2813_v56 = vsel %vm992_vm4, %v963_v45, %v1997_v48 }
  0x9d   : > { %v2005_v49 = vpop.permute.xlu0 %2004  ;;  %v2148_v9 = vpack.i.bf16 %v2813_v56, %v2810_v18 }
  0x9e   : > { %v2818_v10 = vsel %vm992_vm4, %v964_v55, %v2001_v25  ;;  %v2821_v19 = vsel %vm992_vm4, %v965_v62, %v2002_v14  ;;  %v2007_v21 = vunpack.i.h.bf16 %v2005_v49  ;;  %v2006_v17 = vunpack.i.l.bf16 %v2005_v49 }
  0x9f   : > { %2149 = vrot.lane.b32.xlu1 %v2148_v9, %s2317_s9  ;;  %2154 = vrot.lane.b32.xlu0 %v2148_v9, %s2318_s12  ;;  %v2158_v2 = vpack.i.bf16 %v2821_v19, %v2818_v10 }
  0xa0   : > { %v967_v29 = vsel %vm957_vm3, %v2470_v41, %v2007_v21  ;;  %v966_v22 = vsel %vm957_vm3, %v2464_v37, %v2006_v17 }
  0xa1   : > { %v2015_v20 = vpop.permute.xlu0 %2014 }
  0xa2   : > { %v2017_v26 = vunpack.i.h.bf16 %v2015_v20  ;;  %v2016_v28 = vunpack.i.l.bf16 %v2015_v20 }
  0xa3   : > { %2159 = vrot.lane.b32.xlu1 %v2158_v2, %s2318_s12  ;;  %2164 = vrot.lane.b32.xlu0 %v2158_v2, %s2317_s9 }
  0xa4   : > { %v2834_v33 = vsel %vm992_vm4, %v966_v22, %v2016_v28  ;;  %v2837_v34 = vsel %vm992_vm4, %v967_v29, %v2017_v26 }
  0xa5   : > { %v2168_v43 = vpack.i.bf16 %v2837_v34, %v2834_v33 }
  0xa6   : > { %v2010_v54 = vpop.permute.xlu1 %2009 }
  0xa7   : > { %v2012_v46 = vunpack.i.h.bf16 %v2010_v54  ;;  %v2011_v44 = vunpack.i.l.bf16 %v2010_v54  ;;  %2169 = vrot.lane.b32.xlu1 %v2168_v43, %s2317_s9  ;;  %2174 = vrot.lane.b32.xlu0 %v2168_v43, %s2318_s12 }
  0xa9   : > { %v969_v37 = vsel %vm957_vm3, %v2507_v30, %v2012_v46  ;;  %v968_v41 = vsel %vm957_vm3, %v2500_v23, %v2011_v44 }
  0xaa   : > { %v2020_v47 = vpop.permute.xlu1 %2019  ;;  %v2025_v15 = vpop.permute.xlu0 %2024 }
  0xab   : > { %v2022_v8 = vunpack.i.h.bf16 %v2020_v47  ;;  %v2021_v13 = vunpack.i.l.bf16 %v2020_v47  ;;  %v2027_v45 = vunpack.i.h.bf16 %v2025_v15  ;;  %v2026_v48 = vunpack.i.l.bf16 %v2025_v15 }
  0xad   : > { %v2848_v50 = vsel %vm992_vm4, %v968_v41, %v2021_v13  ;;  %v2851_v61 = vsel %vm992_vm4, %v969_v37, %v2022_v8  ;;  %v971_v25 = vsel %vm957_vm3, %v2522_v53, %v2027_v45  ;;  %v970_v49 = vsel %vm957_vm3, %v2515_v40, %v2026_v48 }
  0xae   : > { %v2030_v62 = vpop.permute.xlu1 %2029  ;;  %v2035_v55 = vpop.permute.xlu0 %2034  ;;  %v2178_v30 = vpack.i.bf16 %v2851_v61, %v2848_v50 }
  0xaf   : > { %v2032_v58 = vunpack.i.h.bf16 %v2030_v62  ;;  %v2031_v11 = vunpack.i.l.bf16 %v2030_v62  ;;  %v2037_v23 = vunpack.i.h.bf16 %v2035_v55  ;;  %v2036_v14 = vunpack.i.l.bf16 %v2035_v55 }
  0xb0   : > { %2179 = vrot.lane.b32.xlu1 %v2178_v30, %s2318_s12  ;;  %2184 = vrot.lane.b32.xlu0 %v2178_v30, %s2317_s9 }
  0xb1   : > { %v2862_v9 = vsel %vm992_vm4, %v970_v49, %v2036_v14  ;;  %v2865_v21 = vsel %vm992_vm4, %v971_v25, %v2037_v23  ;;  %v973_v17 = vsel %vm957_vm3, %v2537_v12, %v2032_v58  ;;  %v972_v20 = vsel %vm957_vm3, %v2533_v5, %v2031_v11 }
  0xb2   : > { %v2040_v53 = vpop.permute.xlu1 %2039  ;;  %v2188_v40 = vpack.i.bf16 %v2865_v21, %v2862_v9 }
  0xb3   : > { %v2042_v2 = vunpack.i.h.bf16 %v2040_v53  ;;  %v2041_v26 = vunpack.i.l.bf16 %v2040_v53 }
  0xb4   : > { %2189 = vrot.lane.b32.xlu1 %v2188_v40, %s2317_s9  ;;  %2194 = vrot.lane.b32.xlu0 %v2188_v40, %s2318_s12 }
  0xb5   : > { %v2876_v28 = vsel %vm992_vm4, %v972_v20, %v2041_v26  ;;  %v2879_v29 = vsel %vm992_vm4, %v973_v17, %v2042_v2 }
  0xb6   : > { %v2198_v12 = vpack.i.bf16 %v2879_v29, %v2876_v28 }
  0xb7   : > { %v2045_v5 = vpop.permute.xlu0 %2044 }
  0xb8   : > { %2199 = vrot.lane.b32.xlu1 %v2198_v12, %s2318_s12  ;;  %2204 = vrot.lane.b32.xlu0 %v2198_v12, %s2317_s9  ;;  %v2047_v22 = vunpack.i.h.bf16 %v2045_v5  ;;  %v2046_v43 = vunpack.i.l.bf16 %v2045_v5 }
  0xba   : > { %v975_v15 = vsel %vm957_vm3, %v2575_v0, %v2047_v22  ;;  %v974_v8 = vsel %vm957_vm3, %v2567_v57, %v2046_v43 }
  0xbb   : > { %v2050_v54 = vpop.permute.xlu1 %2049  ;;  %v2055_v46 = vpop.permute.xlu0 %2054 }
  0xbc   : > { %v2052_v44 = vunpack.i.h.bf16 %v2050_v54  ;;  %v2051_v37 = vunpack.i.l.bf16 %v2050_v54  ;;  %v2057_v41 = vunpack.i.h.bf16 %v2055_v46  ;;  %v2056_v47 = vunpack.i.l.bf16 %v2055_v46 }
  0xbe   : > { %v2890_v13 = vsel %vm992_vm4, %v974_v8, %v2056_v47  ;;  %v2893_v45 = vsel %vm992_vm4, %v975_v15, %v2057_v41  ;;  %v977_v48 = vsel %vm957_vm3, %v2589_v31, %v2052_v44  ;;  %v976_v62 = vsel %vm957_vm3, %v2585_v27, %v2051_v37 }
  0xbf   : > { %v2060_v55 = vpop.permute.xlu1 %2059  ;;  %v2208_v30 = vpack.i.bf16 %v2893_v45, %v2890_v13 }
  0xc0   : > { %v2062_v0 = vunpack.i.h.bf16 %v2060_v55  ;;  %v2061_v58 = vunpack.i.l.bf16 %v2060_v55  ;;  %v2065_v11 = vpop.permute.xlu0 %2064 }
  0xc1   : > { %2209 = vrot.lane.b32.xlu1 %v2208_v30, %s2317_s9  ;;  %2214 = vrot.lane.b32.xlu0 %v2208_v30, %s2318_s12  ;;  %v2067_v57 = vunpack.i.h.bf16 %v2065_v11  ;;  %v2066_v23 = vunpack.i.l.bf16 %v2065_v11 }
  0xc2   : > { %v2904_v14 = vsel %vm992_vm4, %v976_v62, %v2061_v58  ;;  %v2907_v31 = vsel %vm992_vm4, %v977_v48, %v2062_v0 }
  0xc3   : > { %v2218_v27 = vpack.i.bf16 %v2907_v31, %v2904_v14  ;;  %v979_v20 = vsel %vm957_vm3, %v2609_v63, %v2067_v57  ;;  %v978_v53 = vsel %vm957_vm3, %v2605_v60, %v2066_v23 }
  0xc4   : > { %v2075_v25 = vpop.permute.xlu0 %2074 }
  0xc5   : > { %v2077_v49 = vunpack.i.h.bf16 %v2075_v25  ;;  %v2076_v17 = vunpack.i.l.bf16 %v2075_v25  ;;  %2219 = vrot.lane.b32.xlu1 %v2218_v27, %s2318_s12  ;;  %2224 = vrot.lane.b32.xlu0 %v2218_v27, %s2317_s9 }
  0xc7   : > { %v2070_v40 = vpop.permute.xlu1 %2069  ;;  %v2918_v2 = vsel %vm992_vm4, %v978_v53, %v2076_v17  ;;  %v2921_v26 = vsel %vm992_vm4, %v979_v20, %v2077_v49 }
  0xc8   : > { %v2072_v12 = vunpack.i.h.bf16 %v2070_v40  ;;  %v2071_v5 = vunpack.i.l.bf16 %v2070_v40  ;;  %v2228_v22 = vpack.i.bf16 %v2921_v26, %v2918_v2 }
  0xca   : > { %2229 = vrot.lane.b32.xlu1 %v2228_v22, %s2317_s9  ;;  %2234 = vrot.lane.b32.xlu0 %v2228_v22, %s2318_s12  ;;  %v981_v63 = vsel %vm957_vm3, %v2638_v51, %v2072_v12  ;;  %v980_v60 = vsel %vm957_vm3, %v2641_v52, %v2071_v5 }
  0xcb   : > { %v2080_v43 = vpop.permute.xlu1 %2079 }
  0xcc   : > { %v2082_v54 = vunpack.i.h.bf16 %v2080_v43  ;;  %v2081_v46 = vunpack.i.l.bf16 %v2080_v43 }
  0xcd   : > { %v2085_v44 = vpop.permute.xlu0 %2084 }
  0xce   : > { %v2932_v37 = vsel %vm992_vm4, %v980_v60, %v2081_v46  ;;  %v2935_v41 = vsel %vm992_vm4, %v981_v63, %v2082_v54  ;;  %v2087_v47 = vunpack.i.h.bf16 %v2085_v44  ;;  %v2086_v15 = vunpack.i.l.bf16 %v2085_v44 }
  0xcf   : > { %v2238_v8 = vpack.i.bf16 %v2935_v41, %v2932_v37 }
  0xd0   : > { %v983_v0 = vsel %vm957_vm3, %v2661_v35, %v2087_v47  ;;  %v982_v58 = vsel %vm957_vm3, %v2656_v32, %v2086_v15 }
  0xd1   : > { %v2090_v48 = vpop.permute.xlu1 %2089  ;;  %v2095_v51 = vpop.permute.xlu0 %2094  ;;  %2239 = vrot.lane.b32.xlu1 %v2238_v8, %s2318_s12  ;;  %2244 = vrot.lane.b32.xlu0 %v2238_v8, %s2317_s9 }
  0xd2   : > { %v2092_v52 = vunpack.i.h.bf16 %v2090_v48  ;;  %v2091_v62 = vunpack.i.l.bf16 %v2090_v48  ;;  %v2097_v55 = vunpack.i.h.bf16 %v2095_v51  ;;  %v2096_v30 = vunpack.i.l.bf16 %v2095_v51 }
  0xd4   : > { %v2946_v11 = vsel %vm992_vm4, %v982_v58, %v2096_v30  ;;  %v2949_v57 = vsel %vm992_vm4, %v983_v0, %v2097_v55  ;;  %v985_v23 = vsel %vm957_vm3, %v2673_v4, %v2092_v52  ;;  %v984_v27 = vsel %vm957_vm3, %v2676_v6, %v2091_v62 }
  0xd5   : > { %v2100_v25 = vpop.permute.xlu1 %2099  ;;  %v2248_v49 = vpack.i.bf16 %v2949_v57, %v2946_v11 }
  0xd6   : > { %v2102_v35 = vunpack.i.h.bf16 %v2100_v25  ;;  %v2101_v17 = vunpack.i.l.bf16 %v2100_v25 }
  0xd7   : > { %2249 = vrot.lane.b32.xlu1 %v2248_v49, %s2317_s9  ;;  %2254 = vrot.lane.b32.xlu0 %v2248_v49, %s2318_s12 }
  0xd8   : > { %v2960_v32 = vsel %vm992_vm4, %v984_v27, %v2101_v17  ;;  %v2963_v20 = vsel %vm992_vm4, %v985_v23, %v2102_v35 }
  0xd9   : > { %v2258_v4 = vpack.i.bf16 %v2963_v20, %v2960_v32 }
  0xda   : > { %v2105_v6 = vpop.permute.xlu0 %2104 }
  0xdb   : > { %2259 = vrot.lane.b32.xlu1 %v2258_v4, %s2318_s12  ;;  %2264 = vrot.lane.b32.xlu0 %v2258_v4, %s2317_s9  ;;  %v2107_v53 = vunpack.i.h.bf16 %v2105_v6  ;;  %v2106_v40 = vunpack.i.l.bf16 %v2105_v6 }
  0xdd   : > { %v2110_v12 = vpop.permute.xlu1 %2109  ;;  %v987_v54 = vsel %vm957_vm3, %v2713_v24, %v2107_v53  ;;  %v986_v46 = vsel %vm957_vm3, %v2706_v16, %v2106_v40 }
  0xde   : > { %v2112_v5 = vunpack.i.h.bf16 %v2110_v12  ;;  %v2111_v22 = vunpack.i.l.bf16 %v2110_v12  ;;  %v2115_v63 = vpop.permute.xlu0 %2114 }
  0xdf   : > { %v2117_v60 = vunpack.i.h.bf16 %v2115_v63  ;;  %v2116_v43 = vunpack.i.l.bf16 %v2115_v63 }
  0xe0   : > { %v989_v44 = vsel %vm957_vm3, %v2726_v3, %v2112_v5  ;;  %v988_v47 = vsel %vm957_vm3, %v2721_v36, %v2111_v22 }
  0xe1   : > { %v2120_v15 = vpop.permute.xlu1 %2119  ;;  %v2978_v8 = vsel %vm992_vm4, %v986_v46, %v2116_v43  ;;  %v2981_v48 = vsel %vm992_vm4, %v987_v54, %v2117_v60 }
  0xe2   : > { %v2122_v51 = vunpack.i.h.bf16 %v2120_v15  ;;  %v2121_v52 = vunpack.i.l.bf16 %v2120_v15  ;;  %v2268_v24 = vpack.i.bf16 %v2981_v48, %v2978_v8 }
  0xe3   : > { %v2125_v62 = vpop.permute.xlu0 %2124 }
  0xe4   : > { %2269 = vrot.lane.b32.xlu1 %v2268_v24, %s2317_s9  ;;  %2274 = vrot.lane.b32.xlu0 %v2268_v24, %s2318_s12  ;;  %v2988_v16 = vsel %vm992_vm4, %v988_v47, %v2121_v52  ;;  %v2991_v36 = vsel %vm992_vm4, %v989_v44, %v2122_v51  ;;  %v2127_v3 = vunpack.i.h.bf16 %v2125_v62  ;;  %v2126_v55 = vunpack.i.l.bf16 %v2125_v62 }
  0xe5   : > { %v2130_v30 = vpop.permute.xlu1 %2129  ;;  %v2278_v23 = vpack.i.bf16 %v2991_v36, %v2988_v16 }
  0xe6   : > { %v2132_v0 = vunpack.i.h.bf16 %v2130_v30  ;;  %v2131_v58 = vunpack.i.l.bf16 %v2130_v30  ;;  %v991_v35 = vsel %vm957_vm3, %v2751_v39, %v2127_v3  ;;  %v990_v17 = vsel %vm957_vm3, %v2754_v42, %v2126_v55 }
  0xe7   : > { %v2135_v27 = vpop.permute.xlu0 %2134 }
  0xe8   : > { %v2137_v25 = vunpack.i.h.bf16 %v2135_v27  ;;  %v2136_v49 = vunpack.i.l.bf16 %v2135_v27  ;;  %2279 = vrot.lane.b32.xlu1 %v2278_v23, %s2318_s12  ;;  %2284 = vrot.lane.b32.xlu0 %v2278_v23, %s2317_s9  ;;  %v959_v4 = vsel %vm957_vm3, %v2359_v1, %v2132_v0  ;;  %v958_v6 = vsel %vm957_vm3, %v2384_v7, %v2131_v58 }
  0xe9   : > { %v2140_v53 = vpop.permute.xlu1 %2139 }
  0xea   : > { %v2142_v40 = vunpack.i.h.bf16 %v2140_v53  ;;  %v2141_v12 = vunpack.i.l.bf16 %v2140_v53  ;;  %v1025_v5 = vsel %vm992_vm4, %v990_v17, %v2136_v49  ;;  %v1026_v22 = vsel %vm992_vm4, %v991_v35, %v2137_v25 }
  0xeb   : > { %v2288_v63 = vpack.i.bf16 %v1026_v22, %v1025_v5 }
  0xec   : > { %v993_v60 = vsel %vm992_vm4, %v958_v6, %v2141_v12  ;;  %v994_v39 = vsel %vm992_vm4, %v959_v4, %v2142_v40 }
  0xed   : > { %2289 = vrot.lane.b32.xlu1 %v2288_v63, %s2317_s9  ;;  %2294 = vrot.lane.b32.xlu0 %v2288_v63, %s2318_s12  ;;  %v2298_v1 = vpack.i.bf16 %v994_v39, %v993_v60 }
  0xf1   : > { %2299 = vrot.lane.b32.xlu1 %v2298_v1, %s2318_s12 }
 0x10a   : > { %v2145_v7 = vpop.permute.xlu0 %2144 }
 0x10b   : > { %v2147_v42 = vunpack.i.h.bf16 %v2145_v7  ;;  %v2146_v43 = vunpack.i.l.bf16 %v2145_v7 }
 0x10d   : > { %v1254_v52 = vsel %vm1253_vm6, %v993_v60, %v2146_v43  ;;  %v1255_v24 = vsel %vm1253_vm6, %v994_v39, %v2147_v42 }
 0x111   : > { %v2150_v54 = vpop.permute.xlu1 %2149  ;;  %v2155_v46 = vpop.permute.xlu0 %2154 }
 0x112   : > { %v2157_v44 = vunpack.i.h.bf16 %v2155_v46  ;;  %v2156_v47 = vunpack.i.l.bf16 %v2155_v46  ;;  %v2152_v15 = vunpack.i.h.bf16 %v2150_v54  ;;  %v2151_v51 = vunpack.i.l.bf16 %v2150_v54 }
 0x114   : > { %v1287_v62 = vsel %vm1286_vm7, %v1254_v52, %v2156_v47  ;;  %v1288_v3 = vsel %vm1286_vm7, %v1255_v24, %v2157_v44  ;;  %v1256_v27 = vsel %vm1253_vm6, %v2790_v59, %v2151_v51  ;;  %v1257_v25 = vsel %vm1253_vm6, %v2793_v38, %v2152_v15 }
 0x115   : > { %v2160_v55 = vpop.permute.xlu1 %2159  ;;  %v2165_v30 = vpop.permute.xlu0 %2164  ;;  %v1319_v0 = vpack.c.bf16 %v1288_v3, %v1287_v62 }
 0x116   : > { %v2162_v58 = vunpack.i.h.bf16 %v2160_v55  ;;  %v2161_v23 = vunpack.i.l.bf16 %v2160_v55  ;;  %v2167_v49 = vunpack.i.h.bf16 %v2165_v30  ;;  %v2166_v35 = vunpack.i.l.bf16 %v2165_v30 }
 0x117   : > { %1920 = vmatprep.mubr.msk.bf16.mxu0 %vm1355_vm8, %v1319_v0 }
 0x118   : > { %v1289_v17 = vsel %vm1286_vm7, %v1256_v27, %v2161_v23  ;;  %v1290_v4 = vsel %vm1286_vm7, %v1257_v25, %v2162_v58  ;;  %v1259_v5 = vsel %vm1253_vm6, %v2813_v56, %v2167_v49  ;;  %v1258_v59 = vsel %vm1253_vm6, %v2810_v18, %v2166_v35 }
 0x119   : > { %v1320_v6 = vpack.c.bf16 %v1290_v4, %v1289_v17  ;;  %v2175_v53 = vpop.permute.xlu0 %2174  ;;  %v2170_v38 = vpop.permute.xlu1 %2169 }
 0x11a   : > { %v2177_v40 = vunpack.i.h.bf16 %v2175_v53  ;;  %v2176_v12 = vunpack.i.l.bf16 %v2175_v53  ;;  %v2172_v39 = vunpack.i.h.bf16 %v2170_v38  ;;  %v2171_v1 = vunpack.i.l.bf16 %v2170_v38 }
 0x11b   : > { %1921 = vmatmul.mubr.msk.bf16.vlgmr.msra.gmra.mrb[0].mxu0 %vm1355_vm8, %v1320_v6 }
 0x11c   : > { %v1291_v22 = vsel %vm1286_vm7, %v1258_v59, %v2176_v12  ;;  %v1292_v63 = vsel %vm1286_vm7, %v1259_v5, %v2177_v40  ;;  %v1261_v56 = vsel %vm1253_vm6, %v2821_v19, %v2172_v39  ;;  %v1260_v18 = vsel %vm1253_vm6, %v2818_v10, %v2171_v1 }
 0x11d   : > { %v1321_v60 = vpack.c.bf16 %v1292_v63, %v1291_v22 }
 0x11f   : > { %1924 = vmatprep.mubr.msk.bf16.mxu0 %vm1355_vm8, %v1321_v60 }
 0x122   : > { %v2180_v7 = vpop.permute.xlu1 %2179  ;;  %v2185_v42 = vpop.permute.xlu0 %2184 }
 0x123   : > { %v2182_v43 = vunpack.i.h.bf16 %v2180_v7  ;;  %v2181_v54 = vunpack.i.l.bf16 %v2180_v7  ;;  %v2187_v46 = vunpack.i.h.bf16 %v2185_v42  ;;  %v2186_v44 = vunpack.i.l.bf16 %v2185_v42 }
 0x125   : > { %v1293_v47 = vsel %vm1286_vm7, %v1260_v18, %v2181_v54  ;;  %v1294_v15 = vsel %vm1286_vm7, %v1261_v56, %v2182_v43  ;;  %v1263_v55 = vsel %vm1253_vm6, %v2837_v34, %v2187_v46  ;;  %v1262_v19 = vsel %vm1253_vm6, %v2834_v33, %v2186_v44 }
 0x126   : > { %v1322_v51 = vpack.c.bf16 %v1294_v15, %v1293_v47  ;;  %v2190_v52 = vpop.permute.xlu1 %2189  ;;  %v2195_v24 = vpop.permute.xlu0 %2194 }
 0x127   : > { %v2197_v62 = vunpack.i.h.bf16 %v2195_v24  ;;  %v2196_v3 = vunpack.i.l.bf16 %v2195_v24  ;;  %v2192_v30 = vunpack.i.h.bf16 %v2190_v52  ;;  %v2191_v0 = vunpack.i.l.bf16 %v2190_v52 }
 0x128   : > { %1925 = vmatmul.mubr.msk.bf16.gmra.mrb[4].mxu0 %vm1355_vm8, %v1322_v51 }
 0x129   : > { %v1295_v10 = vsel %vm1286_vm7, %v1262_v19, %v2196_v3  ;;  %v1296_v58 = vsel %vm1286_vm7, %v1263_v55, %v2197_v62  ;;  %v1265_v35 = vsel %vm1253_vm6, %v2851_v61, %v2192_v30  ;;  %v1264_v34 = vsel %vm1253_vm6, %v2848_v50, %v2191_v0 }
 0x12a   : > { %v1323_v23 = vpack.c.bf16 %v1296_v58, %v1295_v10  ;;  %v2200_v27 = vpop.permute.xlu1 %2199  ;;  %v2205_v4 = vpop.permute.xlu0 %2204 }
 0x12b   : > { %v2202_v25 = vunpack.i.h.bf16 %v2200_v27  ;;  %v2201_v49 = vunpack.i.l.bf16 %v2200_v27  ;;  %v2207_v53 = vunpack.i.h.bf16 %v2205_v4  ;;  %v2206_v40 = vunpack.i.l.bf16 %v2205_v4 }
 0x12c   : > { %1928 = vmatprep.mubr.msk.bf16.mxu0 %vm1355_vm8, %v1323_v23 }
 0x12d   : > { %v1297_v33 = vsel %vm1286_vm7, %v1264_v34, %v2201_v49  ;;  %v1298_v17 = vsel %vm1286_vm7, %v1265_v35, %v2202_v25  ;;  %v1267_v61 = vsel %vm1253_vm6, %v2865_v21, %v2207_v53  ;;  %v1266_v50 = vsel %vm1253_vm6, %v2862_v9, %v2206_v40 }
 0x12e   : > { %v1324_v6 = vpack.c.bf16 %v1298_v17, %v1297_v33 }
 0x130   : > { %1929 = vmatmul.mubr.msk.bf16.gmra.mrb[8].mxu0 %vm1355_vm8, %v1324_v6 }
 0x133   : > { %v2210_v12 = vpop.permute.xlu1 %2209  ;;  %v2215_v5 = vpop.permute.xlu0 %2214 }
 0x134   : > { %v2217_v59 = vunpack.i.h.bf16 %v2215_v5  ;;  %v2216_v38 = vunpack.i.l.bf16 %v2215_v5  ;;  %v2212_v22 = vunpack.i.h.bf16 %v2210_v12  ;;  %v2211_v63 = vunpack.i.l.bf16 %v2210_v12 }
 0x136   : > { %v1299_v60 = vsel %vm1286_vm7, %v1266_v50, %v2216_v38  ;;  %v1300_v39 = vsel %vm1286_vm7, %v1267_v61, %v2217_v59  ;;  %v1269_v56 = vsel %vm1253_vm6, %v2879_v29, %v2212_v22  ;;  %v1268_v21 = vsel %vm1253_vm6, %v2876_v28, %v2211_v63 }
 0x137   : > { %v1325_v1 = vpack.c.bf16 %v1300_v39, %v1299_v60  ;;  %v2220_v7 = vpop.permute.xlu1 %2219  ;;  %v2225_v42 = vpop.permute.xlu0 %2224 }
 0x138   : > { %v2222_v43 = vunpack.i.h.bf16 %v2220_v7  ;;  %v2221_v54 = vunpack.i.l.bf16 %v2220_v7  ;;  %v2227_v46 = vunpack.i.h.bf16 %v2225_v42  ;;  %v2226_v44 = vunpack.i.l.bf16 %v2225_v42 }
 0x139   : > { %1932 = vmatprep.mubr.msk.bf16.mxu0 %vm1355_vm8, %v1325_v1 }
 0x13a   : > { %v1301_v9 = vsel %vm1286_vm7, %v1268_v21, %v2221_v54  ;;  %v1302_v18 = vsel %vm1286_vm7, %v1269_v56, %v2222_v43  ;;  %v1270_v29 = vsel %vm1253_vm6, %v2890_v13, %v2226_v44  ;;  %v1271_v28 = vsel %vm1253_vm6, %v2893_v45, %v2227_v46 }
 0x13b   : > { %v1326_v47 = vpack.c.bf16 %v1302_v18, %v1301_v9 }
 0x13c   : > { %v2235_v15 = vpop.permute.xlu0 %2234  ;;  %v2230_v51 = vpop.permute.xlu1 %2229 }
 0x13d   : > { %v2237_v52 = vunpack.i.h.bf16 %v2235_v15  ;;  %v2236_v24 = vunpack.i.l.bf16 %v2235_v15  ;;  %1933 = vmatmul.mubr.msk.bf16.gmra.mrb[12].mxu0 %vm1355_vm8, %v1326_v47  ;;  %v2232_v19 = vunpack.i.h.bf16 %v2230_v51  ;;  %v2231_v30 = vunpack.i.l.bf16 %v2230_v51 }
 0x13f   : > { %v1303_v62 = vsel %vm1286_vm7, %v1270_v29, %v2236_v24  ;;  %v1304_v3 = vsel %vm1286_vm7, %v1271_v28, %v2237_v52  ;;  %v1273_v27 = vsel %vm1253_vm6, %v2907_v31, %v2232_v19  ;;  %v1272_v13 = vsel %vm1253_vm6, %v2904_v14, %v2231_v30 }
 0x140   : > { %v1327_v55 = vpack.c.bf16 %v1304_v3, %v1303_v62 }
 0x142   : > { %1936 = vmatprep.mubr.msk.bf16.mxu1 %vm1355_vm8, %v1327_v55 }
 0x143   : > { %v2240_v0 = vpop.permute.xlu1 %2239  ;;  %v2245_v10 = vpop.permute.xlu0 %2244 }
 0x144   : > { %v2242_v58 = vunpack.i.h.bf16 %v2240_v0  ;;  %v2241_v23 = vunpack.i.l.bf16 %v2240_v0  ;;  %v2247_v35 = vunpack.i.h.bf16 %v2245_v10  ;;  %v2246_v34 = vunpack.i.l.bf16 %v2245_v10 }
 0x146   : > { %v1305_v45 = vsel %vm1286_vm7, %v1272_v13, %v2241_v23  ;;  %v1306_v25 = vsel %vm1286_vm7, %v1273_v27, %v2242_v58  ;;  %v1275_v53 = vsel %vm1253_vm6, %v2921_v26, %v2247_v35  ;;  %v1274_v31 = vsel %vm1253_vm6, %v2918_v2, %v2246_v34 }
 0x147   : > { %v1328_v49 = vpack.c.bf16 %v1306_v25, %v1305_v45 }
 0x149   : > { %v2250_v33 = vpop.permute.xlu1 %2249  ;;  %v2255_v17 = vpop.permute.xlu0 %2254  ;;  %1937 = vmatmul.mubr.msk.bf16.vlgmr.msra.gmra.mrb[0].mxu1 %vm1355_vm8, %v1328_v49 }
 0x14a   : > { %v2257_v4 = vunpack.i.h.bf16 %v2255_v17  ;;  %v2256_v6 = vunpack.i.l.bf16 %v2255_v17  ;;  %v2252_v14 = vunpack.i.h.bf16 %v2250_v33  ;;  %v2251_v40 = vunpack.i.l.bf16 %v2250_v33 }
 0x14c   : > { %v1307_v12 = vsel %vm1286_vm7, %v1274_v31, %v2256_v6  ;;  %v1308_v5 = vsel %vm1286_vm7, %v1275_v53, %v2257_v4  ;;  %v1277_v22 = vsel %vm1253_vm6, %v2935_v41, %v2252_v14  ;;  %v1276_v63 = vsel %vm1253_vm6, %v2932_v37, %v2251_v40 }
 0x14d   : > { %v1329_v59 = vpack.c.bf16 %v1308_v5, %v1307_v12  ;;  %v2260_v38 = vpop.permute.xlu1 %2259  ;;  %v2265_v60 = vpop.permute.xlu0 %2264 }
 0x14e   : > { %v2262_v61 = vunpack.i.h.bf16 %v2260_v38  ;;  %v2261_v50 = vunpack.i.l.bf16 %v2260_v38  ;;  %v2267_v1 = vunpack.i.h.bf16 %v2265_v60  ;;  %v2266_v7 = vunpack.i.l.bf16 %v2265_v60 }
 0x14f   : > { %1940 = vmatprep.mubr.msk.bf16.mxu1 %vm1355_vm8, %v1329_v59 }
 0x150   : > { %v1309_v2 = vsel %vm1286_vm7, %v1276_v63, %v2261_v50  ;;  %v1310_v26 = vsel %vm1286_vm7, %v1277_v22, %v2262_v61  ;;  %v1279_v41 = vsel %vm1253_vm6, %v2949_v57, %v2267_v1  ;;  %v1278_v37 = vsel %vm1253_vm6, %v2946_v11, %v2266_v7 }
 0x151   : > { %v1330_v39 = vpack.c.bf16 %v1310_v26, %v1309_v2 }
 0x153   : > { %1941 = vmatmul.mubr.msk.bf16.gmra.mrb[4].mxu1 %vm1355_vm8, %v1330_v39 }
 0x156   : > { %v2270_v42 = vpop.permute.xlu1 %2269  ;;  %v2275_v43 = vpop.permute.xlu0 %2274 }
 0x157   : > { %v2277_v54 = vunpack.i.h.bf16 %v2275_v43  ;;  %v2276_v56 = vunpack.i.l.bf16 %v2275_v43  ;;  %v2272_v21 = vunpack.i.h.bf16 %v2270_v42  ;;  %v2271_v9 = vunpack.i.l.bf16 %v2270_v42 }
 0x159   : > { %v1311_v18 = vsel %vm1286_vm7, %v1278_v37, %v2276_v56  ;;  %v1312_v46 = vsel %vm1286_vm7, %v1279_v41, %v2277_v54  ;;  %v1281_v24 = vsel %vm1253_vm6, %v2963_v20, %v2272_v21  ;;  %v1280_v57 = vsel %vm1253_vm6, %v2960_v32, %v2271_v9 }
 0x15a   : > { %v1331_v44 = vpack.c.bf16 %v1312_v46, %v1311_v18  ;;  %v2280_v47 = vpop.permute.xlu1 %2279  ;;  %v2285_v15 = vpop.permute.xlu0 %2284 }
 0x15b   : > { %v2282_v51 = vunpack.i.h.bf16 %v2280_v47  ;;  %v2281_v52 = vunpack.i.l.bf16 %v2280_v47  ;;  %v2287_v28 = vunpack.i.h.bf16 %v2285_v15  ;;  %v2286_v62 = vunpack.i.l.bf16 %v2285_v15 }
 0x15c   : > { %1944 = vmatprep.mubr.msk.bf16.mxu1 %vm1355_vm8, %v1331_v44 }
 0x15d   : > { %v1313_v11 = vsel %vm1286_vm7, %v1280_v57, %v2281_v52  ;;  %v1314_v29 = vsel %vm1286_vm7, %v1281_v24, %v2282_v51  ;;  %v1283_v20 = vsel %vm1253_vm6, %v2981_v48, %v2287_v28  ;;  %v1282_v32 = vsel %vm1253_vm6, %v2978_v8, %v2286_v62 }
 0x15e   : > { %v1332_v3 = vpack.c.bf16 %v1314_v29, %v1313_v11 }
 0x15f   : > { %v2290_v55 = vpop.permute.xlu1 %2289  ;;  %v2295_v19 = vpop.permute.xlu0 %2294 }
 0x160   : > { %v2297_v30 = vunpack.i.h.bf16 %v2295_v19  ;;  %v2296_v0 = vunpack.i.l.bf16 %v2295_v19  ;;  %1945 = vmatmul.mubr.msk.bf16.gmra.mrb[8].mxu1 %vm1355_vm8, %v1332_v3  ;;  %v2292_v10 = vunpack.i.h.bf16 %v2290_v55  ;;  %v2291_v58 = vunpack.i.l.bf16 %v2290_v55 }
 0x162   : > { %v1315_v23 = vsel %vm1286_vm7, %v1282_v32, %v2296_v0  ;;  %v1316_v27 = vsel %vm1286_vm7, %v1283_v20, %v2297_v30  ;;  %v1285_v35 = vsel %vm1253_vm6, %v2991_v36, %v2292_v10  ;;  %v1284_v48 = vsel %vm1253_vm6, %v2988_v16, %v2291_v58 }
 0x163   : > { %v1333_v13 = vpack.c.bf16 %v1316_v27, %v1315_v23  ;;  %v2300_v45 = vpop.permute.xlu1 %2299 }
 0x164   : > { %v2302_v25 = vunpack.i.h.bf16 %v2300_v45  ;;  %v2301_v49 = vunpack.i.l.bf16 %v2300_v45 }
 0x165   : > { %1948 = vmatprep.mubr.msk.bf16.mxu1 %vm1355_vm8, %v1333_v13 }
 0x166   : > { %v1317_v8 = vsel %vm1286_vm7, %v1284_v48, %v2301_v49  ;;  %v1318_v34 = vsel %vm1286_vm7, %v1285_v35, %v2302_v25 }
 0x167   : > { %v1334_v33 = vpack.c.bf16 %v1318_v34, %v1317_v8 }
 0x169   : > { %1949 = vmatmul.mubr.msk.bf16.gmra.mrb[12].mxu1 %vm1355_vm8, %v1334_v33 }
 0x1ee   : > { %v1922_v16 = vpop.f32.mrb[0].mxu0 }
 0x1ef   : > { %1571 = vst.msk [vmem:[%s3127_s15 + $0x10] sm:$0xff] %vm957_vm3, %v1922_v16  ;;  %v1442_v36 = vpop.f32.mrb[1].mxu0  ;;  %v1672_v53 = vmul.f32 %v1922_v16, %v1922_v16  ;;  %v1604_v5 = vsel %vm957_vm3, %v1922_v16, 0.0 }
 0x1f0   : > { %1569 = vst.msk [vmem:[%s3127_s15] sm:$0xff] %vm957_vm3, %v1442_v36  ;;  %v1670_v17 = vmul.f32 %v1442_v36, %v1442_v36  ;;  %v1923_v4 = vpop.f32.mrb[2].mxu0  ;;  %v1601_v31 = vsel %vm957_vm3, %v1442_v36, 0.0 }
 0x1f1   : > { %1572 = vst.msk [vmem:[%s3127_s15 + $0x18] sm:$0xff] %vm957_vm3, %v1923_v4  ;;  %v1445_v6 = vpop.f32.mrb[3].mxu0  ;;  %v1673_v38 = vmul.f32 %v1923_v4, %v1923_v4  ;;  %v1705_v63 = vsel %vm957_vm3, %v1672_v53, 0.0  ;;  %v1606_v2 = vsel %vm957_vm3, %v1923_v4, 0.0 }
 0x1f2   : > { %1570 = vst.msk [vmem:[%s3127_s15 + $0x8] sm:$0xff] %vm957_vm3, %v1445_v6  ;;  %v1602_v14 = vsel %vm957_vm3, %v1445_v6, 0.0  ;;  %v1671_v40 = vmul.f32 %v1445_v6, %v1445_v6  ;;  %v1702_v59 = vsel %vm957_vm3, %v1670_v17, 0.0 }
 0x1f3   : > { %v1603_v12 = vadd.f32 %v1602_v14, %v1601_v31  ;;  %v1707_v39 = vsel %vm957_vm3, %v1673_v38, 0.0 }
 0x1f4   : > { %v1703_v61 = vsel %vm957_vm3, %v1671_v40, 0.0 }
 0x1f5   : > { %v1605_v50 = vadd.f32 %v1604_v5, %v1603_v12  ;;  %v1704_v22 = vadd.f32 %v1703_v61, %v1702_v59 }
 0x1f7   : > { %v1706_v26 = vadd.f32 %v1705_v63, %v1704_v22  ;;  %v1607_v60 = vadd.f32 %v1606_v2, %v1605_v50 }
 0x1f9   : > { %v1708_v1 = vadd.f32 %v1707_v39, %v1706_v26 }
 0x1fb   : > { %v1926_v7 = vpop.f32.mrb[4].mxu0 }
 0x1fc   : > { %1575 = vst.msk [vmem:[%s3127_s15 + $0x30] sm:$0xff] %vm957_vm3, %v1926_v7  ;;  %v1458_v42 = vpop.f32.mrb[5].mxu0  ;;  %v1676_v21 = vmul.f32 %v1926_v7, %v1926_v7  ;;  %v1612_v15 = vsel %vm957_vm3, %v1926_v7, 0.0 }
 0x1fd   : > { %1573 = vst.msk [vmem:[%s3127_s15 + $0x20] sm:$0xff] %vm957_vm3, %v1458_v42  ;;  %v1608_v43 = vsel %vm957_vm3, %v1458_v42, 0.0  ;;  %v1674_v54 = vmul.f32 %v1458_v42, %v1458_v42  ;;  %v1927_v56 = vpop.f32.mrb[6].mxu0 }
 0x1fe   : > { %v1609_v41 = vadd.f32 %v1608_v43, %v1607_v60  ;;  %1576 = vst.msk [vmem:[%s3127_s15 + $0x38] sm:$0xff] %vm957_vm3, %v1927_v56  ;;  %v1461_v37 = vpop.f32.mrb[7].mxu0  ;;  %v1677_v51 = vmul.f32 %v1927_v56, %v1927_v56  ;;  %v1713_v11 = vsel %vm957_vm3, %v1676_v21, 0.0  ;;  %v1614_v29 = vsel %vm957_vm3, %v1927_v56, 0.0 }
 0x1ff   : > { %v1709_v9 = vsel %vm957_vm3, %v1674_v54, 0.0  ;;  %1574 = vst.msk [vmem:[%s3127_s15 + $0x28] sm:$0xff] %vm957_vm3, %v1461_v37  ;;  %v1610_v18 = vsel %vm957_vm3, %v1461_v37, 0.0  ;;  %v1675_v46 = vmul.f32 %v1461_v37, %v1461_v37 }
 0x200   : > { %v1710_v44 = vadd.f32 %v1709_v9, %v1708_v1  ;;  %v1611_v47 = vadd.f32 %v1610_v18, %v1609_v41  ;;  %v1715_v19 = vsel %vm957_vm3, %v1677_v51, 0.0 }
 0x201   : > { %v1711_v52 = vsel %vm957_vm3, %v1675_v46, 0.0 }
 0x202   : > { %v1613_v24 = vadd.f32 %v1612_v15, %v1611_v47  ;;  %v1712_v57 = vadd.f32 %v1711_v52, %v1710_v44 }
 0x203   : > { %v1930_v28 = vpop.f32.mrb[8].mxu0 }
 0x204   : > { %v1714_v62 = vadd.f32 %v1713_v11, %v1712_v57  ;;  %1579 = vst.msk [vmem:[%s3127_s15 + $0x50] sm:$0xff] %vm957_vm3, %v1930_v28  ;;  %v1474_v3 = vpop.f32.mrb[9].mxu0  ;;  %v1615_v55 = vadd.f32 %v1614_v29, %v1613_v24  ;;  %v1680_v23 = vmul.f32 %v1930_v28, %v1930_v28  ;;  %v1620_v35 = vsel %vm957_vm3, %v1930_v28, 0.0 }
 0x205   : > { %1577 = vst.msk [vmem:[%s3127_s15 + $0x40] sm:$0xff] %vm957_vm3, %v1474_v3  ;;  %v1616_v30 = vsel %vm957_vm3, %v1474_v3, 0.0  ;;  %v1678_v0 = vmul.f32 %v1474_v3, %v1474_v3  ;;  %v1931_v20 = vpop.f32.mrb[10].mxu0 }
 0x206   : > { %v1617_v32 = vadd.f32 %v1616_v30, %v1615_v55  ;;  %v1716_v10 = vadd.f32 %v1715_v19, %v1714_v62  ;;  %1580 = vst.msk [vmem:[%s3127_s15 + $0x58] sm:$0xff] %vm957_vm3, %v1931_v20  ;;  %v1477_v58 = vpop.f32.mrb[11].mxu0  ;;  %v1681_v48 = vmul.f32 %v1931_v20, %v1931_v20  ;;  %v1721_v16 = vsel %vm957_vm3, %v1680_v23, 0.0 }
 0x207   : > { %v1717_v27 = vsel %vm957_vm3, %v1678_v0, 0.0  ;;  %1578 = vst.msk [vmem:[%s3127_s15 + $0x48] sm:$0xff] %vm957_vm3, %v1477_v58  ;;  %v1618_v13 = vsel %vm957_vm3, %v1477_v58, 0.0  ;;  %v1679_v45 = vmul.f32 %v1477_v58, %v1477_v58  ;;  %v1622_v36 = vsel %vm957_vm3, %v1931_v20, 0.0 }
 0x208   : > { %v1718_v25 = vadd.f32 %v1717_v27, %v1716_v10  ;;  %v1619_v49 = vadd.f32 %v1618_v13, %v1617_v32  ;;  %v1723_v6 = vsel %vm957_vm3, %v1681_v48, 0.0 }
 0x209   : > { %v1719_v8 = vsel %vm957_vm3, %v1679_v45, 0.0 }
 0x20a   : > { %v1621_v34 = vadd.f32 %v1620_v35, %v1619_v49  ;;  %v1720_v33 = vadd.f32 %v1719_v8, %v1718_v25 }
 0x20c   : > { %v1722_v17 = vadd.f32 %v1721_v16, %v1720_v33  ;;  %v1623_v4 = vadd.f32 %v1622_v36, %v1621_v34 }
 0x20e   : > { %v1724_v53 = vadd.f32 %v1723_v6, %v1722_v17 }
 0x210   : > { %v1934_v31 = vpop.f32.mrb[12].mxu0 }
 0x211   : > { %1583 = vst.msk [vmem:[%s3127_s15 + $0x70] sm:$0xff] %vm957_vm3, %v1934_v31  ;;  %v1490_v14 = vpop.f32.mrb[13].mxu0  ;;  %v1684_v61 = vmul.f32 %v1934_v31, %v1934_v31  ;;  %v1628_v60 = vsel %vm957_vm3, %v1934_v31, 0.0 }
 0x212   : > { %1581 = vst.msk [vmem:[%s3127_s15 + $0x60] sm:$0xff] %vm957_vm3, %v1490_v14  ;;  %v1624_v40 = vsel %vm957_vm3, %v1490_v14, 0.0  ;;  %v1682_v12 = vmul.f32 %v1490_v14, %v1490_v14  ;;  %v1935_v5 = vpop.f32.mrb[14].mxu0 }
 0x213   : > { %v1625_v59 = vadd.f32 %v1624_v40, %v1623_v4  ;;  %1584 = vst.msk [vmem:[%s3127_s15 + $0x78] sm:$0xff] %vm957_vm3, %v1935_v5  ;;  %v1493_v38 = vpop.f32.mrb[15].mxu0  ;;  %v1685_v39 = vmul.f32 %v1935_v5, %v1935_v5  ;;  %v1729_v43 = vsel %vm957_vm3, %v1684_v61, 0.0  ;;  %v1630_v54 = vsel %vm957_vm3, %v1935_v5, 0.0 }
 0x214   : > { %v1725_v50 = vsel %vm957_vm3, %v1682_v12, 0.0  ;;  %1582 = vst.msk [vmem:[%s3127_s15 + $0x68] sm:$0xff] %vm957_vm3, %v1493_v38  ;;  %v1626_v22 = vsel %vm957_vm3, %v1493_v38, 0.0  ;;  %v1683_v63 = vmul.f32 %v1493_v38, %v1493_v38 }
 0x215   : > { %v1726_v2 = vadd.f32 %v1725_v50, %v1724_v53  ;;  %v1627_v26 = vadd.f32 %v1626_v22, %v1625_v59  ;;  %v1731_v37 = vsel %vm957_vm3, %v1685_v39, 0.0 }
 0x216   : > { %v1727_v1 = vsel %vm957_vm3, %v1683_v63, 0.0 }
 0x217   : > { %v1629_v7 = vadd.f32 %v1628_v60, %v1627_v26  ;;  %v1728_v42 = vadd.f32 %v1727_v1, %v1726_v2 }
 0x219   : > { %v1730_v56 = vadd.f32 %v1729_v43, %v1728_v42  ;;  %v1631_v41 = vadd.f32 %v1630_v54, %v1629_v7 }
 0x21b   : > { %v1732_v21 = vadd.f32 %v1731_v37, %v1730_v56 }
 0x21c   : > { %v1938_v9 = vpop.f32.mrb[0].mxu1 }
 0x21d   : > { %1587 = vst.msk [vmem:[%s3127_s15 + $0x90] sm:$0xff] %vm957_vm3, %v1938_v9  ;;  %v1506_v18 = vpop.f32.mrb[1].mxu1  ;;  %v1688_v52 = vmul.f32 %v1938_v9, %v1938_v9  ;;  %v1636_v62 = vsel %vm957_vm3, %v1938_v9, 0.0 }
 0x21e   : > { %1585 = vst.msk [vmem:[%s3127_s15 + $0x80] sm:$0xff] %vm957_vm3, %v1506_v18  ;;  %v1632_v46 = vsel %vm957_vm3, %v1506_v18, 0.0  ;;  %v1686_v44 = vmul.f32 %v1506_v18, %v1506_v18  ;;  %v1939_v47 = vpop.f32.mrb[2].mxu1 }
 0x21f   : > { %v1633_v15 = vadd.f32 %v1632_v46, %v1631_v41  ;;  %1588 = vst.msk [vmem:[%s3127_s15 + $0x98] sm:$0xff] %vm957_vm3, %v1939_v47  ;;  %v1509_v51 = vpop.f32.mrb[3].mxu1  ;;  %v1689_v3 = vmul.f32 %v1939_v47, %v1939_v47  ;;  %v1737_v0 = vsel %vm957_vm3, %v1688_v52, 0.0  ;;  %v1638_v20 = vsel %vm957_vm3, %v1939_v47, 0.0 }
 0x220   : > { %v1733_v24 = vsel %vm957_vm3, %v1686_v44, 0.0  ;;  %1586 = vst.msk [vmem:[%s3127_s15 + $0x88] sm:$0xff] %vm957_vm3, %v1509_v51  ;;  %v1634_v57 = vsel %vm957_vm3, %v1509_v51, 0.0  ;;  %v1687_v11 = vmul.f32 %v1509_v51, %v1509_v51 }
 0x221   : > { %v1734_v29 = vadd.f32 %v1733_v24, %v1732_v21  ;;  %v1635_v28 = vadd.f32 %v1634_v57, %v1633_v15  ;;  %v1739_v58 = vsel %vm957_vm3, %v1689_v3, 0.0 }
 0x222   : > { %v1735_v55 = vsel %vm957_vm3, %v1687_v11, 0.0 }
 0x223   : > { %v1637_v19 = vadd.f32 %v1636_v62, %v1635_v28  ;;  %v1736_v30 = vadd.f32 %v1735_v55, %v1734_v29 }
 0x225   : > { %v1738_v32 = vadd.f32 %v1737_v0, %v1736_v30  ;;  %v1639_v10 = vadd.f32 %v1638_v20, %v1637_v19 }
 0x226   : > { %v1942_v23 = vpop.f32.mrb[4].mxu1 }
 0x227   : > { %1591 = vst.msk [vmem:[%s3127_s15 + $0xb0] sm:$0xff] %vm957_vm3, %v1942_v23  ;;  %v1522_v27 = vpop.f32.mrb[5].mxu1  ;;  %v1740_v13 = vadd.f32 %v1739_v58, %v1738_v32  ;;  %v1692_v8 = vmul.f32 %v1942_v23, %v1942_v23  ;;  %v1644_v4 = vsel %vm957_vm3, %v1942_v23, 0.0 }
 0x228   : > { %1589 = vst.msk [vmem:[%s3127_s15 + $0xa0] sm:$0xff] %vm957_vm3, %v1522_v27  ;;  %v1640_v45 = vsel %vm957_vm3, %v1522_v27, 0.0  ;;  %v1690_v25 = vmul.f32 %v1522_v27, %v1522_v27  ;;  %v1943_v49 = vpop.f32.mrb[6].mxu1 }
 0x229   : > { %v1641_v35 = vadd.f32 %v1640_v45, %v1639_v10  ;;  %1592 = vst.msk [vmem:[%s3127_s15 + $0xb8] sm:$0xff] %vm957_vm3, %v1943_v49  ;;  %v1525_v48 = vpop.f32.mrb[7].mxu1  ;;  %v1693_v6 = vmul.f32 %v1943_v49, %v1943_v49  ;;  %v1745_v40 = vsel %vm957_vm3, %v1692_v8, 0.0  ;;  %v1646_v12 = vsel %vm957_vm3, %v1943_v49, 0.0 }
 0x22a   : > { %v1741_v34 = vsel %vm957_vm3, %v1690_v25, 0.0  ;;  %1590 = vst.msk [vmem:[%s3127_s15 + $0xa8] sm:$0xff] %vm957_vm3, %v1525_v48  ;;  %v1642_v33 = vsel %vm957_vm3, %v1525_v48, 0.0  ;;  %v1691_v16 = vmul.f32 %v1525_v48, %v1525_v48 }
 0x22b   : > { %v1742_v36 = vadd.f32 %v1741_v34, %v1740_v13  ;;  %v1643_v17 = vadd.f32 %v1642_v33, %v1641_v35  ;;  %v1747_v38 = vsel %vm957_vm3, %v1693_v6, 0.0 }
 0x22c   : > { %v1743_v53 = vsel %vm957_vm3, %v1691_v16, 0.0 }
 0x22d   : > { %v1645_v31 = vadd.f32 %v1644_v4, %v1643_v17  ;;  %v1744_v14 = vadd.f32 %v1743_v53, %v1742_v36 }
 0x22f   : > { %v1746_v5 = vadd.f32 %v1745_v40, %v1744_v14  ;;  %v1647_v59 = vadd.f32 %v1646_v12, %v1645_v31 }
 0x231   : > { %v1748_v61 = vadd.f32 %v1747_v38, %v1746_v5 }
 0x233   : > { %v1946_v50 = vpop.f32.mrb[8].mxu1 }
 0x234   : > { %1595 = vst.msk [vmem:[%s3127_s15 + $0xd0] sm:$0xff] %vm957_vm3, %v1946_v50  ;;  %v1538_v22 = vpop.f32.mrb[9].mxu1  ;;  %v1696_v1 = vmul.f32 %v1946_v50, %v1946_v50  ;;  %v1652_v41 = vsel %vm957_vm3, %v1946_v50, 0.0 }
 0x235   : > { %1593 = vst.msk [vmem:[%s3127_s15 + $0xc0] sm:$0xff] %vm957_vm3, %v1538_v22  ;;  %v1648_v63 = vsel %vm957_vm3, %v1538_v22, 0.0  ;;  %v1694_v2 = vmul.f32 %v1538_v22, %v1538_v22  ;;  %v1947_v26 = vpop.f32.mrb[10].mxu1 }
 0x236   : > { %v1649_v60 = vadd.f32 %v1648_v63, %v1647_v59  ;;  %1596 = vst.msk [vmem:[%s3127_s15 + $0xd8] sm:$0xff] %vm957_vm3, %v1947_v26  ;;  %v1541_v39 = vpop.f32.mrb[11].mxu1  ;;  %v1697_v37 = vmul.f32 %v1947_v26, %v1947_v26  ;;  %v1753_v46 = vsel %vm957_vm3, %v1696_v1, 0.0  ;;  %v1654_v44 = vsel %vm957_vm3, %v1947_v26, 0.0 }
 0x237   : > { %v1749_v7 = vsel %vm957_vm3, %v1694_v2, 0.0  ;;  %1594 = vst.msk [vmem:[%s3127_s15 + $0xc8] sm:$0xff] %vm957_vm3, %v1541_v39  ;;  %v1650_v42 = vsel %vm957_vm3, %v1541_v39, 0.0  ;;  %v1695_v43 = vmul.f32 %v1541_v39, %v1541_v39 }
 0x238   : > { %v1750_v54 = vadd.f32 %v1749_v7, %v1748_v61  ;;  %v1651_v56 = vadd.f32 %v1650_v42, %v1649_v60  ;;  %v1755_v52 = vsel %vm957_vm3, %v1697_v37, 0.0 }
 0x239   : > { %v1751_v21 = vsel %vm957_vm3, %v1695_v43, 0.0 }
 0x23a   : > { %v1653_v9 = vadd.f32 %v1652_v41, %v1651_v56  ;;  %v1752_v18 = vadd.f32 %v1751_v21, %v1750_v54 }
 0x23c   : > { %v1754_v47 = vadd.f32 %v1753_v46, %v1752_v18  ;;  %v1950_v15 = vpop.f32.mrb[12].mxu1  ;;  %v1655_v51 = vadd.f32 %v1654_v44, %v1653_v9 }
 0x23d   : > { %1599 = vst.msk [vmem:[%s3127_s15 + $0xf0] sm:$0xff] %vm957_vm3, %v1950_v15  ;;  %v1554_v24 = vpop.f32.mrb[13].mxu1  ;;  %v1700_v55 = vmul.f32 %v1950_v15, %v1950_v15  ;;  %v1660_v10 = vsel %vm957_vm3, %v1950_v15, 0.0 }
 0x23e   : > { %1597 = vst.msk [vmem:[%s3127_s15 + $0xe0] sm:$0xff] %vm957_vm3, %v1554_v24  ;;  %v1656_v57 = vsel %vm957_vm3, %v1554_v24, 0.0  ;;  %v1698_v11 = vmul.f32 %v1554_v24, %v1554_v24  ;;  %v1756_v29 = vadd.f32 %v1755_v52, %v1754_v47  ;;  %v1951_v28 = vpop.f32.mrb[14].mxu1 }
 0x23f   : > { %v1657_v62 = vadd.f32 %v1656_v57, %v1655_v51  ;;  %1600 = vst.msk [vmem:[%s3127_s15 + $0xf8] sm:$0xff] %vm957_vm3, %v1951_v28  ;;  %v1557_v3 = vpop.f32.mrb[15].mxu1  ;;  %v1701_v58 = vmul.f32 %v1951_v28, %v1951_v28  ;;  %v1761_v45 = vsel %vm957_vm3, %v1700_v55, 0.0  ;;  %v1662_v25 = vsel %vm957_vm3, %v1951_v28, 0.0 }
 0x240   : > { %v1757_v19 = vsel %vm957_vm3, %v1698_v11, 0.0  ;;  %1598 = vst.msk [vmem:[%s3127_s15 + $0xe8] sm:$0xff] %vm957_vm3, %v1557_v3  ;;  %v1658_v30 = vsel %vm957_vm3, %v1557_v3, 0.0  ;;  %v1699_v0 = vmul.f32 %v1557_v3, %v1557_v3 }
 0x241   : > { %v1758_v20 = vadd.f32 %v1757_v19, %v1756_v29  ;;  %v1659_v32 = vadd.f32 %v1658_v30, %v1657_v62  ;;  %v1763_v48 = vsel %vm957_vm3, %v1701_v58, 0.0 }
 0x242   : > { %v1759_v23 = vsel %vm957_vm3, %v1699_v0, 0.0 }
 0x243   : > { %v1661_v27 = vadd.f32 %v1660_v10, %v1659_v32  ;;  %v1760_v13 = vadd.f32 %v1759_v23, %v1758_v20 }
 0x245   : > { %v1663_v49 = vadd.f32 %v1662_v25, %v1661_v27  ;;  %v1762_v35 = vadd.f32 %v1761_v45, %v1760_v13 }
 0x247   : > { %v1664_v8 = vrot.slane %v1663_v49, 4  ;;  %v1764_v34 = vadd.f32 %v1763_v48, %v1762_v35 }
 0x249   : > { %v1665_v33 = vadd.f32 %v1664_v8, %v1663_v49  ;;  %v1765_v16 = vrot.slane %v1764_v34, 4 }
 0x24b   : > { %v1666_v36 = vrot.slane %v1665_v33, 2  ;;  %v1766_v17 = vadd.f32 %v1765_v16, %v1764_v34 }
 0x24d   : > { %v1667_v4 = vadd.f32 %v1666_v36, %v1665_v33  ;;  %v1767_v6 = vrot.slane %v1766_v17, 2 }
 0x24f   : > { %v1668_v53 = vrot.slane %v1667_v4, 1  ;;  %v1768_v31 = vadd.f32 %v1767_v6, %v1766_v17 }
 0x251   : > { %v1769_v14 = vrot.slane %v1768_v31, 1  ;;  %v1669_v40 = vadd.f32 %v1668_v53, %v1667_v4 }
 0x253   : > { %v1770_v12 = vadd.f32 %v1769_v14, %v1768_v31 }
 0x255   : > { %v1771_v5 = vsel %vm412_vm0, %v1669_v40, %v1770_v12 }
 0x256   : > { %1773 = vst.msk [vmem:[%s235_s21] sm:$0x3] %vm1772_vm9, %v1771_v5 }
 0x257 PF: > { %s16_s18 = sadd.s32 1, %s2312_s18  }
 0x258   : > { %p13_p4 = scmp.ge.s32.totalorder %s16_s18, 4  }
 0x25a   :  { %15 = sbr.rel (!%p13_p4) target bundleno = 1 (0x1), region = 78 }

</bundles_post_ra>
